<compile_context>
chip_gen: v5e
topology: v5e:2x2
jax: 0.10.0
libtpu: 0.0.40
codegen_flags: <defaults>
</compile_context>

<pallas_src>
import functools

import jax
import jax.numpy as jnp
from jax.experimental import pallas as pl
from jax.experimental.pallas import tpu as pltpu


def edge_features_kernel(e_ref, uw_ref, vxcol_ref, vxrow_ref, out_ref, *,
                         row_chunk, compute_dtype):
    # e_ref:     (1, H, TI*N)   rows [i0, i0+TI) of e[b], flattened over (i, j)
    # uw_ref:    (H, H)         U weight (out_ch, in_ch)
    # vxcol_ref: (1, H, N)      Vx[b] + b_U  (column / j term, all j)
    # vxrow_ref: (1, 1, H, TI)  Vx[b, :, i0:i0+TI]  (row / i term of this tile)
    # out_ref:   (1, H, TI*N)
    N = vxcol_ref.shape[2]
    T = e_ref.shape[2]
    TI = T // N

    uw = uw_ref[...].astype(compute_dtype)        # (H, H), resident across chunks
    colb = vxcol_ref[0]                           # (H, N)  f32, hoisted
    vxi = vxrow_ref[0, 0]                         # (H, TI) f32, hoisted

    if N % 128 == 0:
        # Lane-aligned path: one MXU matmul per R-row chunk instead of TI tiny
        # per-row dots (amortizes MXU weight pushes / result pops). All slice
        # offsets are static multiples of 128 -> plain unmasked loads/stores.
        R = row_chunk
        CN = R * N
        for c in range(TI // R):
            lo = c * CN
            e_chunk = e_ref[0, :, lo:lo + CN].astype(compute_dtype)
            ue = jnp.dot(uw, e_chunk,
                         preferred_element_type=jnp.float32)       # (H, R*N)
            for r in range(R):
                s = r * N
                row = vxi[:, c * R + r:c * R + r + 1]               # (H, 1): Vx_i
                out_ref[0, :, lo + s:lo + s + N] = (
                    ue[:, s:s + N] + colb + row).astype(out_ref.dtype)
    else:
        # Tiny / unaligned-N fallback (masked partial stores; plain XLA would
        # win at these sizes, kept only for completeness & correctness).
        for r in range(TI):
            lo = r * N
            ue = jnp.dot(uw, e_ref[0, :, lo:lo + N].astype(compute_dtype),
                         preferred_element_type=jnp.float32)        # (H, N)
            out_ref[0, :, lo:lo + N] = (
                ue + colb + vxi[:, r:r + 1]).astype(out_ref.dtype)


def _vmem_capacity_bytes():
    """Per-TensorCore VMEM capacity; conservative (v7x) fallback if unknown."""
    try:
        cap = getattr(pltpu.get_tpu_info(), "vmem_capacity_bytes", None)
        if cap:
            return int(cap)
    except Exception:
        pass
    return 64 << 20


def _auto_row_tile(N, H, itemsize, batch, target_bytes, min_steps, max_rows):
    """Largest TI dividing N with a legal lane-dense block, a tile of at most
    target_bytes, and (if achievable) at least min_steps parallel grid steps."""
    candidates = []
    for ti in range(1, min(N, max_rows) + 1):
        if N % ti:
            continue
        if (ti * N) % 128 != 0 and ti != N:
            continue
        if H * ti * N * itemsize > target_bytes:
            continue
        candidates.append(ti)
    if not candidates:  # smallest legal tile, ignoring the byte budget
        for ti in range(1, N + 1):
            if N % ti == 0 and ((ti * N) % 128 == 0 or ti == N):
                candidates.append(ti)
                break
    enough = [ti for ti in candidates if batch * (N // ti) >= min_steps]
    return max(enough) if enough else max(candidates)


def _auto_row_chunk(TI, N):
    """Rows per in-kernel MXU chunk: largest divisor of TI <= 8 with a
    128-aligned lane width; falls back to TI (single chunk) for tiny N."""
    best = None
    for r in range(1, min(TI, 8) + 1):
        if TI % r == 0 and (r * N) % 128 == 0:
            best = r
    return best if best is not None else TI


def _e_in_spec(block_shape, index_map, buffers):
    if buffers > 2:
        try:
            return pl.BlockSpec(block_shape, index_map,
                                pipeline_mode=pl.Buffered(buffers))
        except Exception:
            pass
    return pl.BlockSpec(block_shape, index_map)


def edge_features(x, e, u_w, u_b, v_w, v_b, *, row_tile=None, row_chunk=None,
                  compute_dtype=jnp.float32):
    """x: (B, H, N); e: (B, H, N, N) (NCHW). Returns (B, H, N, N)."""
    B, H, N = x.shape
    assert e.shape == (B, H, N, N)

    uw = u_w.reshape(H, H).astype(jnp.float32)            # (out, in)
    vw = v_w.reshape(H, H).astype(jnp.float32)

    # Vx = V x + b_V once in XLA (tiny), then fold the U bias into the column
    # (j) term so the kernel never re-adds it per grid step.
    vx = (jnp.einsum('oc,bcn->bon', vw, x.astype(jnp.float32))
          + v_b.astype(jnp.float32)[None, :, None])        # (B, H, N)
    vx_col = vx + u_b.astype(jnp.float32)[None, :, None]   # j term (+ b_U)

    # Generation-aware sizing.
    vmem_cap = _vmem_capacity_bytes()
    small_vmem = vmem_cap <= (96 << 20)          # v7x-like: 64 MiB / TensorCore
    target_tile = (4 << 20) if small_vmem else (8 << 20)
    min_steps = 4 if small_vmem else 2           # keep both v7x TCs busy
    max_rows = 128 if N % 128 == 0 else 64

    if row_tile is None:
        TI = _auto_row_tile(N, H, e.dtype.itemsize, B, target_tile, min_steps,
                            max_rows)
    else:
        TI = int(row_tile)
    assert N % TI == 0, f"row_tile {TI} must divide N={N}"
    assert (TI * N) % 128 == 0 or TI == N, \
        f"row_tile {TI}: lane width {TI * N} must be a multiple of 128"
    T = TI * N

    R = int(row_chunk) if row_chunk is not None else _auto_row_chunk(TI, N)
    assert TI % R == 0, f"row_chunk {R} must divide row_tile {TI}"

    grid = (B, N // TI)
    num_steps = B * (N // TI)
    # Deeper buffering on the dominant e stream only where VMEM is plentiful
    # (v5e/v6e) and the grid is long enough for it to matter.
    e_buffers = 3 if (not small_vmem and num_steps > 3) else 2

    # Free reshape: e keeps its NCHW HBM layout, just flatten (i, j).
    e_flat = e.reshape(B, H, N * N)
    # Row (i) term, pre-chunked so every kernel block is statically indexed.
    vx_rows = vx.reshape(B, H, N // TI, TI).transpose(0, 2, 1, 3)  # (B,N//TI,H,TI)

    tile_bytes = H * T * e.dtype.itemsize
    aux_bytes = 2 * (H * N + H * TI + H * H) * 4 + (2 << 20)
    vmem_need = (e_buffers + 2) * tile_bytes + aux_bytes
    vmem_limit = int(min(max(int(1.5 * vmem_need), 16 << 20), vmem_cap // 2))

    cost = pl.CostEstimate(
        flops=2 * B * H * H * N * N + 2 * B * H * N * N,
        transcendentals=0,
        bytes_accessed=2 * e.size * e.dtype.itemsize + 2 * vx.size * 4 + uw.size * 4,
    )

    kernel = functools.partial(edge_features_kernel, row_chunk=R,
                               compute_dtype=compute_dtype)

    out_flat = pl.pallas_call(
        kernel,
        out_shape=jax.ShapeDtypeStruct((B, H, N * N), e.dtype),
        grid_spec=pltpu.PrefetchScalarGridSpec(
            num_scalar_prefetch=0,
            grid=grid,
            in_specs=[
                _e_in_spec((1, H, T), lambda b, i: (b, 0, i), e_buffers),   # e rows
                pl.BlockSpec((H, H),        lambda b, i: (0, 0)),           # U weight
                pl.BlockSpec((1, H, N),     lambda b, i: (b, 0, 0)),        # Vx_j + b_U
                pl.BlockSpec((1, 1, H, TI), lambda b, i: (b, i, 0, 0)),     # Vx_i
            ],
            out_specs=pl.BlockSpec((1, H, T), lambda b, i: (b, 0, i)),
        ),
        compiler_params=pltpu.CompilerParams(
            dimension_semantics=("parallel", "parallel"),
            vmem_limit_bytes=vmem_limit),
        cost_estimate=cost,
    )(e_flat, uw, vx_col, vx_rows)

    return out_flat.reshape(B, H, N, N)


def edge_features_ref(x, e, u_w, u_b, v_w, v_b):
    """Plain-JAX reference mirroring the PyTorch NCHW module exactly."""
    Ue = jnp.einsum('oc,bcij->boij', u_w[:, :, 0, 0], e) + u_b[None, :, None, None]
    Vx = jnp.einsum('oc,bcn->bon', v_w[:, :, 0], x) + v_b[None, :, None]
    return Ue + Vx[:, :, None, :] + Vx[:, :, :, None]


if __name__ == "__main__":
    B, H, N = 2, 32, 128
    key = jax.random.PRNGKey(0)
    k_x, k_e, k_uw, k_ub, k_vw, k_vb = jax.random.split(key, 6)

    # Module inputs (PyTorch NCHW / NCL convention).
    x = jax.random.normal(k_x, (B, H, N), dtype=jnp.float32)
    e = jax.random.normal(k_e, (B, H, N, N), dtype=jnp.float32)

    # Parameters with nn.Conv2d / nn.Conv1d shapes (kaiming-uniform-ish bound).
    bound = 1.0 / (H ** 0.5)
    u_w = jax.random.uniform(k_uw, (H, H, 1, 1), jnp.float32, -bound, bound)
    u_b = jax.random.uniform(k_ub, (H,), jnp.float32, -bound, bound)
    v_w = jax.random.uniform(k_vw, (H, H, 1), jnp.float32, -bound, bound)
    v_b = jax.random.uniform(k_vb, (H,), jnp.float32, -bound, bound)

    ref = edge_features_ref(x, e, u_w, u_b, v_w, v_b)

    # Auto-tiled f32 path (tile / buffering chosen from the VMEM budget).
    out = jax.block_until_ready(edge_features(x, e, u_w, u_b, v_w, v_b))
    assert out.shape == (B, H, N, N)
    assert jnp.allclose(out, ref, atol=1e-4, rtol=1e-4), "mismatch (auto tile)"

    # Explicit smaller row tile -> exercises grid (B, N//TI) = (2, 4).
    out_t = jax.block_until_ready(
        edge_features(x, e, u_w, u_b, v_w, v_b, row_tile=32))
    assert jnp.allclose(out_t, ref, atol=1e-4, rtol=1e-4), "mismatch (row_tile=32)"

    # Opt-in bf16 MXU path (f32 accumulation; numerics differ ~1e-3 from f32).
    out_bf = jax.block_until_ready(
        edge_features(x, e, u_w, u_b, v_w, v_b, compute_dtype=jnp.bfloat16))
    assert jnp.allclose(out_bf, ref, atol=5e-2, rtol=5e-2), "mismatch (bf16)"

    # Tiny-N fallback (TI == N, lane width < 128 -> masked stores).
    Ns = 8
    xs = jax.random.normal(k_x, (B, H, Ns), dtype=jnp.float32)
    es = jax.random.normal(k_e, (B, H, Ns, Ns), dtype=jnp.float32)
    outs = jax.block_until_ready(edge_features(xs, es, u_w, u_b, v_w, v_b))
    refs = edge_features_ref(xs, es, u_w, u_b, v_w, v_b)
    assert jnp.allclose(outs, refs, atol=1e-4, rtol=1e-4), "mismatch (tiny N)"

    print("KERNEL_OK")
</pallas_src>

<mosaic_0001>
module attributes {stable_mosaic.version = 11 : i64} {
  func.func @edge_features_kernel(%arg0: i32, %arg1: i32, %arg2: memref<1x32x8192xf32, #tpu.memory_space<vmem>>, %arg3: memref<32x32xf32, #tpu.memory_space<vmem>>, %arg4: memref<1x32x128xf32, #tpu.memory_space<vmem>>, %arg5: memref<1x1x32x64xf32, #tpu.memory_space<vmem>>, %arg6: memref<1x32x8192xf32, #tpu.memory_space<vmem>>) attributes {dimension_semantics = [#tpu.dimension_semantics<parallel>, #tpu.dimension_semantics<parallel>], iteration_bounds = array<i64: 2, 2>, scalar_prefetch = 0 : i64, scratch_operands = 0 : i64, tpu.core_type = #tpu.core_type<tc>, window_params = [{transform_indices = @transform_0, window_bounds = array<i64: 1, 32, 8192>}, {pipeline_mode = #tpu.pipeline_mode<synchronous>, transform_indices = @transform_1, window_bounds = array<i64: 32, 32>}, {transform_indices = @transform_2, window_bounds = array<i64: 1, 32, 128>}, {transform_indices = @transform_3, window_bounds = array<i64: 1, 1, 32, 64>}, {transform_indices = @transform_4, window_bounds = array<i64: 1, 32, 8192>}]} {
    %c0 = arith.constant 0 : index
    %c0_0 = arith.constant 0 : index
    %0 = vector.load %arg3[%c0, %c0_0] : memref<32x32xf32, #tpu.memory_space<vmem>>, vector<32x32xf32>
    %c0_1 = arith.constant 0 : index
    %c0_2 = arith.constant 0 : index
    %c0_3 = arith.constant 0 : index
    %1 = vector.load %arg4[%c0_1, %c0_2, %c0_3] : memref<1x32x128xf32, #tpu.memory_space<vmem>>, vector<1x32x128xf32>
    %2 = vector.shape_cast %1 : vector<1x32x128xf32> to vector<32x128xf32>
    %c0_4 = arith.constant 0 : index
    %c0_5 = arith.constant 0 : index
    %c0_6 = arith.constant 0 : index
    %c0_7 = arith.constant 0 : index
    %3 = vector.load %arg5[%c0_4, %c0_5, %c0_6, %c0_7] : memref<1x1x32x64xf32, #tpu.memory_space<vmem>>, vector<1x1x32x64xf32>
    %4 = vector.shape_cast %3 : vector<1x1x32x64xf32> to vector<32x64xf32>
    %c0_8 = arith.constant 0 : index
    %c0_9 = arith.constant 0 : index
    %c0_10 = arith.constant 0 : index
    %5 = vector.load %arg2[%c0_8, %c0_9, %c0_10] : memref<1x32x8192xf32, #tpu.memory_space<vmem>>, vector<1x32x1024xf32>
    %6 = vector.shape_cast %5 : vector<1x32x1024xf32> to vector<32x1024xf32>
    %cst = arith.constant dense<0.000000e+00> : vector<32x1024xf32>
    %7 = tpu.matmul %0, %6, %cst {dimension_numbers = #tpu.dot_dimension_numbers<[1], [0], [0], [1], [0, 0, 1, 1], [], []>} : vector<32x32xf32>, vector<32x1024xf32>, vector<32x1024xf32> -> vector<32x1024xf32>
    %8 = vector.extract_strided_slice %4 {offsets = [0, 0], sizes = [32, 1], strides = [1, 1]} : vector<32x64xf32> to vector<32x1xf32>
    %9 = vector.extract_strided_slice %7 {offsets = [0, 0], sizes = [32, 128], strides = [1, 1]} : vector<32x1024xf32> to vector<32x128xf32>
    %10 = arith.addf %9, %2 : vector<32x128xf32>
    %11 = vector.broadcast %8 : vector<32x1xf32> to vector<32x128xf32>
    %12 = arith.addf %10, %11 : vector<32x128xf32>
    %c0_11 = arith.constant 0 : index
    %c0_12 = arith.constant 0 : index
    %c0_13 = arith.constant 0 : index
    %13 = vector.load %arg6[%c0_11, %c0_12, %c0_13] : memref<1x32x8192xf32, #tpu.memory_space<vmem>>, vector<1x32x128xf32>
    %14 = vector.shape_cast %13 : vector<1x32x128xf32> to vector<32x128xf32>
    %15 = vector.shape_cast %12 : vector<32x128xf32> to vector<1x32x128xf32>
    tpu.vector_store %arg6[%c0_11, %c0_12, %c0_13], %15 {strides = array<i32>} : memref<1x32x8192xf32, #tpu.memory_space<vmem>>, vector<1x32x128xf32>,
    %16 = vector.extract_strided_slice %4 {offsets = [0, 1], sizes = [32, 1], strides = [1, 1]} : vector<32x64xf32> to vector<32x1xf32>
    %17 = vector.extract_strided_slice %7 {offsets = [0, 128], sizes = [32, 128], strides = [1, 1]} : vector<32x1024xf32> to vector<32x128xf32>
    %18 = arith.addf %17, %2 : vector<32x128xf32>
    %19 = vector.broadcast %16 : vector<32x1xf32> to vector<32x128xf32>
    %20 = arith.addf %18, %19 : vector<32x128xf32>
    %c0_14 = arith.constant 0 : index
    %c0_15 = arith.constant 0 : index
    %c128 = arith.constant 128 : index
    %21 = vector.load %arg6[%c0_14, %c0_15, %c128] : memref<1x32x8192xf32, #tpu.memory_space<vmem>>, vector<1x32x128xf32>
    %22 = vector.shape_cast %21 : vector<1x32x128xf32> to vector<32x128xf32>
    %23 = vector.shape_cast %20 : vector<32x128xf32> to vector<1x32x128xf32>
    tpu.vector_store %arg6[%c0_14, %c0_15, %c128], %23 {strides = array<i32>} : memref<1x32x8192xf32, #tpu.memory_space<vmem>>, vector<1x32x128xf32>,
    %24 = vector.extract_strided_slice %4 {offsets = [0, 2], sizes = [32, 1], strides = [1, 1]} : vector<32x64xf32> to vector<32x1xf32>
    %25 = vector.extract_strided_slice %7 {offsets = [0, 256], sizes = [32, 128], strides = [1, 1]} : vector<32x1024xf32> to vector<32x128xf32>
    %26 = arith.addf %25, %2 : vector<32x128xf32>
    %27 = vector.broadcast %24 : vector<32x1xf32> to vector<32x128xf32>
    %28 = arith.addf %26, %27 : vector<32x128xf32>
    %c0_16 = arith.constant 0 : index
    %c0_17 = arith.constant 0 : index
    %c256 = arith.constant 256 : index
    %29 = vector.load %arg6[%c0_16, %c0_17, %c256] : memref<1x32x8192xf32, #tpu.memory_space<vmem>>, vector<1x32x128xf32>
    %30 = vector.shape_cast %29 : vector<1x32x128xf32> to vector<32x128xf32>
    %31 = vector.shape_cast %28 : vector<32x128xf32> to vector<1x32x128xf32>
    tpu.vector_store %arg6[%c0_16, %c0_17, %c256], %31 {strides = array<i32>} : memref<1x32x8192xf32, #tpu.memory_space<vmem>>, vector<1x32x128xf32>,
    %32 = vector.extract_strided_slice %4 {offsets = [0, 3], sizes = [32, 1], strides = [1, 1]} : vector<32x64xf32> to vector<32x1xf32>
    %33 = vector.extract_strided_slice %7 {offsets = [0, 384], sizes = [32, 128], strides = [1, 1]} : vector<32x1024xf32> to vector<32x128xf32>
    %34 = arith.addf %33, %2 : vector<32x128xf32>
    %35 = vector.broadcast %32 : vector<32x1xf32> to vector<32x128xf32>
    %36 = arith.addf %34, %35 : vector<32x128xf32>
    %c0_18 = arith.constant 0 : index
    %c0_19 = arith.constant 0 : index
    %c384 = arith.constant 384 : index
    %37 = vector.load %arg6[%c0_18, %c0_19, %c384] : memref<1x32x8192xf32, #tpu.memory_space<vmem>>, vector<1x32x128xf32>
    %38 = vector.shape_cast %37 : vector<1x32x128xf32> to vector<32x128xf32>
    %39 = vector.shape_cast %36 : vector<32x128xf32> to vector<1x32x128xf32>
    tpu.vector_store %arg6[%c0_18, %c0_19, %c384], %39 {strides = array<i32>} : memref<1x32x8192xf32, #tpu.memory_space<vmem>>, vector<1x32x128xf32>,
    %40 = vector.extract_strided_slice %4 {offsets = [0, 4], sizes = [32, 1], strides = [1, 1]} : vector<32x64xf32> to vector<32x1xf32>
    %41 = vector.extract_strided_slice %7 {offsets = [0, 512], sizes = [32, 128], strides = [1, 1]} : vector<32x1024xf32> to vector<32x128xf32>
    %42 = arith.addf %41, %2 : vector<32x128xf32>
    %43 = vector.broadcast %40 : vector<32x1xf32> to vector<32x128xf32>
    %44 = arith.addf %42, %43 : vector<32x128xf32>
    %c0_20 = arith.constant 0 : index
    %c0_21 = arith.constant 0 : index
    %c512 = arith.constant 512 : index
    %45 = vector.load %arg6[%c0_20, %c0_21, %c512] : memref<1x32x8192xf32, #tpu.memory_space<vmem>>, vector<1x32x128xf32>
    %46 = vector.shape_cast %45 : vector<1x32x128xf32> to vector<32x128xf32>
    %47 = vector.shape_cast %44 : vector<32x128xf32> to vector<1x32x128xf32>
    tpu.vector_store %arg6[%c0_20, %c0_21, %c512], %47 {strides = array<i32>} : memref<1x32x8192xf32, #tpu.memory_space<vmem>>, vector<1x32x128xf32>,
    %48 = vector.extract_strided_slice %4 {offsets = [0, 5], sizes = [32, 1], strides = [1, 1]} : vector<32x64xf32> to vector<32x1xf32>
    %49 = vector.extract_strided_slice %7 {offsets = [0, 640], sizes = [32, 128], strides = [1, 1]} : vector<32x1024xf32> to vector<32x128xf32>
    %50 = arith.addf %49, %2 : vector<32x128xf32>
    %51 = vector.broadcast %48 : vector<32x1xf32> to vector<32x128xf32>
    %52 = arith.addf %50, %51 : vector<32x128xf32>
    %c0_22 = arith.constant 0 : index
    %c0_23 = arith.constant 0 : index
    %c640 = arith.constant 640 : index
    %53 = vector.load %arg6[%c0_22, %c0_23, %c640] : memref<1x32x8192xf32, #tpu.memory_space<vmem>>, vector<1x32x128xf32>
    %54 = vector.shape_cast %53 : vector<1x32x128xf32> to vector<32x128xf32>
    %55 = vector.shape_cast %52 : vector<32x128xf32> to vector<1x32x128xf32>
    tpu.vector_store %arg6[%c0_22, %c0_23, %c640], %55 {strides = array<i32>} : memref<1x32x8192xf32, #tpu.memory_space<vmem>>, vector<1x32x128xf32>,
    %56 = vector.extract_strided_slice %4 {offsets = [0, 6], sizes = [32, 1], strides = [1, 1]} : vector<32x64xf32> to vector<32x1xf32>
    %57 = vector.extract_strided_slice %7 {offsets = [0, 768], sizes = [32, 128], strides = [1, 1]} : vector<32x1024xf32> to vector<32x128xf32>
    %58 = arith.addf %57, %2 : vector<32x128xf32>
    %59 = vector.broadcast %56 : vector<32x1xf32> to vector<32x128xf32>
    %60 = arith.addf %58, %59 : vector<32x128xf32>
    %c0_24 = arith.constant 0 : index
    %c0_25 = arith.constant 0 : index
    %c768 = arith.constant 768 : index
    %61 = vector.load %arg6[%c0_24, %c0_25, %c768] : memref<1x32x8192xf32, #tpu.memory_space<vmem>>, vector<1x32x128xf32>
    %62 = vector.shape_cast %61 : vector<1x32x128xf32> to vector<32x128xf32>
    %63 = vector.shape_cast %60 : vector<32x128xf32> to vector<1x32x128xf32>
    tpu.vector_store %arg6[%c0_24, %c0_25, %c768], %63 {strides = array<i32>} : memref<1x32x8192xf32, #tpu.memory_space<vmem>>, vector<1x32x128xf32>,
    %64 = vector.extract_strided_slice %4 {offsets = [0, 7], sizes = [32, 1], strides = [1, 1]} : vector<32x64xf32> to vector<32x1xf32>
    %65 = vector.extract_strided_slice %7 {offsets = [0, 896], sizes = [32, 128], strides = [1, 1]} : vector<32x1024xf32> to vector<32x128xf32>
    %66 = arith.addf %65, %2 : vector<32x128xf32>
    %67 = vector.broadcast %64 : vector<32x1xf32> to vector<32x128xf32>
    %68 = arith.addf %66, %67 : vector<32x128xf32>
    %c0_26 = arith.constant 0 : index
    %c0_27 = arith.constant 0 : index
    %c896 = arith.constant 896 : index
    %69 = vector.load %arg6[%c0_26, %c0_27, %c896] : memref<1x32x8192xf32, #tpu.memory_space<vmem>>, vector<1x32x128xf32>
    %70 = vector.shape_cast %69 : vector<1x32x128xf32> to vector<32x128xf32>
    %71 = vector.shape_cast %68 : vector<32x128xf32> to vector<1x32x128xf32>
    tpu.vector_store %arg6[%c0_26, %c0_27, %c896], %71 {strides = array<i32>} : memref<1x32x8192xf32, #tpu.memory_space<vmem>>, vector<1x32x128xf32>,
    %c0_28 = arith.constant 0 : index
    %c0_29 = arith.constant 0 : index
    %c1024 = arith.constant 1024 : index
    %72 = vector.load %arg2[%c0_28, %c0_29, %c1024] : memref<1x32x8192xf32, #tpu.memory_space<vmem>>, vector<1x32x1024xf32>
    %73 = vector.shape_cast %72 : vector<1x32x1024xf32> to vector<32x1024xf32>
    %cst_30 = arith.constant dense<0.000000e+00> : vector<32x1024xf32>
    %74 = tpu.matmul %0, %73, %cst_30 {dimension_numbers = #tpu.dot_dimension_numbers<[1], [0], [0], [1], [0, 0, 1, 1], [], []>} : vector<32x32xf32>, vector<32x1024xf32>, vector<32x1024xf32> -> vector<32x1024xf32>
    %75 = vector.extract_strided_slice %4 {offsets = [0, 8], sizes = [32, 1], strides = [1, 1]} : vector<32x64xf32> to vector<32x1xf32>
    %76 = vector.extract_strided_slice %74 {offsets = [0, 0], sizes = [32, 128], strides = [1, 1]} : vector<32x1024xf32> to vector<32x128xf32>
    %77 = arith.addf %76, %2 : vector<32x128xf32>
    %78 = vector.broadcast %75 : vector<32x1xf32> to vector<32x128xf32>
    %79 = arith.addf %77, %78 : vector<32x128xf32>
    %c0_31 = arith.constant 0 : index
    %c0_32 = arith.constant 0 : index
    %c1024_33 = arith.constant 1024 : index
    %80 = vector.load %arg6[%c0_31, %c0_32, %c1024_33] : memref<1x32x8192xf32, #tpu.memory_space<vmem>>, vector<1x32x128xf32>
    %81 = vector.shape_cast %80 : vector<1x32x128xf32> to vector<32x128xf32>
    %82 = vector.shape_cast %79 : vector<32x128xf32> to vector<1x32x128xf32>
    tpu.vector_store %arg6[%c0_31, %c0_32, %c1024_33], %82 {strides = array<i32>} : memref<1x32x8192xf32, #tpu.memory_space<vmem>>, vector<1x32x128xf32>,
    %83 = vector.extract_strided_slice %4 {offsets = [0, 9], sizes = [32, 1], strides = [1, 1]} : vector<32x64xf32> to vector<32x1xf32>
    %84 = vector.extract_strided_slice %74 {offsets = [0, 128], sizes = [32, 128], strides = [1, 1]} : vector<32x1024xf32> to vector<32x128xf32>
    %85 = arith.addf %84, %2 : vector<32x128xf32>
    %86 = vector.broadcast %83 : vector<32x1xf32> to vector<32x128xf32>
    %87 = arith.addf %85, %86 : vector<32x128xf32>
    %c0_34 = arith.constant 0 : index
    %c0_35 = arith.constant 0 : index
    %c1152 = arith.constant 1152 : index
    %88 = vector.load %arg6[%c0_34, %c0_35, %c1152] : memref<1x32x8192xf32, #tpu.memory_space<vmem>>, vector<1x32x128xf32>
    %89 = vector.shape_cast %88 : vector<1x32x128xf32> to vector<32x128xf32>
    %90 = vector.shape_cast %87 : vector<32x128xf32> to vector<1x32x128xf32>
    tpu.vector_store %arg6[%c0_34, %c0_35, %c1152], %90 {strides = array<i32>} : memref<1x32x8192xf32, #tpu.memory_space<vmem>>, vector<1x32x128xf32>,
    %91 = vector.extract_strided_slice %4 {offsets = [0, 10], sizes = [32, 1], strides = [1, 1]} : vector<32x64xf32> to vector<32x1xf32>
    %92 = vector.extract_strided_slice %74 {offsets = [0, 256], sizes = [32, 128], strides = [1, 1]} : vector<32x1024xf32> to vector<32x128xf32>
    %93 = arith.addf %92, %2 : vector<32x128xf32>
    %94 = vector.broadcast %91 : vector<32x1xf32> to vector<32x128xf32>
    %95 = arith.addf %93, %94 : vector<32x128xf32>
    %c0_36 = arith.constant 0 : index
    %c0_37 = arith.constant 0 : index
    %c1280 = arith.constant 1280 : index
    %96 = vector.load %arg6[%c0_36, %c0_37, %c1280] : memref<1x32x8192xf32, #tpu.memory_space<vmem>>, vector<1x32x128xf32>
    %97 = vector.shape_cast %96 : vector<1x32x128xf32> to vector<32x128xf32>
    %98 = vector.shape_cast %95 : vector<32x128xf32> to vector<1x32x128xf32>
    tpu.vector_store %arg6[%c0_36, %c0_37, %c1280], %98 {strides = array<i32>} : memref<1x32x8192xf32, #tpu.memory_space<vmem>>, vector<1x32x128xf32>,
    %99 = vector.extract_strided_slice %4 {offsets = [0, 11], sizes = [32, 1], strides = [1, 1]} : vector<32x64xf32> to vector<32x1xf32>
    %100 = vector.extract_strided_slice %74 {offsets = [0, 384], sizes = [32, 128], strides = [1, 1]} : vector<32x1024xf32> to vector<32x128xf32>
    %101 = arith.addf %100, %2 : vector<32x128xf32>
    %102 = vector.broadcast %99 : vector<32x1xf32> to vector<32x128xf32>
    %103 = arith.addf %101, %102 : vector<32x128xf32>
    %c0_38 = arith.constant 0 : index
    %c0_39 = arith.constant 0 : index
    %c1408 = arith.constant 1408 : index
    %104 = vector.load %arg6[%c0_38, %c0_39, %c1408] : memref<1x32x8192xf32, #tpu.memory_space<vmem>>, vector<1x32x128xf32>
    %105 = vector.shape_cast %104 : vector<1x32x128xf32> to vector<32x128xf32>
    %106 = vector.shape_cast %103 : vector<32x128xf32> to vector<1x32x128xf32>
    tpu.vector_store %arg6[%c0_38, %c0_39, %c1408], %106 {strides = array<i32>} : memref<1x32x8192xf32, #tpu.memory_space<vmem>>, vector<1x32x128xf32>,
    %107 = vector.extract_strided_slice %4 {offsets = [0, 12], sizes = [32, 1], strides = [1, 1]} : vector<32x64xf32> to vector<32x1xf32>
    %108 = vector.extract_strided_slice %74 {offsets = [0, 512], sizes = [32, 128], strides = [1, 1]} : vector<32x1024xf32> to vector<32x128xf32>
    %109 = arith.addf %108, %2 : vector<32x128xf32>
    %110 = vector.broadcast %107 : vector<32x1xf32> to vector<32x128xf32>
    %111 = arith.addf %109, %110 : vector<32x128xf32>
    %c0_40 = arith.constant 0 : index
    %c0_41 = arith.constant 0 : index
    %c1536 = arith.constant 1536 : index
    %112 = vector.load %arg6[%c0_40, %c0_41, %c1536] : memref<1x32x8192xf32, #tpu.memory_space<vmem>>, vector<1x32x128xf32>
    %113 = vector.shape_cast %112 : vector<1x32x128xf32> to vector<32x128xf32>
    %114 = vector.shape_cast %111 : vector<32x128xf32> to vector<1x32x128xf32>
    tpu.vector_store %arg6[%c0_40, %c0_41, %c1536], %114 {strides = array<i32>} : memref<1x32x8192xf32, #tpu.memory_space<vmem>>, vector<1x32x128xf32>,
    %115 = vector.extract_strided_slice %4 {offsets = [0, 13], sizes = [32, 1], strides = [1, 1]} : vector<32x64xf32> to vector<32x1xf32>
    %116 = vector.extract_strided_slice %74 {offsets = [0, 640], sizes = [32, 128], strides = [1, 1]} : vector<32x1024xf32> to vector<32x128xf32>
    %117 = arith.addf %116, %2 : vector<32x128xf32>
    %118 = vector.broadcast %115 : vector<32x1xf32> to vector<32x128xf32>
    %119 = arith.addf %117, %118 : vector<32x128xf32>
    %c0_42 = arith.constant 0 : index
    %c0_43 = arith.constant 0 : index
    %c1664 = arith.constant 1664 : index
    %120 = vector.load %arg6[%c0_42, %c0_43, %c1664] : memref<1x32x8192xf32, #tpu.memory_space<vmem>>, vector<1x32x128xf32>
    %121 = vector.shape_cast %120 : vector<1x32x128xf32> to vector<32x128xf32>
    %122 = vector.shape_cast %119 : vector<32x128xf32> to vector<1x32x128xf32>
    tpu.vector_store %arg6[%c0_42, %c0_43, %c1664], %122 {strides = array<i32>} : memref<1x32x8192xf32, #tpu.memory_space<vmem>>, vector<1x32x128xf32>,
    %123 = vector.extract_strided_slice %4 {offsets = [0, 14], sizes = [32, 1], strides = [1, 1]} : vector<32x64xf32> to vector<32x1xf32>
    %124 = vector.extract_strided_slice %74 {offsets = [0, 768], sizes = [32, 128], strides = [1, 1]} : vector<32x1024xf32> to vector<32x128xf32>
    %125 = arith.addf %124, %2 : vector<32x128xf32>
    %126 = vector.broadcast %123 : vector<32x1xf32> to vector<32x128xf32>
    %127 = arith.addf %125, %126 : vector<32x128xf32>
    %c0_44 = arith.constant 0 : index
    %c0_45 = arith.constant 0 : index
    %c1792 = arith.constant 1792 : index
    %128 = vector.load %arg6[%c0_44, %c0_45, %c1792] : memref<1x32x8192xf32, #tpu.memory_space<vmem>>, vector<1x32x128xf32>
    %129 = vector.shape_cast %128 : vector<1x32x128xf32> to vector<32x128xf32>
    %130 = vector.shape_cast %127 : vector<32x128xf32> to vector<1x32x128xf32>
    tpu.vector_store %arg6[%c0_44, %c0_45, %c1792], %130 {strides = array<i32>} : memref<1x32x8192xf32, #tpu.memory_space<vmem>>, vector<1x32x128xf32>,
    %131 = vector.extract_strided_slice %4 {offsets = [0, 15], sizes = [32, 1], strides = [1, 1]} : vector<32x64xf32> to vector<32x1xf32>
    %132 = vector.extract_strided_slice %74 {offsets = [0, 896], sizes = [32, 128], strides = [1, 1]} : vector<32x1024xf32> to vector<32x128xf32>
    %133 = arith.addf %132, %2 : vector<32x128xf32>
    %134 = vector.broadcast %131 : vector<32x1xf32> to vector<32x128xf32>
    %135 = arith.addf %133, %134 : vector<32x128xf32>
    %c0_46 = arith.constant 0 : index
    %c0_47 = arith.constant 0 : index
    %c1920 = arith.constant 1920 : index
    %136 = vector.load %arg6[%c0_46, %c0_47, %c1920] : memref<1x32x8192xf32, #tpu.memory_space<vmem>>, vector<1x32x128xf32>
    %137 = vector.shape_cast %136 : vector<1x32x128xf32> to vector<32x128xf32>
    %138 = vector.shape_cast %135 : vector<32x128xf32> to vector<1x32x128xf32>
    tpu.vector_store %arg6[%c0_46, %c0_47, %c1920], %138 {strides = array<i32>} : memref<1x32x8192xf32, #tpu.memory_space<vmem>>, vector<1x32x128xf32>,
    %c0_48 = arith.constant 0 : index
    %c0_49 = arith.constant 0 : index
    %c2048 = arith.constant 2048 : index
    %139 = vector.load %arg2[%c0_48, %c0_49, %c2048] : memref<1x32x8192xf32, #tpu.memory_space<vmem>>, vector<1x32x1024xf32>
    %140 = vector.shape_cast %139 : vector<1x32x1024xf32> to vector<32x1024xf32>
    %cst_50 = arith.constant dense<0.000000e+00> : vector<32x1024xf32>
    %141 = tpu.matmul %0, %140, %cst_50 {dimension_numbers = #tpu.dot_dimension_numbers<[1], [0], [0], [1], [0, 0, 1, 1], [], []>} : vector<32x32xf32>, vector<32x1024xf32>, vector<32x1024xf32> -> vector<32x1024xf32>
    %142 = vector.extract_strided_slice %4 {offsets = [0, 16], sizes = [32, 1], strides = [1, 1]} : vector<32x64xf32> to vector<32x1xf32>
    %143 = vector.extract_strided_slice %141 {offsets = [0, 0], sizes = [32, 128], strides = [1, 1]} : vector<32x1024xf32> to vector<32x128xf32>
    %144 = arith.addf %143, %2 : vector<32x128xf32>
    %145 = vector.broadcast %142 : vector<32x1xf32> to vector<32x128xf32>
    %146 = arith.addf %144, %145 : vector<32x128xf32>
    %c0_51 = arith.constant 0 : index
    %c0_52 = arith.constant 0 : index
    %c2048_53 = arith.constant 2048 : index
    %147 = vector.load %arg6[%c0_51, %c0_52, %c2048_53] : memref<1x32x8192xf32, #tpu.memory_space<vmem>>, vector<1x32x128xf32>
    %148 = vector.shape_cast %147 : vector<1x32x128xf32> to vector<32x128xf32>
    %149 = vector.shape_cast %146 : vector<32x128xf32> to vector<1x32x128xf32>
    tpu.vector_store %arg6[%c0_51, %c0_52, %c2048_53], %149 {strides = array<i32>} : memref<1x32x8192xf32, #tpu.memory_space<vmem>>, vector<1x32x128xf32>,
    %150 = vector.extract_strided_slice %4 {offsets = [0, 17], sizes = [32, 1], strides = [1, 1]} : vector<32x64xf32> to vector<32x1xf32>
    %151 = vector.extract_strided_slice %141 {offsets = [0, 128], sizes = [32, 128], strides = [1, 1]} : vector<32x1024xf32> to vector<32x128xf32>
    %152 = arith.addf %151, %2 : vector<32x128xf32>
    %153 = vector.broadcast %150 : vector<32x1xf32> to vector<32x128xf32>
    %154 = arith.addf %152, %153 : vector<32x128xf32>
    %c0_54 = arith.constant 0 : index
    %c0_55 = arith.constant 0 : index
    %c2176 = arith.constant 2176 : index
    %155 = vector.load %arg6[%c0_54, %c0_55, %c2176] : memref<1x32x8192xf32, #tpu.memory_space<vmem>>, vector<1x32x128xf32>
    %156 = vector.shape_cast %155 : vector<1x32x128xf32> to vector<32x128xf32>
    %157 = vector.shape_cast %154 : vector<32x128xf32> to vector<1x32x128xf32>
    tpu.vector_store %arg6[%c0_54, %c0_55, %c2176], %157 {strides = array<i32>} : memref<1x32x8192xf32, #tpu.memory_space<vmem>>, vector<1x32x128xf32>,
    %158 = vector.extract_strided_slice %4 {offsets = [0, 18], sizes = [32, 1], strides = [1, 1]} : vector<32x64xf32> to vector<32x1xf32>
    %159 = vector.extract_strided_slice %141 {offsets = [0, 256], sizes = [32, 128], strides = [1, 1]} : vector<32x1024xf32> to vector<32x128xf32>
    %160 = arith.addf %159, %2 : vector<32x128xf32>
    %161 = vector.broadcast %158 : vector<32x1xf32> to vector<32x128xf32>
    %162 = arith.addf %160, %161 : vector<32x128xf32>
    %c0_56 = arith.constant 0 : index
    %c0_57 = arith.constant 0 : index
    %c2304 = arith.constant 2304 : index
    %163 = vector.load %arg6[%c0_56, %c0_57, %c2304] : memref<1x32x8192xf32, #tpu.memory_space<vmem>>, vector<1x32x128xf32>
    %164 = vector.shape_cast %163 : vector<1x32x128xf32> to vector<32x128xf32>
    %165 = vector.shape_cast %162 : vector<32x128xf32> to vector<1x32x128xf32>
    tpu.vector_store %arg6[%c0_56, %c0_57, %c2304], %165 {strides = array<i32>} : memref<1x32x8192xf32, #tpu.memory_space<vmem>>, vector<1x32x128xf32>,
    %166 = vector.extract_strided_slice %4 {offsets = [0, 19], sizes = [32, 1], strides = [1, 1]} : vector<32x64xf32> to vector<32x1xf32>
    %167 = vector.extract_strided_slice %141 {offsets = [0, 384], sizes = [32, 128], strides = [1, 1]} : vector<32x1024xf32> to vector<32x128xf32>
    %168 = arith.addf %167, %2 : vector<32x128xf32>
    %169 = vector.broadcast %166 : vector<32x1xf32> to vector<32x128xf32>
    %170 = arith.addf %168, %169 : vector<32x128xf32>
    %c0_58 = arith.constant 0 : index
    %c0_59 = arith.constant 0 : index
    %c2432 = arith.constant 2432 : index
    %171 = vector.load %arg6[%c0_58, %c0_59, %c2432] : memref<1x32x8192xf32, #tpu.memory_space<vmem>>, vector<1x32x128xf32>
    %172 = vector.shape_cast %171 : vector<1x32x128xf32> to vector<32x128xf32>
    %173 = vector.shape_cast %170 : vector<32x128xf32> to vector<1x32x128xf32>
    tpu.vector_store %arg6[%c0_58, %c0_59, %c2432], %173 {strides = array<i32>} : memref<1x32x8192xf32, #tpu.memory_space<vmem>>, vector<1x32x128xf32>,
    %174 = vector.extract_strided_slice %4 {offsets = [0, 20], sizes = [32, 1], strides = [1, 1]} : vector<32x64xf32> to vector<32x1xf32>
    %175 = vector.extract_strided_slice %141 {offsets = [0, 512], sizes = [32, 128], strides = [1, 1]} : vector<32x1024xf32> to vector<32x128xf32>
    %176 = arith.addf %175, %2 : vector<32x128xf32>
    %177 = vector.broadcast %174 : vector<32x1xf32> to vector<32x128xf32>
    %178 = arith.addf %176, %177 : vector<32x128xf32>
    %c0_60 = arith.constant 0 : index
    %c0_61 = arith.constant 0 : index
    %c2560 = arith.constant 2560 : index
    %179 = vector.load %arg6[%c0_60, %c0_61, %c2560] : memref<1x32x8192xf32, #tpu.memory_space<vmem>>, vector<1x32x128xf32>
    %180 = vector.shape_cast %179 : vector<1x32x128xf32> to vector<32x128xf32>
    %181 = vector.shape_cast %178 : vector<32x128xf32> to vector<1x32x128xf32>
    tpu.vector_store %arg6[%c0_60, %c0_61, %c2560], %181 {strides = array<i32>} : memref<1x32x8192xf32, #tpu.memory_space<vmem>>, vector<1x32x128xf32>,
    %182 = vector.extract_strided_slice %4 {offsets = [0, 21], sizes = [32, 1], strides = [1, 1]} : vector<32x64xf32> to vector<32x1xf32>
    %183 = vector.extract_strided_slice %141 {offsets = [0, 640], sizes = [32, 128], strides = [1, 1]} : vector<32x1024xf32> to vector<32x128xf32>
    %184 = arith.addf %183, %2 : vector<32x128xf32>
    %185 = vector.broadcast %182 : vector<32x1xf32> to vector<32x128xf32>
    %186 = arith.addf %184, %185 : vector<32x128xf32>
    %c0_62 = arith.constant 0 : index
    %c0_63 = arith.constant 0 : index
    %c2688 = arith.constant 2688 : index
    %187 = vector.load %arg6[%c0_62, %c0_63, %c2688] : memref<1x32x8192xf32, #tpu.memory_space<vmem>>, vector<1x32x128xf32>
    %188 = vector.shape_cast %187 : vector<1x32x128xf32> to vector<32x128xf32>
    %189 = vector.shape_cast %186 : vector<32x128xf32> to vector<1x32x128xf32>
    tpu.vector_store %arg6[%c0_62, %c0_63, %c2688], %189 {strides = array<i32>} : memref<1x32x8192xf32, #tpu.memory_space<vmem>>, vector<1x32x128xf32>,
    %190 = vector.extract_strided_slice %4 {offsets = [0, 22], sizes = [32, 1], strides = [1, 1]} : vector<32x64xf32> to vector<32x1xf32>
    %191 = vector.extract_strided_slice %141 {offsets = [0, 768], sizes = [32, 128], strides = [1, 1]} : vector<32x1024xf32> to vector<32x128xf32>
    %192 = arith.addf %191, %2 : vector<32x128xf32>
    %193 = vector.broadcast %190 : vector<32x1xf32> to vector<32x128xf32>
    %194 = arith.addf %192, %193 : vector<32x128xf32>
    %c0_64 = arith.constant 0 : index
    %c0_65 = arith.constant 0 : index
    %c2816 = arith.constant 2816 : index
    %195 = vector.load %arg6[%c0_64, %c0_65, %c2816] : memref<1x32x8192xf32, #tpu.memory_space<vmem>>, vector<1x32x128xf32>
    %196 = vector.shape_cast %195 : vector<1x32x128xf32> to vector<32x128xf32>
    %197 = vector.shape_cast %194 : vector<32x128xf32> to vector<1x32x128xf32>
    tpu.vector_store %arg6[%c0_64, %c0_65, %c2816], %197 {strides = array<i32>} : memref<1x32x8192xf32, #tpu.memory_space<vmem>>, vector<1x32x128xf32>,
    %198 = vector.extract_strided_slice %4 {offsets = [0, 23], sizes = [32, 1], strides = [1, 1]} : vector<32x64xf32> to vector<32x1xf32>
    %199 = vector.extract_strided_slice %141 {offsets = [0, 896], sizes = [32, 128], strides = [1, 1]} : vector<32x1024xf32> to vector<32x128xf32>
    %200 = arith.addf %199, %2 : vector<32x128xf32>
    %201 = vector.broadcast %198 : vector<32x1xf32> to vector<32x128xf32>
    %202 = arith.addf %200, %201 : vector<32x128xf32>
    %c0_66 = arith.constant 0 : index
    %c0_67 = arith.constant 0 : index
    %c2944 = arith.constant 2944 : index
    %203 = vector.load %arg6[%c0_66, %c0_67, %c2944] : memref<1x32x8192xf32, #tpu.memory_space<vmem>>, vector<1x32x128xf32>
    %204 = vector.shape_cast %203 : vector<1x32x128xf32> to vector<32x128xf32>
    %205 = vector.shape_cast %202 : vector<32x128xf32> to vector<1x32x128xf32>
    tpu.vector_store %arg6[%c0_66, %c0_67, %c2944], %205 {strides = array<i32>} : memref<1x32x8192xf32, #tpu.memory_space<vmem>>, vector<1x32x128xf32>,
    %c0_68 = arith.constant 0 : index
    %c0_69 = arith.constant 0 : index
    %c3072 = arith.constant 3072 : index
    %206 = vector.load %arg2[%c0_68, %c0_69, %c3072] : memref<1x32x8192xf32, #tpu.memory_space<vmem>>, vector<1x32x1024xf32>
    %207 = vector.shape_cast %206 : vector<1x32x1024xf32> to vector<32x1024xf32>
    %cst_70 = arith.constant dense<0.000000e+00> : vector<32x1024xf32>
    %208 = tpu.matmul %0, %207, %cst_70 {dimension_numbers = #tpu.dot_dimension_numbers<[1], [0], [0], [1], [0, 0, 1, 1], [], []>} : vector<32x32xf32>, vector<32x1024xf32>, vector<32x1024xf32> -> vector<32x1024xf32>
    %209 = vector.extract_strided_slice %4 {offsets = [0, 24], sizes = [32, 1], strides = [1, 1]} : vector<32x64xf32> to vector<32x1xf32>
    %210 = vector.extract_strided_slice %208 {offsets = [0, 0], sizes = [32, 128], strides = [1, 1]} : vector<32x1024xf32> to vector<32x128xf32>
    %211 = arith.addf %210, %2 : vector<32x128xf32>
    %212 = vector.broadcast %209 : vector<32x1xf32> to vector<32x128xf32>
    %213 = arith.addf %211, %212 : vector<32x128xf32>
    %c0_71 = arith.constant 0 : index
    %c0_72 = arith.constant 0 : index
    %c3072_73 = arith.constant 3072 : index
    %214 = vector.load %arg6[%c0_71, %c0_72, %c3072_73] : memref<1x32x8192xf32, #tpu.memory_space<vmem>>, vector<1x32x128xf32>
    %215 = vector.shape_cast %214 : vector<1x32x128xf32> to vector<32x128xf32>
    %216 = vector.shape_cast %213 : vector<32x128xf32> to vector<1x32x128xf32>
    tpu.vector_store %arg6[%c0_71, %c0_72, %c3072_73], %216 {strides = array<i32>} : memref<1x32x8192xf32, #tpu.memory_space<vmem>>, vector<1x32x128xf32>,
    %217 = vector.extract_strided_slice %4 {offsets = [0, 25], sizes = [32, 1], strides = [1, 1]} : vector<32x64xf32> to vector<32x1xf32>
    %218 = vector.extract_strided_slice %208 {offsets = [0, 128], sizes = [32, 128], strides = [1, 1]} : vector<32x1024xf32> to vector<32x128xf32>
    %219 = arith.addf %218, %2 : vector<32x128xf32>
    %220 = vector.broadcast %217 : vector<32x1xf32> to vector<32x128xf32>
    %221 = arith.addf %219, %220 : vector<32x128xf32>
    %c0_74 = arith.constant 0 : index
    %c0_75 = arith.constant 0 : index
    %c3200 = arith.constant 3200 : index
    %222 = vector.load %arg6[%c0_74, %c0_75, %c3200] : memref<1x32x8192xf32, #tpu.memory_space<vmem>>, vector<1x32x128xf32>
    %223 = vector.shape_cast %222 : vector<1x32x128xf32> to vector<32x128xf32>
    %224 = vector.shape_cast %221 : vector<32x128xf32> to vector<1x32x128xf32>
    tpu.vector_store %arg6[%c0_74, %c0_75, %c3200], %224 {strides = array<i32>} : memref<1x32x8192xf32, #tpu.memory_space<vmem>>, vector<1x32x128xf32>,
    %225 = vector.extract_strided_slice %4 {offsets = [0, 26], sizes = [32, 1], strides = [1, 1]} : vector<32x64xf32> to vector<32x1xf32>
    %226 = vector.extract_strided_slice %208 {offsets = [0, 256], sizes = [32, 128], strides = [1, 1]} : vector<32x1024xf32> to vector<32x128xf32>
    %227 = arith.addf %226, %2 : vector<32x128xf32>
    %228 = vector.broadcast %225 : vector<32x1xf32> to vector<32x128xf32>
    %229 = arith.addf %227, %228 : vector<32x128xf32>
    %c0_76 = arith.constant 0 : index
    %c0_77 = arith.constant 0 : index
    %c3328 = arith.constant 3328 : index
    %230 = vector.load %arg6[%c0_76, %c0_77, %c3328] : memref<1x32x8192xf32, #tpu.memory_space<vmem>>, vector<1x32x128xf32>
    %231 = vector.shape_cast %230 : vector<1x32x128xf32> to vector<32x128xf32>
    %232 = vector.shape_cast %229 : vector<32x128xf32> to vector<1x32x128xf32>
    tpu.vector_store %arg6[%c0_76, %c0_77, %c3328], %232 {strides = array<i32>} : memref<1x32x8192xf32, #tpu.memory_space<vmem>>, vector<1x32x128xf32>,
    %233 = vector.extract_strided_slice %4 {offsets = [0, 27], sizes = [32, 1], strides = [1, 1]} : vector<32x64xf32> to vector<32x1xf32>
    %234 = vector.extract_strided_slice %208 {offsets = [0, 384], sizes = [32, 128], strides = [1, 1]} : vector<32x1024xf32> to vector<32x128xf32>
    %235 = arith.addf %234, %2 : vector<32x128xf32>
    %236 = vector.broadcast %233 : vector<32x1xf32> to vector<32x128xf32>
    %237 = arith.addf %235, %236 : vector<32x128xf32>
    %c0_78 = arith.constant 0 : index
    %c0_79 = arith.constant 0 : index
    %c3456 = arith.constant 3456 : index
    %238 = vector.load %arg6[%c0_78, %c0_79, %c3456] : memref<1x32x8192xf32, #tpu.memory_space<vmem>>, vector<1x32x128xf32>
    %239 = vector.shape_cast %238 : vector<1x32x128xf32> to vector<32x128xf32>
    %240 = vector.shape_cast %237 : vector<32x128xf32> to vector<1x32x128xf32>
    tpu.vector_store %arg6[%c0_78, %c0_79, %c3456], %240 {strides = array<i32>} : memref<1x32x8192xf32, #tpu.memory_space<vmem>>, vector<1x32x128xf32>,
    %241 = vector.extract_strided_slice %4 {offsets = [0, 28], sizes = [32, 1], strides = [1, 1]} : vector<32x64xf32> to vector<32x1xf32>
    %242 = vector.extract_strided_slice %208 {offsets = [0, 512], sizes = [32, 128], strides = [1, 1]} : vector<32x1024xf32> to vector<32x128xf32>
    %243 = arith.addf %242, %2 : vector<32x128xf32>
    %244 = vector.broadcast %241 : vector<32x1xf32> to vector<32x128xf32>
    %245 = arith.addf %243, %244 : vector<32x128xf32>
    %c0_80 = arith.constant 0 : index
    %c0_81 = arith.constant 0 : index
    %c3584 = arith.constant 3584 : index
    %246 = vector.load %arg6[%c0_80, %c0_81, %c3584] : memref<1x32x8192xf32, #tpu.memory_space<vmem>>, vector<1x32x128xf32>
    %247 = vector.shape_cast %246 : vector<1x32x128xf32> to vector<32x128xf32>
    %248 = vector.shape_cast %245 : vector<32x128xf32> to vector<1x32x128xf32>
    tpu.vector_store %arg6[%c0_80, %c0_81, %c3584], %248 {strides = array<i32>} : memref<1x32x8192xf32, #tpu.memory_space<vmem>>, vector<1x32x128xf32>,
    %249 = vector.extract_strided_slice %4 {offsets = [0, 29], sizes = [32, 1], strides = [1, 1]} : vector<32x64xf32> to vector<32x1xf32>
    %250 = vector.extract_strided_slice %208 {offsets = [0, 640], sizes = [32, 128], strides = [1, 1]} : vector<32x1024xf32> to vector<32x128xf32>
    %251 = arith.addf %250, %2 : vector<32x128xf32>
    %252 = vector.broadcast %249 : vector<32x1xf32> to vector<32x128xf32>
    %253 = arith.addf %251, %252 : vector<32x128xf32>
    %c0_82 = arith.constant 0 : index
    %c0_83 = arith.constant 0 : index
    %c3712 = arith.constant 3712 : index
    %254 = vector.load %arg6[%c0_82, %c0_83, %c3712] : memref<1x32x8192xf32, #tpu.memory_space<vmem>>, vector<1x32x128xf32>
    %255 = vector.shape_cast %254 : vector<1x32x128xf32> to vector<32x128xf32>
    %256 = vector.shape_cast %253 : vector<32x128xf32> to vector<1x32x128xf32>
    tpu.vector_store %arg6[%c0_82, %c0_83, %c3712], %256 {strides = array<i32>} : memref<1x32x8192xf32, #tpu.memory_space<vmem>>, vector<1x32x128xf32>,
    %257 = vector.extract_strided_slice %4 {offsets = [0, 30], sizes = [32, 1], strides = [1, 1]} : vector<32x64xf32> to vector<32x1xf32>
    %258 = vector.extract_strided_slice %208 {offsets = [0, 768], sizes = [32, 128], strides = [1, 1]} : vector<32x1024xf32> to vector<32x128xf32>
    %259 = arith.addf %258, %2 : vector<32x128xf32>
    %260 = vector.broadcast %257 : vector<32x1xf32> to vector<32x128xf32>
    %261 = arith.addf %259, %260 : vector<32x128xf32>
    %c0_84 = arith.constant 0 : index
    %c0_85 = arith.constant 0 : index
    %c3840 = arith.constant 3840 : index
    %262 = vector.load %arg6[%c0_84, %c0_85, %c3840] : memref<1x32x8192xf32, #tpu.memory_space<vmem>>, vector<1x32x128xf32>
    %263 = vector.shape_cast %262 : vector<1x32x128xf32> to vector<32x128xf32>
    %264 = vector.shape_cast %261 : vector<32x128xf32> to vector<1x32x128xf32>
    tpu.vector_store %arg6[%c0_84, %c0_85, %c3840], %264 {strides = array<i32>} : memref<1x32x8192xf32, #tpu.memory_space<vmem>>, vector<1x32x128xf32>,
    %265 = vector.extract_strided_slice %4 {offsets = [0, 31], sizes = [32, 1], strides = [1, 1]} : vector<32x64xf32> to vector<32x1xf32>
    %266 = vector.extract_strided_slice %208 {offsets = [0, 896], sizes = [32, 128], strides = [1, 1]} : vector<32x1024xf32> to vector<32x128xf32>
    %267 = arith.addf %266, %2 : vector<32x128xf32>
    %268 = vector.broadcast %265 : vector<32x1xf32> to vector<32x128xf32>
    %269 = arith.addf %267, %268 : vector<32x128xf32>
    %c0_86 = arith.constant 0 : index
    %c0_87 = arith.constant 0 : index
    %c3968 = arith.constant 3968 : index
    %270 = vector.load %arg6[%c0_86, %c0_87, %c3968] : memref<1x32x8192xf32, #tpu.memory_space<vmem>>, vector<1x32x128xf32>
    %271 = vector.shape_cast %270 : vector<1x32x128xf32> to vector<32x128xf32>
    %272 = vector.shape_cast %269 : vector<32x128xf32> to vector<1x32x128xf32>
    tpu.vector_store %arg6[%c0_86, %c0_87, %c3968], %272 {strides = array<i32>} : memref<1x32x8192xf32, #tpu.memory_space<vmem>>, vector<1x32x128xf32>,
    %c0_88 = arith.constant 0 : index
    %c0_89 = arith.constant 0 : index
    %c4096 = arith.constant 4096 : index
    %273 = vector.load %arg2[%c0_88, %c0_89, %c4096] : memref<1x32x8192xf32, #tpu.memory_space<vmem>>, vector<1x32x1024xf32>
    %274 = vector.shape_cast %273 : vector<1x32x1024xf32> to vector<32x1024xf32>
    %cst_90 = arith.constant dense<0.000000e+00> : vector<32x1024xf32>
    %275 = tpu.matmul %0, %274, %cst_90 {dimension_numbers = #tpu.dot_dimension_numbers<[1], [0], [0], [1], [0, 0, 1, 1], [], []>} : vector<32x32xf32>, vector<32x1024xf32>, vector<32x1024xf32> -> vector<32x1024xf32>
    %276 = vector.extract_strided_slice %4 {offsets = [0, 32], sizes = [32, 1], strides = [1, 1]} : vector<32x64xf32> to vector<32x1xf32>
    %277 = vector.extract_strided_slice %275 {offsets = [0, 0], sizes = [32, 128], strides = [1, 1]} : vector<32x1024xf32> to vector<32x128xf32>
    %278 = arith.addf %277, %2 : vector<32x128xf32>
    %279 = vector.broadcast %276 : vector<32x1xf32> to vector<32x128xf32>
    %280 = arith.addf %278, %279 : vector<32x128xf32>
    %c0_91 = arith.constant 0 : index
    %c0_92 = arith.constant 0 : index
    %c4096_93 = arith.constant 4096 : index
    %281 = vector.load %arg6[%c0_91, %c0_92, %c4096_93] : memref<1x32x8192xf32, #tpu.memory_space<vmem>>, vector<1x32x128xf32>
    %282 = vector.shape_cast %281 : vector<1x32x128xf32> to vector<32x128xf32>
    %283 = vector.shape_cast %280 : vector<32x128xf32> to vector<1x32x128xf32>
    tpu.vector_store %arg6[%c0_91, %c0_92, %c4096_93], %283 {strides = array<i32>} : memref<1x32x8192xf32, #tpu.memory_space<vmem>>, vector<1x32x128xf32>,
    %284 = vector.extract_strided_slice %4 {offsets = [0, 33], sizes = [32, 1], strides = [1, 1]} : vector<32x64xf32> to vector<32x1xf32>
    %285 = vector.extract_strided_slice %275 {offsets = [0, 128], sizes = [32, 128], strides = [1, 1]} : vector<32x1024xf32> to vector<32x128xf32>
    %286 = arith.addf %285, %2 : vector<32x128xf32>
    %287 = vector.broadcast %284 : vector<32x1xf32> to vector<32x128xf32>
    %288 = arith.addf %286, %287 : vector<32x128xf32>
    %c0_94 = arith.constant 0 : index
    %c0_95 = arith.constant 0 : index
    %c4224 = arith.constant 4224 : index
    %289 = vector.load %arg6[%c0_94, %c0_95, %c4224] : memref<1x32x8192xf32, #tpu.memory_space<vmem>>, vector<1x32x128xf32>
    %290 = vector.shape_cast %289 : vector<1x32x128xf32> to vector<32x128xf32>
    %291 = vector.shape_cast %288 : vector<32x128xf32> to vector<1x32x128xf32>
    tpu.vector_store %arg6[%c0_94, %c0_95, %c4224], %291 {strides = array<i32>} : memref<1x32x8192xf32, #tpu.memory_space<vmem>>, vector<1x32x128xf32>,
    %292 = vector.extract_strided_slice %4 {offsets = [0, 34], sizes = [32, 1], strides = [1, 1]} : vector<32x64xf32> to vector<32x1xf32>
    %293 = vector.extract_strided_slice %275 {offsets = [0, 256], sizes = [32, 128], strides = [1, 1]} : vector<32x1024xf32> to vector<32x128xf32>
    %294 = arith.addf %293, %2 : vector<32x128xf32>
    %295 = vector.broadcast %292 : vector<32x1xf32> to vector<32x128xf32>
    %296 = arith.addf %294, %295 : vector<32x128xf32>
    %c0_96 = arith.constant 0 : index
    %c0_97 = arith.constant 0 : index
    %c4352 = arith.constant 4352 : index
    %297 = vector.load %arg6[%c0_96, %c0_97, %c4352] : memref<1x32x8192xf32, #tpu.memory_space<vmem>>, vector<1x32x128xf32>
    %298 = vector.shape_cast %297 : vector<1x32x128xf32> to vector<32x128xf32>
    %299 = vector.shape_cast %296 : vector<32x128xf32> to vector<1x32x128xf32>
    tpu.vector_store %arg6[%c0_96, %c0_97, %c4352], %299 {strides = array<i32>} : memref<1x32x8192xf32, #tpu.memory_space<vmem>>, vector<1x32x128xf32>,
    %300 = vector.extract_strided_slice %4 {offsets = [0, 35], sizes = [32, 1], strides = [1, 1]} : vector<32x64xf32> to vector<32x1xf32>
    %301 = vector.extract_strided_slice %275 {offsets = [0, 384], sizes = [32, 128], strides = [1, 1]} : vector<32x1024xf32> to vector<32x128xf32>
    %302 = arith.addf %301, %2 : vector<32x128xf32>
    %303 = vector.broadcast %300 : vector<32x1xf32> to vector<32x128xf32>
    %304 = arith.addf %302, %303 : vector<32x128xf32>
    %c0_98 = arith.constant 0 : index
    %c0_99 = arith.constant 0 : index
    %c4480 = arith.constant 4480 : index
    %305 = vector.load %arg6[%c0_98, %c0_99, %c4480] : memref<1x32x8192xf32, #tpu.memory_space<vmem>>, vector<1x32x128xf32>
    %306 = vector.shape_cast %305 : vector<1x32x128xf32> to vector<32x128xf32>
    %307 = vector.shape_cast %304 : vector<32x128xf32> to vector<1x32x128xf32>
    tpu.vector_store %arg6[%c0_98, %c0_99, %c4480], %307 {strides = array<i32>} : memref<1x32x8192xf32, #tpu.memory_space<vmem>>, vector<1x32x128xf32>,
    %308 = vector.extract_strided_slice %4 {offsets = [0, 36], sizes = [32, 1], strides = [1, 1]} : vector<32x64xf32> to vector<32x1xf32>
    %309 = vector.extract_strided_slice %275 {offsets = [0, 512], sizes = [32, 128], strides = [1, 1]} : vector<32x1024xf32> to vector<32x128xf32>
    %310 = arith.addf %309, %2 : vector<32x128xf32>
    %311 = vector.broadcast %308 : vector<32x1xf32> to vector<32x128xf32>
    %312 = arith.addf %310, %311 : vector<32x128xf32>
    %c0_100 = arith.constant 0 : index
    %c0_101 = arith.constant 0 : index
    %c4608 = arith.constant 4608 : index
    %313 = vector.load %arg6[%c0_100, %c0_101, %c4608] : memref<1x32x8192xf32, #tpu.memory_space<vmem>>, vector<1x32x128xf32>
    %314 = vector.shape_cast %313 : vector<1x32x128xf32> to vector<32x128xf32>
    %315 = vector.shape_cast %312 : vector<32x128xf32> to vector<1x32x128xf32>
    tpu.vector_store %arg6[%c0_100, %c0_101, %c4608], %315 {strides = array<i32>} : memref<1x32x8192xf32, #tpu.memory_space<vmem>>, vector<1x32x128xf32>,
    %316 = vector.extract_strided_slice %4 {offsets = [0, 37], sizes = [32, 1], strides = [1, 1]} : vector<32x64xf32> to vector<32x1xf32>
    %317 = vector.extract_strided_slice %275 {offsets = [0, 640], sizes = [32, 128], strides = [1, 1]} : vector<32x1024xf32> to vector<32x128xf32>
    %318 = arith.addf %317, %2 : vector<32x128xf32>
    %319 = vector.broadcast %316 : vector<32x1xf32> to vector<32x128xf32>
    %320 = arith.addf %318, %319 : vector<32x128xf32>
    %c0_102 = arith.constant 0 : index
    %c0_103 = arith.constant 0 : index
    %c4736 = arith.constant 4736 : index
    %321 = vector.load %arg6[%c0_102, %c0_103, %c4736] : memref<1x32x8192xf32, #tpu.memory_space<vmem>>, vector<1x32x128xf32>
    %322 = vector.shape_cast %321 : vector<1x32x128xf32> to vector<32x128xf32>
    %323 = vector.shape_cast %320 : vector<32x128xf32> to vector<1x32x128xf32>
    tpu.vector_store %arg6[%c0_102, %c0_103, %c4736], %323 {strides = array<i32>} : memref<1x32x8192xf32, #tpu.memory_space<vmem>>, vector<1x32x128xf32>,
    %324 = vector.extract_strided_slice %4 {offsets = [0, 38], sizes = [32, 1], strides = [1, 1]} : vector<32x64xf32> to vector<32x1xf32>
    %325 = vector.extract_strided_slice %275 {offsets = [0, 768], sizes = [32, 128], strides = [1, 1]} : vector<32x1024xf32> to vector<32x128xf32>
    %326 = arith.addf %325, %2 : vector<32x128xf32>
    %327 = vector.broadcast %324 : vector<32x1xf32> to vector<32x128xf32>
    %328 = arith.addf %326, %327 : vector<32x128xf32>
    %c0_104 = arith.constant 0 : index
    %c0_105 = arith.constant 0 : index
    %c4864 = arith.constant 4864 : index
    %329 = vector.load %arg6[%c0_104, %c0_105, %c4864] : memref<1x32x8192xf32, #tpu.memory_space<vmem>>, vector<1x32x128xf32>
    %330 = vector.shape_cast %329 : vector<1x32x128xf32> to vector<32x128xf32>
    %331 = vector.shape_cast %328 : vector<32x128xf32> to vector<1x32x128xf32>
    tpu.vector_store %arg6[%c0_104, %c0_105, %c4864], %331 {strides = array<i32>} : memref<1x32x8192xf32, #tpu.memory_space<vmem>>, vector<1x32x128xf32>,
    %332 = vector.extract_strided_slice %4 {offsets = [0, 39], sizes = [32, 1], strides = [1, 1]} : vector<32x64xf32> to vector<32x1xf32>
    %333 = vector.extract_strided_slice %275 {offsets = [0, 896], sizes = [32, 128], strides = [1, 1]} : vector<32x1024xf32> to vector<32x128xf32>
    %334 = arith.addf %333, %2 : vector<32x128xf32>
    %335 = vector.broadcast %332 : vector<32x1xf32> to vector<32x128xf32>
    %336 = arith.addf %334, %335 : vector<32x128xf32>
    %c0_106 = arith.constant 0 : index
    %c0_107 = arith.constant 0 : index
    %c4992 = arith.constant 4992 : index
    %337 = vector.load %arg6[%c0_106, %c0_107, %c4992] : memref<1x32x8192xf32, #tpu.memory_space<vmem>>, vector<1x32x128xf32>
    %338 = vector.shape_cast %337 : vector<1x32x128xf32> to vector<32x128xf32>
    %339 = vector.shape_cast %336 : vector<32x128xf32> to vector<1x32x128xf32>
    tpu.vector_store %arg6[%c0_106, %c0_107, %c4992], %339 {strides = array<i32>} : memref<1x32x8192xf32, #tpu.memory_space<vmem>>, vector<1x32x128xf32>,
    %c0_108 = arith.constant 0 : index
    %c0_109 = arith.constant 0 : index
    %c5120 = arith.constant 5120 : index
    %340 = vector.load %arg2[%c0_108, %c0_109, %c5120] : memref<1x32x8192xf32, #tpu.memory_space<vmem>>, vector<1x32x1024xf32>
    %341 = vector.shape_cast %340 : vector<1x32x1024xf32> to vector<32x1024xf32>
    %cst_110 = arith.constant dense<0.000000e+00> : vector<32x1024xf32>
    %342 = tpu.matmul %0, %341, %cst_110 {dimension_numbers = #tpu.dot_dimension_numbers<[1], [0], [0], [1], [0, 0, 1, 1], [], []>} : vector<32x32xf32>, vector<32x1024xf32>, vector<32x1024xf32> -> vector<32x1024xf32>
    %343 = vector.extract_strided_slice %4 {offsets = [0, 40], sizes = [32, 1], strides = [1, 1]} : vector<32x64xf32> to vector<32x1xf32>
    %344 = vector.extract_strided_slice %342 {offsets = [0, 0], sizes = [32, 128], strides = [1, 1]} : vector<32x1024xf32> to vector<32x128xf32>
    %345 = arith.addf %344, %2 : vector<32x128xf32>
    %346 = vector.broadcast %343 : vector<32x1xf32> to vector<32x128xf32>
    %347 = arith.addf %345, %346 : vector<32x128xf32>
    %c0_111 = arith.constant 0 : index
    %c0_112 = arith.constant 0 : index
    %c5120_113 = arith.constant 5120 : index
    %348 = vector.load %arg6[%c0_111, %c0_112, %c5120_113] : memref<1x32x8192xf32, #tpu.memory_space<vmem>>, vector<1x32x128xf32>
    %349 = vector.shape_cast %348 : vector<1x32x128xf32> to vector<32x128xf32>
    %350 = vector.shape_cast %347 : vector<32x128xf32> to vector<1x32x128xf32>
    tpu.vector_store %arg6[%c0_111, %c0_112, %c5120_113], %350 {strides = array<i32>} : memref<1x32x8192xf32, #tpu.memory_space<vmem>>, vector<1x32x128xf32>,
    %351 = vector.extract_strided_slice %4 {offsets = [0, 41], sizes = [32, 1], strides = [1, 1]} : vector<32x64xf32> to vector<32x1xf32>
    %352 = vector.extract_strided_slice %342 {offsets = [0, 128], sizes = [32, 128], strides = [1, 1]} : vector<32x1024xf32> to vector<32x128xf32>
    %353 = arith.addf %352, %2 : vector<32x128xf32>
    %354 = vector.broadcast %351 : vector<32x1xf32> to vector<32x128xf32>
    %355 = arith.addf %353, %354 : vector<32x128xf32>
    %c0_114 = arith.constant 0 : index
    %c0_115 = arith.constant 0 : index
    %c5248 = arith.constant 5248 : index
    %356 = vector.load %arg6[%c0_114, %c0_115, %c5248] : memref<1x32x8192xf32, #tpu.memory_space<vmem>>, vector<1x32x128xf32>
    %357 = vector.shape_cast %356 : vector<1x32x128xf32> to vector<32x128xf32>
    %358 = vector.shape_cast %355 : vector<32x128xf32> to vector<1x32x128xf32>
    tpu.vector_store %arg6[%c0_114, %c0_115, %c5248], %358 {strides = array<i32>} : memref<1x32x8192xf32, #tpu.memory_space<vmem>>, vector<1x32x128xf32>,
    %359 = vector.extract_strided_slice %4 {offsets = [0, 42], sizes = [32, 1], strides = [1, 1]} : vector<32x64xf32> to vector<32x1xf32>
    %360 = vector.extract_strided_slice %342 {offsets = [0, 256], sizes = [32, 128], strides = [1, 1]} : vector<32x1024xf32> to vector<32x128xf32>
    %361 = arith.addf %360, %2 : vector<32x128xf32>
    %362 = vector.broadcast %359 : vector<32x1xf32> to vector<32x128xf32>
    %363 = arith.addf %361, %362 : vector<32x128xf32>
    %c0_116 = arith.constant 0 : index
    %c0_117 = arith.constant 0 : index
    %c5376 = arith.constant 5376 : index
    %364 = vector.load %arg6[%c0_116, %c0_117, %c5376] : memref<1x32x8192xf32, #tpu.memory_space<vmem>>, vector<1x32x128xf32>
    %365 = vector.shape_cast %364 : vector<1x32x128xf32> to vector<32x128xf32>
    %366 = vector.shape_cast %363 : vector<32x128xf32> to vector<1x32x128xf32>
    tpu.vector_store %arg6[%c0_116, %c0_117, %c5376], %366 {strides = array<i32>} : memref<1x32x8192xf32, #tpu.memory_space<vmem>>, vector<1x32x128xf32>,
    %367 = vector.extract_strided_slice %4 {offsets = [0, 43], sizes = [32, 1], strides = [1, 1]} : vector<32x64xf32> to vector<32x1xf32>
    %368 = vector.extract_strided_slice %342 {offsets = [0, 384], sizes = [32, 128], strides = [1, 1]} : vector<32x1024xf32> to vector<32x128xf32>
    %369 = arith.addf %368, %2 : vector<32x128xf32>
    %370 = vector.broadcast %367 : vector<32x1xf32> to vector<32x128xf32>
    %371 = arith.addf %369, %370 : vector<32x128xf32>
    %c0_118 = arith.constant 0 : index
    %c0_119 = arith.constant 0 : index
    %c5504 = arith.constant 5504 : index
    %372 = vector.load %arg6[%c0_118, %c0_119, %c5504] : memref<1x32x8192xf32, #tpu.memory_space<vmem>>, vector<1x32x128xf32>
    %373 = vector.shape_cast %372 : vector<1x32x128xf32> to vector<32x128xf32>
    %374 = vector.shape_cast %371 : vector<32x128xf32> to vector<1x32x128xf32>
    tpu.vector_store %arg6[%c0_118, %c0_119, %c5504], %374 {strides = array<i32>} : memref<1x32x8192xf32, #tpu.memory_space<vmem>>, vector<1x32x128xf32>,
    %375 = vector.extract_strided_slice %4 {offsets = [0, 44], sizes = [32, 1], strides = [1, 1]} : vector<32x64xf32> to vector<32x1xf32>
    %376 = vector.extract_strided_slice %342 {offsets = [0, 512], sizes = [32, 128], strides = [1, 1]} : vector<32x1024xf32> to vector<32x128xf32>
    %377 = arith.addf %376, %2 : vector<32x128xf32>
    %378 = vector.broadcast %375 : vector<32x1xf32> to vector<32x128xf32>
    %379 = arith.addf %377, %378 : vector<32x128xf32>
    %c0_120 = arith.constant 0 : index
    %c0_121 = arith.constant 0 : index
    %c5632 = arith.constant 5632 : index
    %380 = vector.load %arg6[%c0_120, %c0_121, %c5632] : memref<1x32x8192xf32, #tpu.memory_space<vmem>>, vector<1x32x128xf32>
    %381 = vector.shape_cast %380 : vector<1x32x128xf32> to vector<32x128xf32>
    %382 = vector.shape_cast %379 : vector<32x128xf32> to vector<1x32x128xf32>
    tpu.vector_store %arg6[%c0_120, %c0_121, %c5632], %382 {strides = array<i32>} : memref<1x32x8192xf32, #tpu.memory_space<vmem>>, vector<1x32x128xf32>,
    %383 = vector.extract_strided_slice %4 {offsets = [0, 45], sizes = [32, 1], strides = [1, 1]} : vector<32x64xf32> to vector<32x1xf32>
    %384 = vector.extract_strided_slice %342 {offsets = [0, 640], sizes = [32, 128], strides = [1, 1]} : vector<32x1024xf32> to vector<32x128xf32>
    %385 = arith.addf %384, %2 : vector<32x128xf32>
    %386 = vector.broadcast %383 : vector<32x1xf32> to vector<32x128xf32>
    %387 = arith.addf %385, %386 : vector<32x128xf32>
    %c0_122 = arith.constant 0 : index
    %c0_123 = arith.constant 0 : index
    %c5760 = arith.constant 5760 : index
    %388 = vector.load %arg6[%c0_122, %c0_123, %c5760] : memref<1x32x8192xf32, #tpu.memory_space<vmem>>, vector<1x32x128xf32>
    %389 = vector.shape_cast %388 : vector<1x32x128xf32> to vector<32x128xf32>
    %390 = vector.shape_cast %387 : vector<32x128xf32> to vector<1x32x128xf32>
    tpu.vector_store %arg6[%c0_122, %c0_123, %c5760], %390 {strides = array<i32>} : memref<1x32x8192xf32, #tpu.memory_space<vmem>>, vector<1x32x128xf32>,
    %391 = vector.extract_strided_slice %4 {offsets = [0, 46], sizes = [32, 1], strides = [1, 1]} : vector<32x64xf32> to vector<32x1xf32>
    %392 = vector.extract_strided_slice %342 {offsets = [0, 768], sizes = [32, 128], strides = [1, 1]} : vector<32x1024xf32> to vector<32x128xf32>
    %393 = arith.addf %392, %2 : vector<32x128xf32>
    %394 = vector.broadcast %391 : vector<32x1xf32> to vector<32x128xf32>
    %395 = arith.addf %393, %394 : vector<32x128xf32>
    %c0_124 = arith.constant 0 : index
    %c0_125 = arith.constant 0 : index
    %c5888 = arith.constant 5888 : index
    %396 = vector.load %arg6[%c0_124, %c0_125, %c5888] : memref<1x32x8192xf32, #tpu.memory_space<vmem>>, vector<1x32x128xf32>
    %397 = vector.shape_cast %396 : vector<1x32x128xf32> to vector<32x128xf32>
    %398 = vector.shape_cast %395 : vector<32x128xf32> to vector<1x32x128xf32>
    tpu.vector_store %arg6[%c0_124, %c0_125, %c5888], %398 {strides = array<i32>} : memref<1x32x8192xf32, #tpu.memory_space<vmem>>, vector<1x32x128xf32>,
    %399 = vector.extract_strided_slice %4 {offsets = [0, 47], sizes = [32, 1], strides = [1, 1]} : vector<32x64xf32> to vector<32x1xf32>
    %400 = vector.extract_strided_slice %342 {offsets = [0, 896], sizes = [32, 128], strides = [1, 1]} : vector<32x1024xf32> to vector<32x128xf32>
    %401 = arith.addf %400, %2 : vector<32x128xf32>
    %402 = vector.broadcast %399 : vector<32x1xf32> to vector<32x128xf32>
    %403 = arith.addf %401, %402 : vector<32x128xf32>
    %c0_126 = arith.constant 0 : index
    %c0_127 = arith.constant 0 : index
    %c6016 = arith.constant 6016 : index
    %404 = vector.load %arg6[%c0_126, %c0_127, %c6016] : memref<1x32x8192xf32, #tpu.memory_space<vmem>>, vector<1x32x128xf32>
    %405 = vector.shape_cast %404 : vector<1x32x128xf32> to vector<32x128xf32>
    %406 = vector.shape_cast %403 : vector<32x128xf32> to vector<1x32x128xf32>
    tpu.vector_store %arg6[%c0_126, %c0_127, %c6016], %406 {strides = array<i32>} : memref<1x32x8192xf32, #tpu.memory_space<vmem>>, vector<1x32x128xf32>,
    %c0_128 = arith.constant 0 : index
    %c0_129 = arith.constant 0 : index
    %c6144 = arith.constant 6144 : index
    %407 = vector.load %arg2[%c0_128, %c0_129, %c6144] : memref<1x32x8192xf32, #tpu.memory_space<vmem>>, vector<1x32x1024xf32>
    %408 = vector.shape_cast %407 : vector<1x32x1024xf32> to vector<32x1024xf32>
    %cst_130 = arith.constant dense<0.000000e+00> : vector<32x1024xf32>
    %409 = tpu.matmul %0, %408, %cst_130 {dimension_numbers = #tpu.dot_dimension_numbers<[1], [0], [0], [1], [0, 0, 1, 1], [], []>} : vector<32x32xf32>, vector<32x1024xf32>, vector<32x1024xf32> -> vector<32x1024xf32>
    %410 = vector.extract_strided_slice %4 {offsets = [0, 48], sizes = [32, 1], strides = [1, 1]} : vector<32x64xf32> to vector<32x1xf32>
    %411 = vector.extract_strided_slice %409 {offsets = [0, 0], sizes = [32, 128], strides = [1, 1]} : vector<32x1024xf32> to vector<32x128xf32>
    %412 = arith.addf %411, %2 : vector<32x128xf32>
    %413 = vector.broadcast %410 : vector<32x1xf32> to vector<32x128xf32>
    %414 = arith.addf %412, %413 : vector<32x128xf32>
    %c0_131 = arith.constant 0 : index
    %c0_132 = arith.constant 0 : index
    %c6144_133 = arith.constant 6144 : index
    %415 = vector.load %arg6[%c0_131, %c0_132, %c6144_133] : memref<1x32x8192xf32, #tpu.memory_space<vmem>>, vector<1x32x128xf32>
    %416 = vector.shape_cast %415 : vector<1x32x128xf32> to vector<32x128xf32>
    %417 = vector.shape_cast %414 : vector<32x128xf32> to vector<1x32x128xf32>
    tpu.vector_store %arg6[%c0_131, %c0_132, %c6144_133], %417 {strides = array<i32>} : memref<1x32x8192xf32, #tpu.memory_space<vmem>>, vector<1x32x128xf32>,
    %418 = vector.extract_strided_slice %4 {offsets = [0, 49], sizes = [32, 1], strides = [1, 1]} : vector<32x64xf32> to vector<32x1xf32>
    %419 = vector.extract_strided_slice %409 {offsets = [0, 128], sizes = [32, 128], strides = [1, 1]} : vector<32x1024xf32> to vector<32x128xf32>
    %420 = arith.addf %419, %2 : vector<32x128xf32>
    %421 = vector.broadcast %418 : vector<32x1xf32> to vector<32x128xf32>
    %422 = arith.addf %420, %421 : vector<32x128xf32>
    %c0_134 = arith.constant 0 : index
    %c0_135 = arith.constant 0 : index
    %c6272 = arith.constant 6272 : index
    %423 = vector.load %arg6[%c0_134, %c0_135, %c6272] : memref<1x32x8192xf32, #tpu.memory_space<vmem>>, vector<1x32x128xf32>
    %424 = vector.shape_cast %423 : vector<1x32x128xf32> to vector<32x128xf32>
    %425 = vector.shape_cast %422 : vector<32x128xf32> to vector<1x32x128xf32>
    tpu.vector_store %arg6[%c0_134, %c0_135, %c6272], %425 {strides = array<i32>} : memref<1x32x8192xf32, #tpu.memory_space<vmem>>, vector<1x32x128xf32>,
    %426 = vector.extract_strided_slice %4 {offsets = [0, 50], sizes = [32, 1], strides = [1, 1]} : vector<32x64xf32> to vector<32x1xf32>
    %427 = vector.extract_strided_slice %409 {offsets = [0, 256], sizes = [32, 128], strides = [1, 1]} : vector<32x1024xf32> to vector<32x128xf32>
    %428 = arith.addf %427, %2 : vector<32x128xf32>
    %429 = vector.broadcast %426 : vector<32x1xf32> to vector<32x128xf32>
    %430 = arith.addf %428, %429 : vector<32x128xf32>
    %c0_136 = arith.constant 0 : index
    %c0_137 = arith.constant 0 : index
    %c6400 = arith.constant 6400 : index
    %431 = vector.load %arg6[%c0_136, %c0_137, %c6400] : memref<1x32x8192xf32, #tpu.memory_space<vmem>>, vector<1x32x128xf32>
    %432 = vector.shape_cast %431 : vector<1x32x128xf32> to vector<32x128xf32>
    %433 = vector.shape_cast %430 : vector<32x128xf32> to vector<1x32x128xf32>
    tpu.vector_store %arg6[%c0_136, %c0_137, %c6400], %433 {strides = array<i32>} : memref<1x32x8192xf32, #tpu.memory_space<vmem>>, vector<1x32x128xf32>,
    %434 = vector.extract_strided_slice %4 {offsets = [0, 51], sizes = [32, 1], strides = [1, 1]} : vector<32x64xf32> to vector<32x1xf32>
    %435 = vector.extract_strided_slice %409 {offsets = [0, 384], sizes = [32, 128], strides = [1, 1]} : vector<32x1024xf32> to vector<32x128xf32>
    %436 = arith.addf %435, %2 : vector<32x128xf32>
    %437 = vector.broadcast %434 : vector<32x1xf32> to vector<32x128xf32>
    %438 = arith.addf %436, %437 : vector<32x128xf32>
    %c0_138 = arith.constant 0 : index
    %c0_139 = arith.constant 0 : index
    %c6528 = arith.constant 6528 : index
    %439 = vector.load %arg6[%c0_138, %c0_139, %c6528] : memref<1x32x8192xf32, #tpu.memory_space<vmem>>, vector<1x32x128xf32>
    %440 = vector.shape_cast %439 : vector<1x32x128xf32> to vector<32x128xf32>
    %441 = vector.shape_cast %438 : vector<32x128xf32> to vector<1x32x128xf32>
    tpu.vector_store %arg6[%c0_138, %c0_139, %c6528], %441 {strides = array<i32>} : memref<1x32x8192xf32, #tpu.memory_space<vmem>>, vector<1x32x128xf32>,
    %442 = vector.extract_strided_slice %4 {offsets = [0, 52], sizes = [32, 1], strides = [1, 1]} : vector<32x64xf32> to vector<32x1xf32>
    %443 = vector.extract_strided_slice %409 {offsets = [0, 512], sizes = [32, 128], strides = [1, 1]} : vector<32x1024xf32> to vector<32x128xf32>
    %444 = arith.addf %443, %2 : vector<32x128xf32>
    %445 = vector.broadcast %442 : vector<32x1xf32> to vector<32x128xf32>
    %446 = arith.addf %444, %445 : vector<32x128xf32>
    %c0_140 = arith.constant 0 : index
    %c0_141 = arith.constant 0 : index
    %c6656 = arith.constant 6656 : index
    %447 = vector.load %arg6[%c0_140, %c0_141, %c6656] : memref<1x32x8192xf32, #tpu.memory_space<vmem>>, vector<1x32x128xf32>
    %448 = vector.shape_cast %447 : vector<1x32x128xf32> to vector<32x128xf32>
    %449 = vector.shape_cast %446 : vector<32x128xf32> to vector<1x32x128xf32>
    tpu.vector_store %arg6[%c0_140, %c0_141, %c6656], %449 {strides = array<i32>} : memref<1x32x8192xf32, #tpu.memory_space<vmem>>, vector<1x32x128xf32>,
    %450 = vector.extract_strided_slice %4 {offsets = [0, 53], sizes = [32, 1], strides = [1, 1]} : vector<32x64xf32> to vector<32x1xf32>
    %451 = vector.extract_strided_slice %409 {offsets = [0, 640], sizes = [32, 128], strides = [1, 1]} : vector<32x1024xf32> to vector<32x128xf32>
    %452 = arith.addf %451, %2 : vector<32x128xf32>
    %453 = vector.broadcast %450 : vector<32x1xf32> to vector<32x128xf32>
    %454 = arith.addf %452, %453 : vector<32x128xf32>
    %c0_142 = arith.constant 0 : index
    %c0_143 = arith.constant 0 : index
    %c6784 = arith.constant 6784 : index
    %455 = vector.load %arg6[%c0_142, %c0_143, %c6784] : memref<1x32x8192xf32, #tpu.memory_space<vmem>>, vector<1x32x128xf32>
    %456 = vector.shape_cast %455 : vector<1x32x128xf32> to vector<32x128xf32>
    %457 = vector.shape_cast %454 : vector<32x128xf32> to vector<1x32x128xf32>
    tpu.vector_store %arg6[%c0_142, %c0_143, %c6784], %457 {strides = array<i32>} : memref<1x32x8192xf32, #tpu.memory_space<vmem>>, vector<1x32x128xf32>,
    %458 = vector.extract_strided_slice %4 {offsets = [0, 54], sizes = [32, 1], strides = [1, 1]} : vector<32x64xf32> to vector<32x1xf32>
    %459 = vector.extract_strided_slice %409 {offsets = [0, 768], sizes = [32, 128], strides = [1, 1]} : vector<32x1024xf32> to vector<32x128xf32>
    %460 = arith.addf %459, %2 : vector<32x128xf32>
    %461 = vector.broadcast %458 : vector<32x1xf32> to vector<32x128xf32>
    %462 = arith.addf %460, %461 : vector<32x128xf32>
    %c0_144 = arith.constant 0 : index
    %c0_145 = arith.constant 0 : index
    %c6912 = arith.constant 6912 : index
    %463 = vector.load %arg6[%c0_144, %c0_145, %c6912] : memref<1x32x8192xf32, #tpu.memory_space<vmem>>, vector<1x32x128xf32>
    %464 = vector.shape_cast %463 : vector<1x32x128xf32> to vector<32x128xf32>
    %465 = vector.shape_cast %462 : vector<32x128xf32> to vector<1x32x128xf32>
    tpu.vector_store %arg6[%c0_144, %c0_145, %c6912], %465 {strides = array<i32>} : memref<1x32x8192xf32, #tpu.memory_space<vmem>>, vector<1x32x128xf32>,
    %466 = vector.extract_strided_slice %4 {offsets = [0, 55], sizes = [32, 1], strides = [1, 1]} : vector<32x64xf32> to vector<32x1xf32>
    %467 = vector.extract_strided_slice %409 {offsets = [0, 896], sizes = [32, 128], strides = [1, 1]} : vector<32x1024xf32> to vector<32x128xf32>
    %468 = arith.addf %467, %2 : vector<32x128xf32>
    %469 = vector.broadcast %466 : vector<32x1xf32> to vector<32x128xf32>
    %470 = arith.addf %468, %469 : vector<32x128xf32>
    %c0_146 = arith.constant 0 : index
    %c0_147 = arith.constant 0 : index
    %c7040 = arith.constant 7040 : index
    %471 = vector.load %arg6[%c0_146, %c0_147, %c7040] : memref<1x32x8192xf32, #tpu.memory_space<vmem>>, vector<1x32x128xf32>
    %472 = vector.shape_cast %471 : vector<1x32x128xf32> to vector<32x128xf32>
    %473 = vector.shape_cast %470 : vector<32x128xf32> to vector<1x32x128xf32>
    tpu.vector_store %arg6[%c0_146, %c0_147, %c7040], %473 {strides = array<i32>} : memref<1x32x8192xf32, #tpu.memory_space<vmem>>, vector<1x32x128xf32>,
    %c0_148 = arith.constant 0 : index
    %c0_149 = arith.constant 0 : index
    %c7168 = arith.constant 7168 : index
    %474 = vector.load %arg2[%c0_148, %c0_149, %c7168] : memref<1x32x8192xf32, #tpu.memory_space<vmem>>, vector<1x32x1024xf32>
    %475 = vector.shape_cast %474 : vector<1x32x1024xf32> to vector<32x1024xf32>
    %cst_150 = arith.constant dense<0.000000e+00> : vector<32x1024xf32>
    %476 = tpu.matmul %0, %475, %cst_150 {dimension_numbers = #tpu.dot_dimension_numbers<[1], [0], [0], [1], [0, 0, 1, 1], [], []>} : vector<32x32xf32>, vector<32x1024xf32>, vector<32x1024xf32> -> vector<32x1024xf32>
    %477 = vector.extract_strided_slice %4 {offsets = [0, 56], sizes = [32, 1], strides = [1, 1]} : vector<32x64xf32> to vector<32x1xf32>
    %478 = vector.extract_strided_slice %476 {offsets = [0, 0], sizes = [32, 128], strides = [1, 1]} : vector<32x1024xf32> to vector<32x128xf32>
    %479 = arith.addf %478, %2 : vector<32x128xf32>
    %480 = vector.broadcast %477 : vector<32x1xf32> to vector<32x128xf32>
    %481 = arith.addf %479, %480 : vector<32x128xf32>
    %c0_151 = arith.constant 0 : index
    %c0_152 = arith.constant 0 : index
    %c7168_153 = arith.constant 7168 : index
    %482 = vector.load %arg6[%c0_151, %c0_152, %c7168_153] : memref<1x32x8192xf32, #tpu.memory_space<vmem>>, vector<1x32x128xf32>
    %483 = vector.shape_cast %482 : vector<1x32x128xf32> to vector<32x128xf32>
    %484 = vector.shape_cast %481 : vector<32x128xf32> to vector<1x32x128xf32>
    tpu.vector_store %arg6[%c0_151, %c0_152, %c7168_153], %484 {strides = array<i32>} : memref<1x32x8192xf32, #tpu.memory_space<vmem>>, vector<1x32x128xf32>,
    %485 = vector.extract_strided_slice %4 {offsets = [0, 57], sizes = [32, 1], strides = [1, 1]} : vector<32x64xf32> to vector<32x1xf32>
    %486 = vector.extract_strided_slice %476 {offsets = [0, 128], sizes = [32, 128], strides = [1, 1]} : vector<32x1024xf32> to vector<32x128xf32>
    %487 = arith.addf %486, %2 : vector<32x128xf32>
    %488 = vector.broadcast %485 : vector<32x1xf32> to vector<32x128xf32>
    %489 = arith.addf %487, %488 : vector<32x128xf32>
    %c0_154 = arith.constant 0 : index
    %c0_155 = arith.constant 0 : index
    %c7296 = arith.constant 7296 : index
    %490 = vector.load %arg6[%c0_154, %c0_155, %c7296] : memref<1x32x8192xf32, #tpu.memory_space<vmem>>, vector<1x32x128xf32>
    %491 = vector.shape_cast %490 : vector<1x32x128xf32> to vector<32x128xf32>
    %492 = vector.shape_cast %489 : vector<32x128xf32> to vector<1x32x128xf32>
    tpu.vector_store %arg6[%c0_154, %c0_155, %c7296], %492 {strides = array<i32>} : memref<1x32x8192xf32, #tpu.memory_space<vmem>>, vector<1x32x128xf32>,
    %493 = vector.extract_strided_slice %4 {offsets = [0, 58], sizes = [32, 1], strides = [1, 1]} : vector<32x64xf32> to vector<32x1xf32>
    %494 = vector.extract_strided_slice %476 {offsets = [0, 256], sizes = [32, 128], strides = [1, 1]} : vector<32x1024xf32> to vector<32x128xf32>
    %495 = arith.addf %494, %2 : vector<32x128xf32>
    %496 = vector.broadcast %493 : vector<32x1xf32> to vector<32x128xf32>
    %497 = arith.addf %495, %496 : vector<32x128xf32>
    %c0_156 = arith.constant 0 : index
    %c0_157 = arith.constant 0 : index
    %c7424 = arith.constant 7424 : index
    %498 = vector.load %arg6[%c0_156, %c0_157, %c7424] : memref<1x32x8192xf32, #tpu.memory_space<vmem>>, vector<1x32x128xf32>
    %499 = vector.shape_cast %498 : vector<1x32x128xf32> to vector<32x128xf32>
    %500 = vector.shape_cast %497 : vector<32x128xf32> to vector<1x32x128xf32>
    tpu.vector_store %arg6[%c0_156, %c0_157, %c7424], %500 {strides = array<i32>} : memref<1x32x8192xf32, #tpu.memory_space<vmem>>, vector<1x32x128xf32>,
    %501 = vector.extract_strided_slice %4 {offsets = [0, 59], sizes = [32, 1], strides = [1, 1]} : vector<32x64xf32> to vector<32x1xf32>
    %502 = vector.extract_strided_slice %476 {offsets = [0, 384], sizes = [32, 128], strides = [1, 1]} : vector<32x1024xf32> to vector<32x128xf32>
    %503 = arith.addf %502, %2 : vector<32x128xf32>
    %504 = vector.broadcast %501 : vector<32x1xf32> to vector<32x128xf32>
    %505 = arith.addf %503, %504 : vector<32x128xf32>
    %c0_158 = arith.constant 0 : index
    %c0_159 = arith.constant 0 : index
    %c7552 = arith.constant 7552 : index
    %506 = vector.load %arg6[%c0_158, %c0_159, %c7552] : memref<1x32x8192xf32, #tpu.memory_space<vmem>>, vector<1x32x128xf32>
    %507 = vector.shape_cast %506 : vector<1x32x128xf32> to vector<32x128xf32>
    %508 = vector.shape_cast %505 : vector<32x128xf32> to vector<1x32x128xf32>
    tpu.vector_store %arg6[%c0_158, %c0_159, %c7552], %508 {strides = array<i32>} : memref<1x32x8192xf32, #tpu.memory_space<vmem>>, vector<1x32x128xf32>,
    %509 = vector.extract_strided_slice %4 {offsets = [0, 60], sizes = [32, 1], strides = [1, 1]} : vector<32x64xf32> to vector<32x1xf32>
    %510 = vector.extract_strided_slice %476 {offsets = [0, 512], sizes = [32, 128], strides = [1, 1]} : vector<32x1024xf32> to vector<32x128xf32>
    %511 = arith.addf %510, %2 : vector<32x128xf32>
    %512 = vector.broadcast %509 : vector<32x1xf32> to vector<32x128xf32>
    %513 = arith.addf %511, %512 : vector<32x128xf32>
    %c0_160 = arith.constant 0 : index
    %c0_161 = arith.constant 0 : index
    %c7680 = arith.constant 7680 : index
    %514 = vector.load %arg6[%c0_160, %c0_161, %c7680] : memref<1x32x8192xf32, #tpu.memory_space<vmem>>, vector<1x32x128xf32>
    %515 = vector.shape_cast %514 : vector<1x32x128xf32> to vector<32x128xf32>
    %516 = vector.shape_cast %513 : vector<32x128xf32> to vector<1x32x128xf32>
    tpu.vector_store %arg6[%c0_160, %c0_161, %c7680], %516 {strides = array<i32>} : memref<1x32x8192xf32, #tpu.memory_space<vmem>>, vector<1x32x128xf32>,
    %517 = vector.extract_strided_slice %4 {offsets = [0, 61], sizes = [32, 1], strides = [1, 1]} : vector<32x64xf32> to vector<32x1xf32>
    %518 = vector.extract_strided_slice %476 {offsets = [0, 640], sizes = [32, 128], strides = [1, 1]} : vector<32x1024xf32> to vector<32x128xf32>
    %519 = arith.addf %518, %2 : vector<32x128xf32>
    %520 = vector.broadcast %517 : vector<32x1xf32> to vector<32x128xf32>
    %521 = arith.addf %519, %520 : vector<32x128xf32>
    %c0_162 = arith.constant 0 : index
    %c0_163 = arith.constant 0 : index
    %c7808 = arith.constant 7808 : index
    %522 = vector.load %arg6[%c0_162, %c0_163, %c7808] : memref<1x32x8192xf32, #tpu.memory_space<vmem>>, vector<1x32x128xf32>
    %523 = vector.shape_cast %522 : vector<1x32x128xf32> to vector<32x128xf32>
    %524 = vector.shape_cast %521 : vector<32x128xf32> to vector<1x32x128xf32>
    tpu.vector_store %arg6[%c0_162, %c0_163, %c7808], %524 {strides = array<i32>} : memref<1x32x8192xf32, #tpu.memory_space<vmem>>, vector<1x32x128xf32>,
    %525 = vector.extract_strided_slice %4 {offsets = [0, 62], sizes = [32, 1], strides = [1, 1]} : vector<32x64xf32> to vector<32x1xf32>
    %526 = vector.extract_strided_slice %476 {offsets = [0, 768], sizes = [32, 128], strides = [1, 1]} : vector<32x1024xf32> to vector<32x128xf32>
    %527 = arith.addf %526, %2 : vector<32x128xf32>
    %528 = vector.broadcast %525 : vector<32x1xf32> to vector<32x128xf32>
    %529 = arith.addf %527, %528 : vector<32x128xf32>
    %c0_164 = arith.constant 0 : index
    %c0_165 = arith.constant 0 : index
    %c7936 = arith.constant 7936 : index
    %530 = vector.load %arg6[%c0_164, %c0_165, %c7936] : memref<1x32x8192xf32, #tpu.memory_space<vmem>>, vector<1x32x128xf32>
    %531 = vector.shape_cast %530 : vector<1x32x128xf32> to vector<32x128xf32>
    %532 = vector.shape_cast %529 : vector<32x128xf32> to vector<1x32x128xf32>
    tpu.vector_store %arg6[%c0_164, %c0_165, %c7936], %532 {strides = array<i32>} : memref<1x32x8192xf32, #tpu.memory_space<vmem>>, vector<1x32x128xf32>,
    %533 = vector.extract_strided_slice %4 {offsets = [0, 63], sizes = [32, 1], strides = [1, 1]} : vector<32x64xf32> to vector<32x1xf32>
    %534 = vector.extract_strided_slice %476 {offsets = [0, 896], sizes = [32, 128], strides = [1, 1]} : vector<32x1024xf32> to vector<32x128xf32>
    %535 = arith.addf %534, %2 : vector<32x128xf32>
    %536 = vector.broadcast %533 : vector<32x1xf32> to vector<32x128xf32>
    %537 = arith.addf %535, %536 : vector<32x128xf32>
    %c0_166 = arith.constant 0 : index
    %c0_167 = arith.constant 0 : index
    %c8064 = arith.constant 8064 : index
    %538 = vector.load %arg6[%c0_166, %c0_167, %c8064] : memref<1x32x8192xf32, #tpu.memory_space<vmem>>, vector<1x32x128xf32>
    %539 = vector.shape_cast %538 : vector<1x32x128xf32> to vector<32x128xf32>
    %540 = vector.shape_cast %537 : vector<32x128xf32> to vector<1x32x128xf32>
    tpu.vector_store %arg6[%c0_166, %c0_167, %c8064], %540 {strides = array<i32>} : memref<1x32x8192xf32, #tpu.memory_space<vmem>>, vector<1x32x128xf32>,
    return
  }
  func.func @transform_0(%arg0: i32, %arg1: i32) -> (i32, i32, i32) {
    %c0_i32 = arith.constant 0 : i32
    %c0_i32_0 = arith.constant 0 : i32
    return %arg0, %c0_i32, %arg1 : i32, i32, i32
  }
  func.func @transform_1(%arg0: i32, %arg1: i32) -> (i32, i32) {
    %c0_i32 = arith.constant 0 : i32
    %c0_i32_0 = arith.constant 0 : i32
    %c0_i32_1 = arith.constant 0 : i32
    return %c0_i32, %c0_i32_0 : i32, i32
  }
  func.func @transform_2(%arg0: i32, %arg1: i32) -> (i32, i32, i32) {
    %c0_i32 = arith.constant 0 : i32
    %c0_i32_0 = arith.constant 0 : i32
    %c0_i32_1 = arith.constant 0 : i32
    return %arg0, %c0_i32, %c0_i32_0 : i32, i32, i32
  }
  func.func @transform_3(%arg0: i32, %arg1: i32) -> (i32, i32, i32, i32) {
    %c0_i32 = arith.constant 0 : i32
    %c0_i32_0 = arith.constant 0 : i32
    %c0_i32_1 = arith.constant 0 : i32
    return %arg0, %arg1, %c0_i32, %c0_i32_0 : i32, i32, i32, i32
  }
  func.func @transform_4(%arg0: i32, %arg1: i32) -> (i32, i32, i32) {
    %c0_i32 = arith.constant 0 : i32
    %c0_i32_0 = arith.constant 0 : i32
    return %arg0, %c0_i32, %arg1 : i32, i32, i32
  }
}

</mosaic_0001>

<bundles_post_ra>
// kernel: tpu_custom_call.1
= control target key start
LH: loop header
LB: loop body
LE: loop exit
PB: predicated region body
PF: predicated region fallthrough
CT: control target
= control target key end

     0   :  { %s7923_s0 = inlined_call_operand.hbm [shape: f32[2,32,16384], index: 0, kind: input, shape index: {}]   ;;  %s7924_s1 = inlined_call_operand.hbm [shape: f32[32,32], index: 1, kind: input, shape index: {}]   ;;  %s7925_s2 = inlined_call_operand.hbm [shape: f32[2,32,128], index: 2, kind: input, shape index: {}]   ;;  %s7926_s3 = inlined_call_operand.hbm [shape: f32[2,2,32,64], index: 3, kind: input, shape index: {}]   ;;  %s7927_s4 = inlined_call_operand.hbm [shape: f32[2,32,16384], index: 4, kind: output, shape index: {}]  }
   0x1   :  { %7939 = sst [smem:[#allocation23_spill]] %s7923_s0 }
   0x2   :  { %7940 = sst [smem:[#allocation24_spill]] %s7924_s1 }
   0x3   :  { %7941 = sst [smem:[#allocation25_spill]] %s7925_s2 }
   0x4   :  { %9 = vsyncpa [#allocation3], 0 }
   0x5   :  { %11 = vsyncpa [#allocation3 + $0x1], 0 }
   0x6   :  { %12 = vsyncpa [#allocation6], 0 }
   0x7   :  { %13 = vsyncpa [#allocation4], 0 }
   0x8   :  { %15 = vsyncpa [#allocation4 + $0x1], 0  ;;  %s5492_s15 = smov 0   ;;  %s5494_s16 = smov 0  }
   0x9   :  { %s5496_s17 = smov 0   ;;  %s5498_s18 = smov 0  }
   0xa   :  { %s5500_s19 = smov 0   ;;  %s5502_s20 = smov 0  }
   0xb   :  { %s5504_s21 = smov 0   ;;  %s5506_s22 = smov 0  }
   0xc   :  { %s5508_s23 = smov 0   ;;  %s5510_s24 = smov 0  }
   0xd   :  { %s5512_s25 = smov 0  }
   0xe LB: > { %7942 = sst [smem:[#allocation15_spill]] %s5360_s17  ;;  %s30_s26 = sadd.s32 1, %s5384_s23  ;;  %s5392_s25 = sphi %s5512_s25, %s21_s25   ;;  %s5388_s24 = sphi %s5510_s24, %s7978_s24   ;;  %s5384_s23 = sphi %s5508_s23, %s7977_s23   ;;  %s5380_s22 = sphi %s5506_s22, %s7976_s22   ;;  %s5376_s21 = sphi %s5504_s21, %s7975_s21   ;;  %s5372_s20 = sphi %s5502_s20, %s7968_s20   ;;  %s5368_s19 = sphi %s5500_s19, %s7974_s19   ;;  %s5364_s18 = sphi %s5498_s18, %s7973_s18   ;;  %s5360_s17 = sphi %s5496_s17, %s7966_s17   ;;  %s5356_s16 = sphi %s5494_s16, %s7972_s16   ;;  %s5352_s15 = sphi %s5492_s15, %s7971_s15  }
   0xf   : > { %7943 = sst [smem:[#allocation16_spill]] %s5364_s18  ;;  %s33_s27 = sadd.s32 1, %s5388_s24 }
  0x10   : > { %7944 = sst [smem:[#allocation17_spill]] %s5372_s20  ;;  %p31_p0 = scmp.ge.s32.totalorder %s30_s26, 2 }
  0x11   : > { %s42_s28 = sadd.s32 1, %s5372_s20  ;;  %p49_p1 = scmp.ne.s32.totalorder %s5372_s20, %s5368_s19 }
  0x12   : > { %p50_p2 = scmp.eq.s32.totalorder %s5392_s25, 0  ;;  %s7980_s26 = smov (%p31_p0, %s30_s26), 0 }
  0x13   : > { %7945 = sst [smem:[#allocation18_spill]] %s7980_s26  ;;  %s7982_s27 = smov (!%p31_p0, %s33_s27), %s5388_s24 }
  0x14   : > { %s38_s29 = ssub.s32 %s5384_s23, %s7980_s26  ;;  %p5563_p3 = por %p50_p2, %p49_p1 }
  0x15   : > { %p35_p4 = scmp.ge.s32.totalorder %s7982_s27, 2  ;;  %p4747_p5 = scmp.lt.s32.totalorder %s5392_s25, 4 }
  0x16   : > { %s196_s5 = sand.u32 1, %s5392_s25   ;;  %s7930_s6 = sand.u32 1, %s5372_s20  }
  0x17   : > { %s7984_s27 = smov (%p35_p4, %s7982_s27), 0  ;;  %s4436_s8 = sshll.u32 %s7930_s6, 11 }
  0x18   : > { %7947 = sst [smem:[#allocation19_spill]] %s7984_s27  ;;  %s37_s7 = ssub.s32 %s5388_s24, %s7984_s27 }
  0x19   : > { %s39_s9 = sor.u32 %s38_s29, %s37_s7  ;;  %p87_p6 = scmp.eq.s32.totalorder %s37_s7, 0 }
  0x1a   : > { %p40_p7 = scmp.eq.s32.totalorder %s39_s9, 0  ;;  %s4437_s10 = sshll.u32 %s5384_s23, 6 }
  0x1b   : > { %s4438_s11 = sshll.u32 %s5388_s24, 9  ;;  %s200_s14 = scalar_lea.vmem [#allocation2], %s4436_s8 }
  0x1c   : > { %s5579_s12 = scalar_select %p40_p7, %s5372_s20, %s42_s28  }
  0x1d   : > { %s205_s13 = sadd.s32 %s4438_s11, %s4437_s10  ;;  %s210_s26 = sshll.u32 %s200_s14, 4  ;;  %s211_s26 = int_to_ptr.vmem [resolvable:$true] %s210_s26 }
  0x1e   : > { %7948 = sst [smem:[#allocation20_spill]] %s5579_s12  ;;  %s4439_s27 = sshll.u32 %s205_s13, 3 }
  0x1f   : > { %s7949_s0 = sld [smem:[#allocation23_spill]]  ;;  %p5588_p8 = pnand %p4747_p5, %p5563_p3 }
  0x20   : > { %s5592_s10 = scalar_lea.sflag [#allocation3], %s196_s5  ;;  %s5394_s11 = smov 16384  }
  0x21   : > { %s5395_s13 = smov 8192   ;;  %s5396_s14 = smov 512  }
  0x22   : > { %s89_s6 = sadd.s32 1, %s5360_s17  ;;  %p96_p9 = scmp.ne.s32.totalorder %s5360_s17, %s5356_s16 }
  0x23   : > { %p102_p11 = scmp.ne.s32.totalorder %s5356_s16, %s5352_s15  ;;  %s222_s30 = sand.u32 1, %s5360_s17  }
  0x24   : > { %p98_p10 = por %p96_p9, %p50_p2  ;;  %s4715_s5 = sshll.u32 %s5388_s24, 5 }
  0x25   : > { %s207_s9 = scalar_lea.hbm %s7949_s0, %s4439_s27  ;;  %s4440_s29 = sshll.u32 %s222_s30, 5 }
  0x26   : > { %s208_s8 = sshll.u32 %s207_s9, 4  ;;  %s7952_s2 = sld [smem:[#allocation25_spill]]  ;;  %s209_s8 = int_to_ptr.hbm [resolvable:$true] %s208_s8 }
  0x27   : > { %4735 = dma.hbm_to_vmem [thread:$0]  (!%p5588_p8), %s209_s8, 32768, %s211_s26, %s5592_s10, %s5394_s11, %s5395_s13, %s5396_s14  }
  0x28   : > { %s5602_s27 = scalar_select %p87_p6, %s5360_s17, %s89_s6  }
  0x29   : > { %s224_s7 = scalar_lea.vmem [#allocation7], %s4440_s29  ;;  %p4736_p12 = pnand %p4747_p5, %p98_p10 }
  0x2a   : > { %7951 = sst [smem:[#allocation21_spill]] %s5602_s27  ;;  %s232_s11 = sshll.u32 %s224_s7, 4  ;;  %s233_s11 = int_to_ptr.vmem [resolvable:$true] %s232_s11 }
  0x2b   : > { %s7931_s13 = smov 128   ;;  %s7933_s14 = smov 8  }
  0x2c   : > { %s229_s26 = scalar_lea.hbm %s7952_s2, %s4715_s5  ;;  %s5620_s0 = sadd.s32 4294967295, %s5392_s25  }
  0x2d   : > { %s230_s8 = sshll.u32 %s229_s26, 4  ;;  %s4432_s6 = sadd.s32 4294967294, %s5392_s25   ;;  %s231_s8 = int_to_ptr.hbm [resolvable:$true] %s230_s8 }
  0x2e   : > { %4738 = dma.hbm_to_vmem [thread:$0]  (!%p4736_p12), %s231_s8, 512, %s233_s11, %s5592_s10, %s7931_s13, %s7931_s13, %s7933_s14  }
  0x2f   : > { %p55_p13 = scmp.ne.s32.totalorder %s5368_s19, %s5364_s18  ;;  %p56_p0 = scmp.eq.s32.totalorder %s5620_s0, 0 }
  0x30   : > { %p156_p2 = scmp.eq.s32.totalorder %s5620_s0, 3  ;;  %p162_p3 = scmp.eq.s32.totalorder %s4432_s6, 3 }
  0x31   : > { %p4433_p4 = scmp.ge.s32.totalorder %s5392_s25, 1  ;;  %p5630_p5 = por %p56_p0, %p55_p13 }
  0x32   : > { %p5639_p6 = por %p102_p11, %p56_p0  ;;  %p5646_p7 = por %p156_p2, %p49_p1 }
  0x33   : > { %p5650_p9 = por %p162_p3, %p55_p13  ;;  %p169_p10 = scmp.lt.s32.totalorder %s5392_s25, 5 }
  0x34   : > { %s7958_s1 = sld [smem:[#allocation24_spill]]  ;;  %s5399_s11 = smov [#allocation5]  }
  0x35   : > { %s7956_s9 = scalar_select %p5650_p9, 1, 0 }
  0x36   : > { %p5658_p12 = pnand %p4433_p4, %p169_p10  ;;  %s182_s6 = sshll.u32 %s5399_s11, 4  ;;  %s183_s6 = int_to_ptr.vmem [resolvable:$true] %s182_s6 }
  0x37   : > { %7957 = sst [smem:[#allocation22_spill]] %s7956_s9  ;;  %s7960_s13 = sand.u32 1, %s5372_s20  }
  0x38   : > { %s4443_s14 = sshll.u32 %s7960_s13, 5  ;;  %p4728_p1 = pneg %p5658_p12 }
  0x39   : > { %s4444_s2 = sshll.u32 %s5384_s23, 2  ;;  %s4445_s26 = sshll.u32 %s5388_s24, 3 }
  0x3a   : > { %s180_s7 = sshll.u32 %s7958_s1, 4  ;;  %p4729_p11 = pnand %p4728_p1, %p56_p0  ;;  %s181_s7 = int_to_ptr.hbm [resolvable:$true] %s180_s7 }
  0x3b   : > { %s251_s8 = sadd.s32 %s4445_s26, %s4444_s2  ;;  %s246_s1 = scalar_lea.vmem [#allocation8], %s4443_s14 }
  0x3c   : > { %s256_s12 = sshll.u32 %s246_s1, 4  ;;  %s4446_s27 = sshll.u32 %s251_s8, 3  ;;  %s257_s12 = int_to_ptr.vmem [resolvable:$true] %s256_s12 }
  0x3d   : > { %s7961_s17 = smov 8   ;;  %s7962_s9 = smov 128  }
  0x3e   : > { %4731 = dma.hbm_to_vmem [thread:$0]  (!%p4729_p11), %s181_s7, 512, %s183_s6, [#allocation6], %s7962_s9, %s7962_s9, %s7961_s17  }
  0x3f   : > { %s253_s18 = scalar_lea.hbm %s7926_s3, %s4446_s27  ;;  %268 = sbr.rel (%p5658_p12) target bundleno = 1077 (0x435), region = 36 }
  0x40   : > { %s254_s13 = sshll.u32 %s253_s18, 4  ;;  %s270_s1 = sand.u32 (!%p5658_p12), 1, %s5620_s0   ;;  %s255_s13 = int_to_ptr.hbm [resolvable:$true] %s254_s13 }
  0x41   : > { %4741 = dma.hbm_to_vmem [thread:$0]  (!%p5588_p8), %s255_s13, 512, %s257_s12, %s5592_s10, %s7962_s9, %s7962_s9, %s7961_s17  }
  0x42   : > { %s5686_s2 = sand.u32 (!%p5658_p12), 1, %s5368_s19   ;;  %s271_s27 = scalar_lea.sflag (!%p5658_p12), [#allocation3], %s270_s1 }
  0x43   : > { %s4448_s20 = sshll.u32 (!%p5658_p12), %s5686_s2, 11 }
  0x44   : > { %s5691_s18 = scalar_lea.vmem [#allocation2], %s4448_s20 }
  0x45   : > { %5331 = dma.done.wait (%p5630_p5), %s271_s27, 32768  }
  0x46   : > { %5333 = vsyncadd (%p5630_p5), %s271_s27, 4294934528 }
  0x47   : > { %5335 = dma.done.wait (%p56_p0), [#allocation6], 512  }
  0x48   : > { %5337 = vsyncadd (%p56_p0), [#allocation6], 4294966784  ;;  %s287_s17 = sand.u32 1, %s5356_s16  }
  0x49   : > { %s4450_s12 = sshll.u32 %s287_s17, 5 }
  0x4a   : > { %s5702_s28 = scalar_lea.vmem [#allocation7], %s4450_s12 }
  0x4b   : > { %5339 = dma.done.wait (%p5639_p6), %s271_s27, 512  }
  0x4c   : > { %5341 = vsyncadd (%p5639_p6), %s271_s27, 4294966784  ;;  %s4451_s10 = sshll.u32 %s5686_s2, 5 }
  0x4d   : > { %s5709_s14 = scalar_lea.vmem [#allocation8], %s4451_s10 }
  0x4e   : > { %5343 = dma.done.wait (%p5630_p5), %s271_s27, 512  }
  0x4f   : > { %5345 = vsyncadd (%p5630_p5), %s271_s27, 4294966784  ;;  %v5400_v0 = vmov 0   ;;  %v5401_v1 = vmov 1   ;;  %v373_v2 = vld [vmem:[%s5691_s18 + $0x600] sm:$0xff]  ;;  %v374_v3 = vld [vmem:[%s5691_s18 + $0x608] sm:$0xff]  ;;  %vm381_vm0 = vcmask 261120  }
  0x50   : > { %4912 = vset.pattern.permute.xlu1 %v5400_v0  ;;  %4913 = vset.pattern.permute.xlu2 %v5401_v1  ;;  %v375_v4 = vld [vmem:[%s5691_s18 + $0x610] sm:$0xff]  ;;  %v376_v5 = vld [vmem:[%s5691_s18 + $0x618] sm:$0xff]  ;;  %v365_v7 = vld [vmem:[%s5691_s18 + $0x400] sm:$0xff]  ;;  %v5402_v41 = vmov 2   ;;  %v5403_v45 = vmov 3   ;;  %v5404_v49 = vmov 4  }
  0x51   : > { %4911 = vset.pattern.permute.xlu0 %v5400_v0  ;;  %406 = vmatpush.msra.mxu0 %v373_v2  ;;  %v5721_v6 = vld [vmem:[%s5709_s14 + $0x10] sm:$0xff]  ;;  %v366_v8 = vld [vmem:[%s5691_s18 + $0x408] sm:$0xff]  ;;  %v368_v10 = vld [vmem:[%s5691_s18 + $0x418] sm:$0xff]  ;;  %v5405_v56 = vmov 5   ;;  %v5406_v58 = vmov 6   ;;  %v5407_v61 = vmov 7  }
  0x52   : > { %435 = vmatpush.msra.mxu1 %v374_v3  ;;  %464 = vmatpush.msra.mxu2 %v375_v4  ;;  %v367_v9 = vld [vmem:[%s5691_s18 + $0x410] sm:$0xff]  ;;  %v357_v11 = vld [vmem:[%s5691_s18 + $0x200] sm:$0xff]  ;;  %v358_v12 = vld [vmem:[%s5691_s18 + $0x208] sm:$0xff]  ;;  %v5408_v0 = vmov 9   ;;  %s5991_s0 = scalar_lea.vmem [#allocation9], %s4448_s20  ;;  %s4710_s30 = sshll.u32 %s5376_s21, 6 }
  0x53   : > { %493 = vmatpush.msra.mxu3 %v376_v5  ;;  %642 = vperm.xlu1 %4912, %v5721_v6   ;;  %v359_v13 = vld [vmem:[%s5691_s18 + $0x210] sm:$0xff]  ;;  %v360_v14 = vld [vmem:[%s5691_s18 + $0x218] sm:$0xff]  ;;  %v349_v15 = vld [vmem:[%s5691_s18] sm:$0xff]  ;;  %s4711_s5 = sshll.u32 %s5380_s22, 9  ;;  %s4285_s8 = sshll.u32 %s5991_s0, 4  ;;  %s4286_s8 = int_to_ptr.vmem [resolvable:$true] %s4285_s8 }
  0x54   : > { %407 = vmatpush.msra.mxu0 %v365_v7  ;;  %436 = vmatpush.msra.mxu1 %v366_v8  ;;  %v350_v16 = vld [vmem:[%s5691_s18 + $0x8] sm:$0xff]  ;;  %v351_v17 = vld [vmem:[%s5691_s18 + $0x10] sm:$0xff]  ;;  %v352_v18 = vld [vmem:[%s5691_s18 + $0x18] sm:$0xff]  ;;  %s4282_s9 = sadd.s32 %s4711_s5, %s4710_s30  ;;  %s4271_s22 = scalar_lea.sflag [#allocation4], %s5686_s2 }
  0x55   : > { %465 = vmatpush.msra.mxu2 %v367_v9  ;;  %494 = vmatpush.msra.mxu3 %v368_v10  ;;  %v5736_v19 = vld [vmem:[#allocation5] sm:$0xff]  ;;  %v5739_v20 = vld [vmem:[%s5709_s14 + $0x18] sm:$0xff]  ;;  %v378_v23 = vld [vmem:[%s5691_s18 + $0x628] sm:$0xff]  ;;  %v5409_v10 = vmov 8   ;;  %s4712_s7 = sshll.u32 %s4282_s9, 3  ;;  %s5278_s27 = scalar_lea.hbm %s7927_s4, 8192 }
  0x56   : > { %408 = vmatpush.msra.mxu0 %v357_v11  ;;  %437 = vmatpush.msra.mxu1 %v358_v12  ;;  %v5744_v21 = vld [vmem:[%s5709_s14] sm:$0xff]  ;;  %v379_v24 = vld [vmem:[%s5691_s18 + $0x630] sm:$0xff]  ;;  %v370_v26 = vld [vmem:[%s5691_s18 + $0x428] sm:$0xff]  ;;  %v5410_v12 = vmov 10   ;;  %s4284_s26 = scalar_lea.hbm %s7927_s4, %s4712_s7 }
  0x57   : > { %466 = vmatpush.msra.mxu2 %v359_v13  ;;  %495 = vmatpush.msra.mxu3 %v360_v14  ;;  %v377_v22 = vld [vmem:[%s5691_s18 + $0x620] sm:$0xff]  ;;  %v371_v27 = vld [vmem:[%s5691_s18 + $0x430] sm:$0xff]  ;;  %v5761_v29 = vld [vmem:[#allocation5 + $0x8] sm:$0xff]  ;;  %s4287_s21 = sshll.u32 %s4284_s26, 4  ;;  %s4288_s21 = int_to_ptr.hbm [resolvable:$true] %s4287_s21 }
  0x58   : > { %409 = vmatpush.msra.mxu0 %v349_v15  ;;  %438 = vmatpush.msra.mxu1 %v350_v16  ;;  %v369_v25 = vld [vmem:[%s5691_s18 + $0x420] sm:$0xff]  ;;  %v362_v30 = vld [vmem:[%s5691_s18 + $0x228] sm:$0xff]  ;;  %v380_v31 = vld [vmem:[%s5691_s18 + $0x638] sm:$0xff]  ;;  %v5411_v15 = vmov 11   ;;  %s5272_s11 = sshra.s32 %s4288_s21, 4  ;;  %s5273_s11 = int_to_ptr.hbm [resolvable:$true] %s5272_s11 }
  0x59   : > { %467 = vmatpush.msra.mxu2 %v351_v17  ;;  %496 = vmatpush.msra.mxu3 %v352_v18  ;;  %v361_v28 = vld [vmem:[%s5691_s18 + $0x220] sm:$0xff]  ;;  %v5769_v32 = vld [vmem:[%s5709_s14 + $0x8] sm:$0xff]  ;;  %v363_v35 = vld [vmem:[%s5691_s18 + $0x230] sm:$0xff]  ;;  %s5274_s13 = scalar_lea.hbm %s5273_s11, 2048  ;;  %p5279_p2 = scmp.lt.s32.totalorder %s5273_s11, %s7927_s4 }
  0x5a   : > { %4453 = vmatmul.msk.f32.vlgmr.msra.gmra.mxu0 %vm381_vm0, %v5736_v19  ;;  %4457 = vmatmul.msk.f32.vlgmr.msra.gmra.mxu1 %vm381_vm0, %v5736_v19  ;;  %v353_v33 = vld [vmem:[%s5691_s18 + $0x20] sm:$0xff]  ;;  %v354_v34 = vld [vmem:[%s5691_s18 + $0x28] sm:$0xff]  ;;  %v372_v36 = vld [vmem:[%s5691_s18 + $0x438] sm:$0xff]  ;;  %p5275_p8 = scmp.ne.s32.totalorder %s5273_s11, %s5274_s13  ;;  %p5280_p3 = scmp.lt.s32.totalorder %s5278_s27, %s5274_s13 }
  0x5b   : > { %4461 = vmatmul.msk.f32.vlgmr.msra.gmra.mxu2 %vm381_vm0, %v5736_v19  ;;  %4465 = vmatmul.msk.f32.vlgmr.msra.gmra.mxu3 %vm381_vm0, %v5736_v19  ;;  %v355_v37 = vld [vmem:[%s5691_s18 + $0x30] sm:$0xff]  ;;  %v364_v38 = vld [vmem:[%s5691_s18 + $0x238] sm:$0xff]  ;;  %v878_v43 = vld [vmem:[%s5691_s18 + $0x640] sm:$0xff] }
  0x5c   : > { %647 = vperm.xlu1 %4912, %v5739_v20   ;;  %663 = vperm.xlu2 %4913, %v5744_v21   ;;  %v5786_v39 = vld [vmem:[#allocation5 + $0x10] sm:$0xff]  ;;  %v356_v40 = vld [vmem:[%s5691_s18 + $0x38] sm:$0xff]  ;;  %v870_v44 = vld [vmem:[%s5691_s18 + $0x440] sm:$0xff]  ;;  %p5276_p13 = pnand %p5275_p8, %p5646_p7  ;;  %p5281_p4 = por %p5280_p3, %p5279_p2 }
  0x5d   : > { %522 = vmatpush.msrb.mxu0 %v377_v22  ;;  %551 = vmatpush.msrb.mxu1 %v378_v23  ;;  %v5800_v42 = vld [vmem:[#allocation5 + $0x18] sm:$0xff]  ;;  %v862_v46 = vld [vmem:[%s5691_s18 + $0x240] sm:$0xff]  ;;  %v880_v48 = vld [vmem:[%s5691_s18 + $0x650] sm:$0xff] }
  0x5e   : > { %580 = vmatpush.msrb.mxu2 %v379_v24  ;;  %632 = vperm.xlu0 %4911, %v5744_v21   ;;  %v854_v47 = vld [vmem:[%s5691_s18 + $0x40] sm:$0xff]  ;;  %v872_v50 = vld [vmem:[%s5691_s18 + $0x450] sm:$0xff]  ;;  %v879_v51 = vld [vmem:[%s5691_s18 + $0x648] sm:$0xff]  ;;  %p5277_p0 = pneg %p5276_p13 }
  0x5f   : > { %523 = vmatpush.msrb.mxu0 %v369_v25  ;;  %552 = vmatpush.msrb.mxu1 %v370_v26  ;;  %v864_v52 = vld [vmem:[%s5691_s18 + $0x250] sm:$0xff]  ;;  %v871_v54 = vld [vmem:[%s5691_s18 + $0x448] sm:$0xff]  ;;  %v881_v59 = vld [vmem:[%s5691_s18 + $0x658] sm:$0xff] }
  0x60   : > { %581 = vmatpush.msrb.mxu2 %v371_v27  ;;  %609 = vmatpush.msrb.mxu3 %v380_v31  ;;  %v856_v53 = vld [vmem:[%s5691_s18 + $0x50] sm:$0xff]  ;;  %v863_v55 = vld [vmem:[%s5691_s18 + $0x248] sm:$0xff]  ;;  %v873_v60 = vld [vmem:[%s5691_s18 + $0x458] sm:$0xff]  ;;  %p5282_p5 = pnand %p5281_p4, %p5277_p0 }
  0x61   : > { %524 = vmatpush.msrb.mxu0 %v361_v28  ;;  %553 = vmatpush.msrb.mxu1 %v362_v30  ;;  %v855_v57 = vld [vmem:[%s5691_s18 + $0x48] sm:$0xff]  ;;  %v865_v62 = vld [vmem:[%s5691_s18 + $0x258] sm:$0xff]  ;;  %v874_v2 = vld [vmem:[%s5691_s18 + $0x460] sm:$0xff] }
  0x62   : > { %4454 = vmatmul.msk.f32.gmra.mxu0 %vm381_vm0, %v5761_v29  ;;  %4458 = vmatmul.msk.f32.gmra.mxu1 %vm381_vm0, %v5761_v29  ;;  %v857_v63 = vld [vmem:[%s5691_s18 + $0x58] sm:$0xff]  ;;  %v866_v3 = vld [vmem:[%s5691_s18 + $0x260] sm:$0xff]  ;;  %v883_v5 = vld [vmem:[%s5691_s18 + $0x668] sm:$0xff] }
  0x63   : > { %4462 = vmatmul.msk.f32.gmra.mxu2 %vm381_vm0, %v5761_v29  ;;  %4466 = vmatmul.msk.f32.gmra.mxu3 %vm381_vm0, %v5761_v29  ;;  %v858_v4 = vld [vmem:[%s5691_s18 + $0x60] sm:$0xff]  ;;  %v875_v8 = vld [vmem:[%s5691_s18 + $0x468] sm:$0xff]  ;;  %v884_v17 = vld [vmem:[%s5691_s18 + $0x670] sm:$0xff] }
  0x64   : > { %4915 = vset.pattern.permute.xlu1 %v5401_v1  ;;  %667 = vperm.xlu2 %4913, %v5769_v32   ;;  %v867_v9 = vld [vmem:[%s5691_s18 + $0x268] sm:$0xff]  ;;  %v885_v18 = vld [vmem:[%s5691_s18 + $0x678] sm:$0xff]  ;;  %v876_v22 = vld [vmem:[%s5691_s18 + $0x470] sm:$0xff] }
  0x65   : > { %675 = vperm.xlu1 %4915, %v5739_v20   ;;  %525 = vmatpush.msrb.mxu0 %v353_v33  ;;  %v859_v11 = vld [vmem:[%s5691_s18 + $0x68] sm:$0xff]  ;;  %v877_v23 = vld [vmem:[%s5691_s18 + $0x478] sm:$0xff]  ;;  %v868_v24 = vld [vmem:[%s5691_s18 + $0x270] sm:$0xff] }
  0x66   : > { %554 = vmatpush.msrb.mxu1 %v354_v34  ;;  %582 = vmatpush.msrb.mxu2 %v363_v35  ;;  %v869_v26 = vld [vmem:[%s5691_s18 + $0x278] sm:$0xff]  ;;  %v860_v27 = vld [vmem:[%s5691_s18 + $0x70] sm:$0xff]  ;;  %v5972_v31 = vld [vmem:[%s5702_s28] sm:$0xff] }
  0x67   : > { %610 = vmatpush.msrb.mxu3 %v372_v36  ;;  %637 = vperm.xlu0 %4911, %v5769_v32   ;;  %v861_v30 = vld [vmem:[%s5691_s18 + $0x78] sm:$0xff] }
  0x68   : > { %583 = vmatpush.msrb.mxu2 %v355_v37  ;;  %898 = vmatpush.msra.mxu0 %v878_v43  ;;  %v5996_v43 = vld [vmem:[%s5702_s28 + $0x8] sm:$0xff] }
  0x69   : > { %611 = vmatpush.msrb.mxu3 %v364_v38  ;;  %927 = vmatpush.msra.mxu1 %v879_v51  ;;  %v5412_v38 = vmov 12  }
  0x6a   : > { %4455 = vmatmul.msk.f32.gmra.mxu0 %vm381_vm0, %v5786_v39  ;;  %4459 = vmatmul.msk.f32.gmra.mxu1 %vm381_vm0, %v5786_v39 }
  0x6b   : > { %4463 = vmatmul.msk.f32.gmra.mxu2 %vm381_vm0, %v5786_v39  ;;  %4467 = vmatmul.msk.f32.gmra.mxu3 %vm381_vm0, %v5786_v39 }
  0x6c   : > { %4916 = vset.pattern.permute.xlu2 %v5402_v41  ;;  %612 = vmatpush.msrb.mxu3 %v356_v40 }
  0x6d   : > { %4917 = vset.pattern.permute.xlu1 %v5402_v41  ;;  %691 = vperm.xlu2 %4916, %v5744_v21  }
  0x6e   : > { %695 = vperm.xlu1 %4917, %v5769_v32   ;;  %899 = vmatpush.msra.mxu0 %v870_v44 }
  0x6f   : > { %4914 = vset.pattern.permute.xlu0 %v5401_v1  ;;  %956 = vmatpush.msra.mxu2 %v880_v48  ;;  %v882_v1 = vld [vmem:[%s5691_s18 + $0x660] sm:$0xff] }
  0x70   : > { %671 = vperm.xlu0 %4914, %v5721_v6   ;;  %900 = vmatpush.msra.mxu0 %v862_v46 }
  0x71   : > { %957 = vmatpush.msra.mxu2 %v872_v50  ;;  %928 = vmatpush.msra.mxu1 %v871_v54 }
  0x72   : > { %4456 = vmatmul.msk.f32.gmra.mxu0 %vm381_vm0, %v5800_v42  ;;  %4460 = vmatmul.msk.f32.gmra.mxu1 %vm381_vm0, %v5800_v42 }
  0x73   : > { %4464 = vmatmul.msk.f32.gmra.mxu2 %vm381_vm0, %v5800_v42  ;;  %4468 = vmatmul.msk.f32.gmra.mxu3 %vm381_vm0, %v5800_v42 }
  0x74   : > { %901 = vmatpush.msra.mxu0 %v854_v47  ;;  %958 = vmatpush.msra.mxu2 %v864_v52 }
  0x75   : > { %699 = vperm.xlu2 %4916, %v5721_v6   ;;  %929 = vmatpush.msra.mxu1 %v863_v55 }
  0x76   : > { %4919 = vset.pattern.permute.xlu1 %v5403_v45  ;;  %959 = vmatpush.msra.mxu2 %v856_v53  ;;  %v6013_v53 = vld [vmem:[%s5702_s28 + $0x10] sm:$0xff] }
  0x77   : > { %719 = vperm.xlu1 %4919, %v5744_v21   ;;  %930 = vmatpush.msra.mxu1 %v855_v57 }
  0x78   : > { %4918 = vset.pattern.permute.xlu0 %v5402_v41  ;;  %985 = vmatpush.msra.mxu3 %v881_v59 }
  0x79   : > { %703 = vperm.xlu0 %4918, %v5739_v20  }
  0x7a   : > { %4469 = vmatmul.msk.f32.vlgmr.msrb.gmra.mxu0 %vm381_vm0, %v5736_v19  ;;  %4473 = vmatmul.msk.f32.vlgmr.msrb.gmra.mxu1 %vm381_vm0, %v5736_v19 }
  0x7b   : > { %4477 = vmatmul.msk.f32.vlgmr.msrb.gmra.mxu2 %vm381_vm0, %v5736_v19  ;;  %4481 = vmatmul.msk.f32.vlgmr.msrb.gmra.mxu3 %vm381_vm0, %v5736_v19 }
  0x7c   : > { %986 = vmatpush.msra.mxu3 %v873_v60  ;;  %1014 = vmatpush.msrb.mxu0 %v882_v1 }
  0x7d   : > { %4920 = vset.pattern.permute.xlu2 %v5403_v45  ;;  %1043 = vmatpush.msrb.mxu1 %v883_v5  ;;  %v1358_v5 = vld [vmem:[%s5691_s18 + $0x480] sm:$0xff] }
  0x7e   : > { %723 = vperm.xlu2 %4920, %v5769_v32   ;;  %987 = vmatpush.msra.mxu3 %v865_v62 }
  0x7f   : > { %727 = vperm.xlu1 %4919, %v5721_v6   ;;  %1015 = vmatpush.msrb.mxu0 %v874_v2 }
  0x80   : > { %988 = vmatpush.msra.mxu3 %v857_v63  ;;  %1044 = vmatpush.msrb.mxu1 %v875_v8  ;;  %v1350_v8 = vld [vmem:[%s5691_s18 + $0x280] sm:$0xff] }
  0x81   : > { %4921 = vset.pattern.permute.xlu0 %v5404_v49  ;;  %1016 = vmatpush.msrb.mxu0 %v866_v3 }
  0x82   : > { %4470 = vmatmul.msk.f32.gmra.mxu0 %vm381_vm0, %v5761_v29  ;;  %4474 = vmatmul.msk.f32.gmra.mxu1 %vm381_vm0, %v5761_v29 }
  0x83   : > { %4478 = vmatmul.msk.f32.gmra.mxu2 %vm381_vm0, %v5761_v29  ;;  %4482 = vmatmul.msk.f32.gmra.mxu3 %vm381_vm0, %v5761_v29 }
  0x84   : > { %747 = vperm.xlu0 %4921, %v5744_v21   ;;  %1017 = vmatpush.msrb.mxu0 %v858_v4 }
  0x85   : > { %1045 = vmatpush.msrb.mxu1 %v867_v9  ;;  %1072 = vmatpush.msrb.mxu2 %v884_v17 }
  0x86   : > { %731 = vperm.xlu2 %4920, %v5739_v20   ;;  %1101 = vmatpush.msrb.mxu3 %v885_v18 }
  0x87   : > { %4922 = vset.pattern.permute.xlu1 %v5404_v49  ;;  %1046 = vmatpush.msrb.mxu1 %v859_v11 }
  0x88   : > { %751 = vperm.xlu1 %4922, %v5769_v32   ;;  %1073 = vmatpush.msrb.mxu2 %v876_v22 }
  0x89   : > { %1102 = vmatpush.msrb.mxu3 %v877_v23 }
  0x8a   : > { %4471 = vmatmul.msk.f32.gmra.mxu0 %vm381_vm0, %v5786_v39  ;;  %4475 = vmatmul.msk.f32.gmra.mxu1 %vm381_vm0, %v5786_v39 }
  0x8b   : > { %4479 = vmatmul.msk.f32.gmra.mxu2 %vm381_vm0, %v5786_v39  ;;  %4483 = vmatmul.msk.f32.gmra.mxu3 %vm381_vm0, %v5786_v39 }
  0x8c   : > { %4925 = vset.pattern.permute.xlu0 %v5405_v56  ;;  %1074 = vmatpush.msrb.mxu2 %v868_v24 }
  0x8d   : > { %779 = vperm.xlu0 %4925, %v5769_v32   ;;  %1103 = vmatpush.msrb.mxu3 %v869_v26  ;;  %v1367_v26 = vld [vmem:[%s5691_s18 + $0x688] sm:$0xff] }
  0x8e   : > { %4923 = vset.pattern.permute.xlu2 %v5404_v49  ;;  %1075 = vmatpush.msrb.mxu2 %v860_v27 }
  0x8f   : > { %755 = vperm.xlu2 %4923, %v5721_v6   ;;  %1104 = vmatpush.msrb.mxu3 %v861_v30 }
  0x90   : > { %759 = vperm.xlu1 %4922, %v5739_v20  }
  0x92   : > { %4472 = vmatmul.msk.f32.gmra.mxu0 %vm381_vm0, %v5800_v42  ;;  %4476 = vmatmul.msk.f32.gmra.mxu1 %vm381_vm0, %v5800_v42 }
  0x93   : > { %4480 = vmatmul.msk.f32.gmra.mxu2 %vm381_vm0, %v5800_v42  ;;  %4484 = vmatmul.msk.f32.gmra.mxu3 %vm381_vm0, %v5800_v42 }
  0x95   : > { %4929 = vset.pattern.permute.xlu0 %v5406_v58 }
  0x96   : > { %811 = vperm.xlu0 %4929, %v5721_v6  }
  0x97   : > { %4924 = vset.pattern.permute.xlu2 %v5405_v56 }
  0x98   : > { %4926 = vset.pattern.permute.xlu1 %v5405_v56  ;;  %775 = vperm.xlu2 %4924, %v5744_v21  }
  0x99   : > { %783 = vperm.xlu1 %4926, %v5721_v6  }
  0x9a   : > { %4485 = vmatmul.msk.f32.vlgmr.msra.gmra.mxu0 %vm381_vm0, %v5736_v19  ;;  %4489 = vmatmul.msk.f32.vlgmr.msra.gmra.mxu1 %vm381_vm0, %v5736_v19 }
  0x9b   : > { %4493 = vmatmul.msk.f32.vlgmr.msra.gmra.mxu2 %vm381_vm0, %v5736_v19  ;;  %4497 = vmatmul.msk.f32.vlgmr.msra.gmra.mxu3 %vm381_vm0, %v5736_v19 }
  0x9c   : > { %1415 = vmatpush.msra.mxu1 %v1367_v26 }
  0x9e   : > { %4932 = vset.pattern.permute.xlu0 %v5407_v61 }
  0x9f   : > { %843 = vperm.xlu0 %4932, %v5739_v20  }
  0xa0   : > { %787 = vperm.xlu2 %4924, %v5739_v20  }
  0xa1   : > { %4927 = vset.pattern.permute.xlu1 %v5406_v58 }
  0xa2   : > { %803 = vperm.xlu1 %4927, %v5744_v21   ;;  %4486 = vmatmul.msk.f32.gmra.mxu0 %vm381_vm0, %v5761_v29 }
  0xa3   : > { %4494 = vmatmul.msk.f32.gmra.mxu2 %vm381_vm0, %v5761_v29  ;;  %4490 = vmatmul.msk.f32.gmra.mxu1 %vm381_vm0, %v5761_v29 }
  0xa4   : > { %4498 = vmatmul.msk.f32.gmra.mxu3 %vm381_vm0, %v5761_v29 }
  0xa7   : > { %4935 = vset.pattern.permute.xlu0 %v5408_v0 }
  0xa8   : > { %4928 = vset.pattern.permute.xlu2 %v5406_v58  ;;  %1151 = vperm.xlu0 %4935, %v5744_v21  }
  0xa9   : > { %807 = vperm.xlu2 %4928, %v5769_v32  }
  0xaa   : > { %815 = vperm.xlu1 %4927, %v5739_v20   ;;  %4487 = vmatmul.msk.f32.gmra.mxu0 %vm381_vm0, %v5786_v39 }
  0xab   : > { %4495 = vmatmul.msk.f32.gmra.mxu2 %vm381_vm0, %v5786_v39  ;;  %4491 = vmatmul.msk.f32.gmra.mxu1 %vm381_vm0, %v5786_v39 }
  0xac   : > { %4499 = vmatmul.msk.f32.gmra.mxu3 %vm381_vm0, %v5786_v39 }
  0xb0   : > { %4939 = vset.pattern.permute.xlu0 %v5410_v12 }
  0xb1   : > { %4930 = vset.pattern.permute.xlu2 %v5407_v61  ;;  %1183 = vperm.xlu0 %4939, %v5769_v32  }
  0xb2   : > { %4931 = vset.pattern.permute.xlu1 %v5407_v61  ;;  %4488 = vmatmul.msk.f32.gmra.mxu0 %vm381_vm0, %v5800_v42 }
  0xb3   : > { %835 = vperm.xlu1 %4931, %v5769_v32   ;;  %831 = vperm.xlu2 %4930, %v5744_v21  }
  0xb4   : > { %4496 = vmatmul.msk.f32.gmra.mxu2 %vm381_vm0, %v5800_v42  ;;  %4492 = vmatmul.msk.f32.gmra.mxu1 %vm381_vm0, %v5800_v42 }
  0xb5   : > { %4500 = vmatmul.msk.f32.gmra.mxu3 %vm381_vm0, %v5800_v42 }
  0xb6   : > { %v5916_v7 = vpop.permute.xlu2 %663 }
  0xb9   : > { %4943 = vset.pattern.permute.xlu0 %v5411_v15 }
  0xba   : > { %4501 = vmatmul.msk.f32.vlgmr.msrb.gmra.mxu0 %vm381_vm0, %v5736_v19  ;;  %1215 = vperm.xlu0 %4943, %v5721_v6  }
  0xbb   : > { %4933 = vset.pattern.permute.xlu1 %v5409_v10  ;;  %839 = vperm.xlu2 %4930, %v5721_v6  }
  0xbc   : > { %1123 = vperm.xlu1 %4933, %v5744_v21   ;;  %4505 = vmatmul.msk.f32.vlgmr.msrb.gmra.mxu1 %vm381_vm0, %v5736_v19 }
  0xbd   : > { %4509 = vmatmul.msk.f32.vlgmr.msrb.gmra.mxu2 %vm381_vm0, %v5736_v19  ;;  %4513 = vmatmul.msk.f32.vlgmr.msrb.gmra.mxu3 %vm381_vm0, %v5736_v19 }
  0xbe   : > { %v5929_v13 = vpop.permute.xlu2 %667 }
  0xc2   : > { %4502 = vmatmul.msk.f32.gmra.mxu0 %vm381_vm0, %v5761_v29  ;;  %4946 = vset.pattern.permute.xlu0 %v5412_v38 }
  0xc3   : > { %4934 = vset.pattern.permute.xlu2 %v5409_v10  ;;  %1247 = vperm.xlu0 %4946, %v5739_v20   ;;  %v1342_v10 = vld [vmem:[%s5691_s18 + $0x80] sm:$0xff] }
  0xc4   : > { %1131 = vperm.xlu1 %4933, %v5721_v6   ;;  %1127 = vperm.xlu2 %4934, %v5769_v32  }
  0xc5   : > { %v5938_v14 = vpop.permute.xlu1 %642  ;;  %4506 = vmatmul.msk.f32.gmra.mxu1 %vm381_vm0, %v5761_v29  ;;  %4510 = vmatmul.msk.f32.gmra.mxu2 %vm381_vm0, %v5761_v29 }
  0xc6   : > { %4514 = vmatmul.msk.f32.gmra.mxu3 %vm381_vm0, %v5761_v29 }
  0xc7   : > { %v692_v16 = vpop.permute.xlu2 %691 }
  0xca   : > { %4503 = vmatmul.msk.f32.gmra.mxu0 %vm381_vm0, %v5786_v39 }
  0xcc   : > { %4936 = vset.pattern.permute.xlu1 %v5408_v0  ;;  %1135 = vperm.xlu2 %4934, %v5739_v20  }
  0xcd   : > { %1155 = vperm.xlu1 %4936, %v5769_v32   ;;  %4507 = vmatmul.msk.f32.gmra.mxu1 %vm381_vm0, %v5786_v39 }
  0xce   : > { %v5954_v25 = vpop.permute.xlu1 %647  ;;  %4511 = vmatmul.msk.f32.gmra.mxu2 %vm381_vm0, %v5786_v39  ;;  %4515 = vmatmul.msk.f32.gmra.mxu3 %vm381_vm0, %v5786_v39 }
  0xcf   : > { %v5960_v28 = vpop.permute.xlu2 %699 }
  0xd2   : > { %4504 = vmatmul.msk.f32.gmra.mxu0 %vm381_vm0, %v5800_v42 }
  0xd4   : > { %4937 = vset.pattern.permute.xlu2 %v5408_v0  ;;  %v1366_v0 = vld [vmem:[%s5691_s18 + $0x680] sm:$0xff] }
  0xd5   : > { %1163 = vperm.xlu1 %4936, %v5739_v20   ;;  %1159 = vperm.xlu2 %4937, %v5721_v6  }
  0xd6   : > { %4508 = vmatmul.msk.f32.gmra.mxu1 %vm381_vm0, %v5800_v42  ;;  %4512 = vmatmul.msk.f32.gmra.mxu2 %vm381_vm0, %v5800_v42 }
  0xd7   : > { %v5977_v33 = vpop.permute.xlu1 %675  ;;  %v5979_v34 = vpop.f32.mrf.mxu0  ;;  %1386 = vmatpush.msra.mxu0 %v1366_v0  ;;  %4516 = vmatmul.msk.f32.gmra.mxu3 %vm381_vm0, %v5800_v42  ;;  %v5415_v0 = vmov 15  }
  0xd8   : > { %v440_v35 = vpop.f32.mrf.mxu1  ;;  %v724_v37 = vpop.permute.xlu2 %723 }
  0xd9   : > { %v658_v36 = vadd.f32 %v440_v35, %v5972_v31  ;;  %1387 = vmatpush.msra.mxu0 %v1358_v5  ;;  %v1359_v35 = vld [vmem:[%s5691_s18 + $0x488] sm:$0xff] }
  0xda   : > { %1416 = vmatpush.msra.mxu1 %v1359_v35  ;;  %v1361_v35 = vld [vmem:[%s5691_s18 + $0x498] sm:$0xff] }
  0xdb   : > { %v678_v40 = vadd.f32 %v5916_v7, %v658_v36  ;;  %v6037_v7 = vld [vmem:[%s5702_s28 + $0x18] sm:$0xff]  ;;  %1388 = vmatpush.msra.mxu0 %v1350_v8 }
  0xdd   : > { %682 = vst [vmem:[%s5991_s0 + $0x8] sm:$0xff] %v678_v40  ;;  %4940 = vset.pattern.permute.xlu1 %v5410_v12  ;;  %4938 = vset.pattern.permute.xlu2 %v5410_v12 }
  0xde   : > { %1187 = vperm.xlu1 %4940, %v5721_v6   ;;  %v469_v41 = vpop.f32.mrf.mxu2  ;;  %v498_v45 = vpop.f32.mrf.mxu3  ;;  %1179 = vperm.xlu2 %4938, %v5744_v21  }
  0xdf   : > { %v686_v44 = vadd.f32 %v469_v41, %v5972_v31  ;;  %v5999_v46 = vpop.f32.mrf.mxu0  ;;  %v714_v54 = vadd.f32 %v498_v45, %v5972_v31  ;;  %1389 = vmatpush.msra.mxu0 %v1342_v10  ;;  %v1360_v41 = vld [vmem:[%s5691_s18 + $0x490] sm:$0xff] }
  0xe0   : > { %v696_v47 = vpop.permute.xlu1 %695  ;;  %v443_v48 = vpop.f32.mrf.mxu1  ;;  %4517 = vmatmul.msk.f32.vlgmr.msra.gmra.mxu0 %vm381_vm0, %v5736_v19 }
  0xe1   : > { %v706_v49 = vadd.f32 %v692_v16, %v686_v44  ;;  %v659_v50 = vadd.f32 %v443_v48, %v5996_v43  ;;  %v6003_v51 = vpop.permute.xlu2 %731  ;;  %v1343_v44 = vld [vmem:[%s5691_s18 + $0x88] sm:$0xff]  ;;  %v1352_v48 = vld [vmem:[%s5691_s18 + $0x290] sm:$0xff] }
  0xe3   : > { %710 = vst [vmem:[%s5991_s0 + $0x10] sm:$0xff] %v706_v49  ;;  %v679_v52 = vadd.f32 %v5929_v13, %v659_v50 }
  0xe5   : > { %683 = vst [vmem:[%s5991_s0 + $0x208] sm:$0xff] %v679_v52 }
  0xe6   : > { %4941 = vset.pattern.permute.xlu1 %v5411_v15  ;;  %v472_v55 = vpop.f32.mrf.mxu2  ;;  %v501_v57 = vpop.f32.mrf.mxu3  ;;  %1191 = vperm.xlu2 %4938, %v5739_v20  }
  0xe7   : > { %v687_v56 = vadd.f32 %v472_v55, %v5996_v43  ;;  %1207 = vperm.xlu1 %4941, %v5744_v21   ;;  %v417_v58 = vpop.f32.mrf.mxu0  ;;  %v715_v59 = vadd.f32 %v501_v57, %v5996_v43 }
  0xe8   : > { %v628_v60 = vadd.f32 %v417_v58, %v6013_v53  ;;  %v6022_v61 = vpop.f32.mrf.mxu1  ;;  %4518 = vmatmul.msk.f32.gmra.mxu0 %vm381_vm0, %v5761_v29  ;;  %v5414_v58 = vmov 13  }
  0xe9   : > { %v707_v62 = vadd.f32 %v696_v47, %v687_v56  ;;  %v720_v63 = vpop.permute.xlu1 %719  ;;  %v735_v1 = vadd.f32 %v724_v37, %v715_v59  ;;  %v6026_v4 = vpop.permute.xlu2 %755 }
  0xea   : > { %v652_v2 = vadd.f32 %v5938_v14, %v628_v60  ;;  %v734_v3 = vadd.f32 %v720_v63, %v714_v54  ;;  %v1344_v54 = vld [vmem:[%s5691_s18 + $0x90] sm:$0xff] }
  0xeb   : > { %711 = vst [vmem:[%s5991_s0 + $0x210] sm:$0xff] %v707_v62 }
  0xec   : > { %739 = vst [vmem:[%s5991_s0 + $0x218] sm:$0xff] %v735_v1 }
  0xed   : > { %656 = vst [vmem:[%s5991_s0 + $0x400] sm:$0xff] %v652_v2 }
  0xee   : > { %738 = vst [vmem:[%s5991_s0 + $0x18] sm:$0xff] %v734_v3  ;;  %v475_v9 = vpop.f32.mrf.mxu2  ;;  %v504_v12 = vpop.f32.mrf.mxu3  ;;  %4942 = vset.pattern.permute.xlu2 %v5411_v15 }
  0xef   : > { %v688_v11 = vadd.f32 %v475_v9, %v6013_v53  ;;  %1219 = vperm.xlu1 %4941, %v5739_v20   ;;  %v420_v13 = vpop.f32.mrf.mxu0  ;;  %v716_v14 = vadd.f32 %v504_v12, %v6013_v53  ;;  %1211 = vperm.xlu2 %4942, %v5769_v32  }
  0xf0   : > { %v629_v16 = vadd.f32 %v420_v13, %v6037_v7  ;;  %v449_v17 = vpop.f32.mrf.mxu1  ;;  %4519 = vmatmul.msk.f32.gmra.mxu0 %vm381_vm0, %v5786_v39 }
  0xf1   : > { %v708_v18 = vadd.f32 %v5960_v28, %v688_v11  ;;  %v661_v22 = vadd.f32 %v449_v17, %v6037_v7  ;;  %v728_v23 = vpop.permute.xlu1 %727  ;;  %v5413_v28 = vmov 14   ;;  %v5416_v17 = vmov 16  }
  0xf2   : > { %v653_v15 = vadd.f32 %v5954_v25, %v629_v16  ;;  %v736_v24 = vadd.f32 %v728_v23, %v716_v14  ;;  %v776_v30 = vpop.permute.xlu2 %775  ;;  %4949 = vset.pattern.permute.xlu0 %v5413_v28  ;;  %v1368_v25 = vld [vmem:[%s5691_s18 + $0x690] sm:$0xff] }
  0xf3   : > { %712 = vst [vmem:[%s5991_s0 + $0x410] sm:$0xff] %v708_v18  ;;  %v681_v27 = vadd.f32 %v5977_v33, %v661_v22  ;;  %1291 = vperm.xlu0 %4949, %v5744_v21   ;;  %1444 = vmatpush.msra.mxu2 %v1368_v25  ;;  %v1351_v33 = vld [vmem:[%s5691_s18 + $0x288] sm:$0xff]  ;;  %v1369_v22 = vld [vmem:[%s5691_s18 + $0x698] sm:$0xff] }
  0xf4   : > { %657 = vst [vmem:[%s5991_s0 + $0x600] sm:$0xff] %v653_v15  ;;  %1417 = vmatpush.msra.mxu1 %v1351_v33  ;;  %1473 = vmatpush.msra.mxu3 %v1369_v22  ;;  %v1363_v22 = vld [vmem:[%s5691_s18 + $0x4a8] sm:$0xff] }
  0xf5   : > { %685 = vst [vmem:[%s5991_s0 + $0x608] sm:$0xff] %v681_v27  ;;  %1445 = vmatpush.msra.mxu2 %v1360_v41  ;;  %v1353_v41 = vld [vmem:[%s5691_s18 + $0x298] sm:$0xff] }
  0xf6   : > { %740 = vst [vmem:[%s5991_s0 + $0x418] sm:$0xff] %v736_v24  ;;  %v6063_v36 = vpop.f32.mrf.mxu2  ;;  %v507_v37 = vpop.f32.mrf.mxu3  ;;  %1418 = vmatpush.msra.mxu1 %v1343_v44  ;;  %1474 = vmatpush.msra.mxu3 %v1361_v35  ;;  %v1355_v35 = vld [vmem:[%s5691_s18 + $0x2a8] sm:$0xff] }
  0xf7   : > { %4945 = vset.pattern.permute.xlu1 %v5412_v38  ;;  %v6067_v40 = vpop.f32.mrf.mxu0  ;;  %v717_v45 = vadd.f32 %v507_v37, %v6037_v7  ;;  %4944 = vset.pattern.permute.xlu2 %v5412_v38 }
  0xf8   : > { %1239 = vperm.xlu1 %4945, %v5769_v32   ;;  %v556_v47 = vpop.f32.mrf.mxu1  ;;  %1235 = vperm.xlu2 %4944, %v5744_v21  }
  0xf9   : > { %v770_v49 = vadd.f32 %v556_v47, %v5972_v31  ;;  %v737_v50 = vadd.f32 %v6003_v51, %v717_v45  ;;  %4521 = vmatmul.msk.f32.vlgmr.msra.gmra.mxu1 %vm381_vm0, %v5736_v19  ;;  %1446 = vmatpush.msra.mxu2 %v1352_v48  ;;  %v1345_v48 = vld [vmem:[%s5691_s18 + $0x98] sm:$0xff] }
  0xfa   : > { %v752_v52 = vpop.permute.xlu1 %751  ;;  %v6085_v38 = vpop.permute.xlu2 %787  ;;  %4520 = vmatmul.msk.f32.gmra.mxu0 %vm381_vm0, %v5800_v42  ;;  %1475 = vmatpush.msra.mxu3 %v1353_v41  ;;  %v6207_v41 = vld [vmem:[%s5709_s14 + $0x18] sm:$0xff] }
  0xfb   : > { %v790_v55 = vadd.f32 %v776_v30, %v770_v49  ;;  %741 = vst [vmem:[%s5991_s0 + $0x618] sm:$0xff] %v737_v50  ;;  %1447 = vmatpush.msra.mxu2 %v1344_v54  ;;  %4953 = vset.pattern.permute.xlu0 %v5415_v0  ;;  %v1370_v49 = vld [vmem:[%s5691_s18 + $0x6a0] sm:$0xff] }
  0xfc   : > { %4525 = vmatmul.msk.f32.vlgmr.msra.gmra.mxu2 %vm381_vm0, %v5736_v19  ;;  %1323 = vperm.xlu0 %4953, %v5769_v32  }
  0xfd   : > { %794 = vst [vmem:[%s5991_s0 + $0x28] sm:$0xff] %v790_v55  ;;  %1476 = vmatpush.msra.mxu3 %v1345_v48  ;;  %1502 = vmatpush.msrb.mxu0 %v1370_v49  ;;  %v1348_v48 = vld [vmem:[%s5691_s18 + $0xb0] sm:$0xff] }
  0xfe   : > { %v585_v56 = vpop.f32.mrf.mxu2  ;;  %v614_v57 = vpop.f32.mrf.mxu3  ;;  %4529 = vmatmul.msk.f32.vlgmr.msra.gmra.mxu3 %vm381_vm0, %v5736_v19 }
  0xff   : > { %v530_v51 = vpop.f32.mrf.mxu0  ;;  %v826_v16 = vadd.f32 %v614_v57, %v5972_v31  ;;  %v798_v25 = vadd.f32 %v585_v56, %v5972_v31  ;;  %v1362_v56 = vld [vmem:[%s5691_s18 + $0x4a0] sm:$0xff] }
 0x100   : > { %4947 = vset.pattern.permute.xlu1 %v5414_v58  ;;  %v743_v59 = vadd.f32 %v530_v51, %v5996_v43  ;;  %v6090_v60 = vpop.f32.mrf.mxu1  ;;  %1243 = vperm.xlu2 %4944, %v5721_v6  }
 0x101   : > { %1263 = vperm.xlu1 %4947, %v5744_v21   ;;  %4522 = vmatmul.msk.f32.gmra.mxu1 %vm381_vm0, %v5761_v29 }
 0x102   : > { %v763_v62 = vadd.f32 %v752_v52, %v743_v59  ;;  %v760_v63 = vpop.permute.xlu1 %759  ;;  %1503 = vmatpush.msrb.mxu0 %v1362_v56  ;;  %v1346_v59 = vld [vmem:[%s5691_s18 + $0xa0] sm:$0xff] }
 0x103   : > { %v808_v1 = vpop.permute.xlu2 %807 }
 0x104   : > { %767 = vst [vmem:[%s5991_s0 + $0x220] sm:$0xff] %v763_v62  ;;  %4526 = vmatmul.msk.f32.gmra.mxu2 %vm381_vm0, %v5761_v29  ;;  %4957 = vset.pattern.permute.xlu0 %v5416_v17 }
 0x105   : > { %1619 = vperm.xlu0 %4957, %v5721_v6  }
 0x106   : > { %v588_v2 = vpop.f32.mrf.mxu2  ;;  %v6104_v8 = vpop.f32.mrf.mxu3  ;;  %4530 = vmatmul.msk.f32.gmra.mxu3 %vm381_vm0, %v5761_v29 }
 0x107   : > { %v533_v3 = vpop.f32.mrf.mxu0  ;;  %v799_v5 = vadd.f32 %v588_v2, %v5996_v43 }
 0x108   : > { %v744_v9 = vadd.f32 %v533_v3, %v6013_v53  ;;  %v562_v10 = vpop.f32.mrf.mxu1  ;;  %4948 = vset.pattern.permute.xlu2 %v5414_v58  ;;  %v1354_v58 = vld [vmem:[%s5691_s18 + $0x2a0] sm:$0xff] }
 0x109   : > { %v772_v11 = vadd.f32 %v562_v10, %v6013_v53  ;;  %1271 = vperm.xlu1 %4947, %v5721_v6   ;;  %v819_v12 = vadd.f32 %v808_v1, %v799_v5  ;;  %1267 = vperm.xlu2 %4948, %v5769_v32   ;;  %v827_v10 = vadd.f32 %v6104_v8, %v5996_v43 }
 0x10a   : > { %v764_v13 = vadd.f32 %v6026_v4, %v744_v9  ;;  %4523 = vmatmul.msk.f32.gmra.mxu1 %vm381_vm0, %v5786_v39  ;;  %1504 = vmatpush.msrb.mxu0 %v1354_v58  ;;  %v6238_v58 = vld [vmem:[%s5709_s14 + $0x8] sm:$0xff] }
 0x10b   : > { %v784_v14 = vpop.permute.xlu1 %783  ;;  %823 = vst [vmem:[%s5991_s0 + $0x230] sm:$0xff] %v819_v12 }
 0x10c   : > { %768 = vst [vmem:[%s5991_s0 + $0x420] sm:$0xff] %v764_v13  ;;  %v792_v18 = vadd.f32 %v784_v14, %v772_v11  ;;  %4527 = vmatmul.msk.f32.gmra.mxu2 %vm381_vm0, %v5786_v39  ;;  %1505 = vmatpush.msrb.mxu0 %v1346_v59  ;;  %v1357_v59 = vld [vmem:[%s5691_s18 + $0x2b8] sm:$0xff] }
 0x10d   : > { %v832_v23 = vpop.permute.xlu2 %831  ;;  %4533 = vmatmul.msk.f32.vlgmr.msrb.gmra.mxu0 %vm381_vm0, %v5736_v19 }
 0x10e   : > { %796 = vst [vmem:[%s5991_s0 + $0x428] sm:$0xff] %v792_v18  ;;  %v6122_v4 = vpop.f32.mrf.mxu2  ;;  %v846_v24 = vadd.f32 %v832_v23, %v826_v16  ;;  %v620_v30 = vpop.f32.mrf.mxu3  ;;  %4531 = vmatmul.msk.f32.gmra.mxu3 %vm381_vm0, %v5786_v39  ;;  %v1371_v16 = vld [vmem:[%s5691_s18 + $0x6a8] sm:$0xff] }
 0x10f   : > { %v536_v15 = vpop.f32.mrf.mxu0  ;;  %v828_v45 = vadd.f32 %v620_v30, %v6013_v53  ;;  %1531 = vmatpush.msrb.mxu1 %v1371_v16 }
 0x110   : > { %v745_v26 = vadd.f32 %v536_v15, %v6037_v7  ;;  %v565_v27 = vpop.f32.mrf.mxu1  ;;  %850 = vst [vmem:[%s5991_s0 + $0x38] sm:$0xff] %v846_v24 }
 0x111   : > { %v773_v33 = vadd.f32 %v565_v27, %v6037_v7  ;;  %4950 = vset.pattern.permute.xlu1 %v5413_v28  ;;  %1275 = vperm.xlu2 %4948, %v5739_v20  }
 0x112   : > { %v765_v37 = vadd.f32 %v760_v63, %v745_v26  ;;  %1295 = vperm.xlu1 %4950, %v5769_v32   ;;  %4524 = vmatmul.msk.f32.gmra.mxu1 %vm381_vm0, %v5800_v42  ;;  %v5417_v63 = vmov 17  }
 0x113   : > { %v793_v44 = vadd.f32 %v6085_v38, %v773_v33  ;;  %4960 = vset.pattern.permute.xlu0 %v5417_v63  ;;  %1532 = vmatpush.msrb.mxu1 %v1363_v22  ;;  %v1364_v33 = vld [vmem:[%s5691_s18 + $0x4b0] sm:$0xff] }
 0x114   : > { %769 = vst [vmem:[%s5991_s0 + $0x620] sm:$0xff] %v765_v37  ;;  %v804_v47 = vpop.permute.xlu1 %803  ;;  %4528 = vmatmul.msk.f32.gmra.mxu2 %vm381_vm0, %v5800_v42  ;;  %1651 = vperm.xlu0 %4960, %v5739_v20   ;;  %v1347_v37 = vld [vmem:[%s5691_s18 + $0xa8] sm:$0xff] }
 0x115   : > { %797 = vst [vmem:[%s5991_s0 + $0x628] sm:$0xff] %v793_v44  ;;  %v818_v50 = vadd.f32 %v804_v47, %v798_v25  ;;  %v840_v54 = vpop.permute.xlu2 %839  ;;  %4534 = vmatmul.msk.f32.gmra.mxu0 %vm381_vm0, %v5761_v29  ;;  %1533 = vmatpush.msrb.mxu1 %v1355_v35  ;;  %v1356_v44 = vld [vmem:[%s5691_s18 + $0x2b0] sm:$0xff] }
 0x116   : > { %v594_v52 = vpop.f32.mrf.mxu2  ;;  %v848_v38 = vadd.f32 %v840_v54, %v828_v45  ;;  %4532 = vmatmul.msk.f32.gmra.mxu3 %vm381_vm0, %v5800_v42  ;;  %v6198_v30 = vpop.f32.mrf.mxu3  ;;  %v1373_v54 = vld [vmem:[%s5691_s18 + $0x6b8] sm:$0xff] }
 0x117   : > { %822 = vst [vmem:[%s5991_s0 + $0x30] sm:$0xff] %v818_v50  ;;  %v903_v55 = vpop.f32.mrf.mxu0  ;;  %v801_v57 = vadd.f32 %v594_v52, %v6037_v7  ;;  %1534 = vmatpush.msrb.mxu1 %v1347_v37  ;;  %v6217_v50 = vld [vmem:[#allocation5] sm:$0xff]  ;;  %1589 = vmatpush.msrb.mxu3 %v1373_v54 }
 0x118   : > { %v6149_v51 = vpop.f32.mrf.mxu1  ;;  %852 = vst [vmem:[%s5991_s0 + $0x438] sm:$0xff] %v848_v38 }
 0x119   : > { %4951 = vset.pattern.permute.xlu2 %v5413_v28 }
 0x11a   : > { %1303 = vperm.xlu1 %4950, %v5739_v20   ;;  %1299 = vperm.xlu2 %4951, %v5721_v6  }
 0x11b   : > { %4537 = vmatmul.msk.f32.vlgmr.msrb.gmra.mxu1 %vm381_vm0, %v6217_v50 }
 0x11c   : > { %v816_v62 = vpop.permute.xlu1 %815 }
 0x11d   : > { %v821_v1 = vadd.f32 %v816_v62, %v801_v57  ;;  %4535 = vmatmul.msk.f32.gmra.mxu0 %vm381_vm0, %v5786_v39  ;;  %v1372_v39 = vld [vmem:[%s5691_s18 + $0x6b0] sm:$0xff]  ;;  %v1365_v57 = vld [vmem:[%s5691_s18 + $0x4b8] sm:$0xff] }
 0x11e   : > { %v961_v2 = vpop.f32.mrf.mxu2  ;;  %v1128_v3 = vpop.permute.xlu2 %1127  ;;  %1560 = vmatpush.msrb.mxu2 %v1372_v39  ;;  %1590 = vmatpush.msrb.mxu3 %v1365_v57 }
 0x11f   : > { %825 = vst [vmem:[%s5991_s0 + $0x630] sm:$0xff] %v821_v1  ;;  %v906_v28 = vpop.f32.mrf.mxu0  ;;  %v1174_v45 = vadd.f32 %v961_v2, %v5972_v31  ;;  %v6234_v56 = vpop.f32.mrf.mxu3  ;;  %v6245_v2 = vld [vmem:[#allocation5 + $0x8] sm:$0xff] }
 0x120   : > { %v1119_v5 = vadd.f32 %v906_v28, %v5996_v43  ;;  %v6166_v9 = vpop.f32.mrf.mxu1  ;;  %1561 = vmatpush.msrb.mxu2 %v1364_v33  ;;  %v1349_v28 = vld [vmem:[%s5691_s18 + $0xb8] sm:$0xff]  ;;  %1591 = vmatpush.msrb.mxu3 %v1357_v59 }
 0x121   : > { %v1147_v38 = vadd.f32 %v6166_v9, %v5996_v43 }
 0x122   : > { %4954 = vset.pattern.permute.xlu1 %v5415_v0  ;;  %v1139_v11 = vadd.f32 %v1128_v3, %v1119_v5  ;;  %4952 = vset.pattern.permute.xlu2 %v5415_v0  ;;  %v1118_v0 = vadd.f32 %v903_v55, %v5972_v31 }
 0x123   : > { %1327 = vperm.xlu1 %4954, %v5721_v6   ;;  %1319 = vperm.xlu2 %4952, %v5744_v21  }
 0x124   : > { %1143 = vst [vmem:[%s5991_s0 + $0x240] sm:$0xff] %v1139_v11  ;;  %1562 = vmatpush.msrb.mxu2 %v1356_v44  ;;  %4538 = vmatmul.msk.f32.gmra.mxu1 %vm381_vm0, %v6245_v2 }
 0x125   : > { %v836_v19 = vpop.permute.xlu1 %835  ;;  %4536 = vmatmul.msk.f32.gmra.mxu0 %vm381_vm0, %v5800_v42  ;;  %v6224_v42 = vld [vmem:[%s5709_s14] sm:$0xff]  ;;  %1592 = vmatpush.msrb.mxu3 %v1349_v28 }
 0x126   : > { %v847_v12 = vadd.f32 %v836_v19, %v827_v10  ;;  %v6179_v13 = vpop.f32.mrf.mxu2  ;;  %v1136_v14 = vpop.permute.xlu2 %1135  ;;  %1563 = vmatpush.msrb.mxu2 %v1348_v48  ;;  %4545 = vmatmul.msk.f32.vlgmr.msrb.gmra.mxu3 %vm381_vm0, %v6217_v50  ;;  %v5419_v19 = vmov 18  }
 0x127   : > { %v909_v8 = vpop.f32.mrf.mxu0  ;;  %4541 = vmatmul.msk.f32.vlgmr.msrb.gmra.mxu2 %vm381_vm0, %v6217_v50 }
 0x128   : > { %851 = vst [vmem:[%s5991_s0 + $0x238] sm:$0xff] %v847_v12  ;;  %v938_v6 = vpop.f32.mrf.mxu1  ;;  %v1120_v25 = vadd.f32 %v909_v8, %v6013_v53  ;;  %v5420_v12 = vmov 20   ;;  %v6260_v8 = vld [vmem:[%s5709_s14 + $0x10] sm:$0xff] }
 0x129   : > { %v1148_v29 = vadd.f32 %v938_v6, %v6013_v53 }
 0x12b   : > { %4955 = vset.pattern.permute.xlu1 %v5416_v17  ;;  %1331 = vperm.xlu2 %4952, %v5739_v20  }
 0x12c   : > { %1611 = vperm.xlu1 %4955, %v5744_v21  }
 0x12e   : > { %v1124_v18 = vpop.permute.xlu1 %1123  ;;  %v6195_v26 = vpop.f32.mrf.mxu2  ;;  %4546 = vmatmul.msk.f32.gmra.mxu3 %vm381_vm0, %v6245_v2 }
 0x12f   : > { %v1138_v23 = vadd.f32 %v1124_v18, %v1118_v0  ;;  %v912_v15 = vpop.f32.mrf.mxu0  ;;  %v1160_v21 = vpop.permute.xlu2 %1159  ;;  %4542 = vmatmul.msk.f32.gmra.mxu2 %vm381_vm0, %v6245_v2  ;;  %v6264_v0 = vld [vmem:[#allocation5 + $0x10] sm:$0xff] }
 0x130   : > { %v1121_v20 = vadd.f32 %v912_v15, %v6037_v7  ;;  %v1168_v24 = vadd.f32 %v1160_v21, %v1148_v29  ;;  %4539 = vmatmul.msk.f32.gmra.mxu1 %vm381_vm0, %v6264_v0  ;;  %v6283_v21 = vld [vmem:[#allocation5 + $0x18] sm:$0xff] }
 0x131   : > { %1142 = vst [vmem:[%s5991_s0 + $0x40] sm:$0xff] %v1138_v23  ;;  %v941_v5 = vpop.f32.mrf.mxu1 }
 0x132   : > { %v1141_v27 = vadd.f32 %v1136_v14, %v1121_v20  ;;  %1172 = vst [vmem:[%s5991_s0 + $0x448] sm:$0xff] %v1168_v24  ;;  %v1149_v11 = vadd.f32 %v941_v5, %v6037_v7  ;;  %v993_v14 = vpop.f32.mrf.mxu3  ;;  %v1176_v20 = vadd.f32 %v6195_v26, %v6013_v53  ;;  %v5421_v26 = vmov 21   ;;  %v1830_v5 = vld [vmem:[%s5691_s18 + $0xc0] sm:$0xff] }
 0x133   : > { %4956 = vset.pattern.permute.xlu2 %v5416_v17  ;;  %v1203_v16 = vadd.f32 %v993_v14, %v5996_v43 }
 0x134   : > { %1145 = vst [vmem:[%s5991_s0 + $0x640] sm:$0xff] %v1141_v27  ;;  %1623 = vperm.xlu1 %4955, %v6207_v41   ;;  %1615 = vperm.xlu2 %4956, %v5769_v32   ;;  %v5418_v32 = vmov 19  }
 0x135   : > { %4963 = vset.pattern.permute.xlu0 %v5418_v32 }
 0x136   : > { %v1132_v47 = vpop.permute.xlu1 %1131  ;;  %1695 = vperm.xlu0 %4963, %v6224_v42   ;;  %4547 = vmatmul.msk.f32.gmra.mxu3 %vm381_vm0, %v6264_v0 }
 0x137   : > { %v1140_v49 = vadd.f32 %v1132_v47, %v1120_v25  ;;  %v970_v55 = vpop.f32.mrf.mxu2  ;;  %4543 = vmatmul.msk.f32.gmra.mxu2 %vm381_vm0, %v6264_v0  ;;  %v1854_v47 = vld [vmem:[%s5691_s18 + $0x6c0] sm:$0xff] }
 0x138   : > { %v1180_v17 = vpop.permute.xlu2 %1179  ;;  %v1177_v62 = vadd.f32 %v970_v55, %v6037_v7  ;;  %4540 = vmatmul.msk.f32.gmra.mxu1 %vm381_vm0, %v6283_v21  ;;  %1874 = vmatpush.msra.mxu0 %v1854_v47 }
 0x139   : > { %1144 = vst [vmem:[%s5991_s0 + $0x440] sm:$0xff] %v1140_v49  ;;  %v1194_v52 = vadd.f32 %v1180_v17, %v1174_v45  ;;  %v6269_v18 = vpop.f32.mrf.mxu1  ;;  %v1202_v45 = vadd.f32 %v6234_v56, %v5972_v31  ;;  %v1855_v17 = vld [vmem:[%s5691_s18 + $0x6c8] sm:$0xff] }
 0x13a   : > { %v6288_v27 = vpop.f32.mrf.mxu3  ;;  %1903 = vmatpush.msra.mxu1 %v1855_v17 }
 0x13b   : > { %1198 = vst [vmem:[%s5991_s0 + $0x50] sm:$0xff] %v1194_v52  ;;  %v1846_v52 = vld [vmem:[%s5691_s18 + $0x4c0] sm:$0xff] }
 0x13c   : > { %4959 = vset.pattern.permute.xlu1 %v5417_v63  ;;  %4958 = vset.pattern.permute.xlu2 %v5417_v63  ;;  %v1019_v63 = vpop.f32.mrf.mxu0 }
 0x13d   : > { %1643 = vperm.xlu1 %4959, %v6238_v58   ;;  %1639 = vperm.xlu2 %4958, %v6224_v42   ;;  %v1230_v39 = vadd.f32 %v1019_v63, %v5972_v31 }
 0x13e   : > { %4967 = vset.pattern.permute.xlu0 %v5420_v12  ;;  %1875 = vmatpush.msra.mxu0 %v1846_v52 }
 0x13f   : > { %v1156_v1 = vpop.permute.xlu1 %1155  ;;  %1727 = vperm.xlu0 %4967, %v6238_v58   ;;  %4544 = vmatmul.msk.f32.gmra.mxu2 %vm381_vm0, %v6283_v21 }
 0x140   : > { %v1167_v3 = vadd.f32 %v1156_v1, %v1147_v38  ;;  %v1192_v9 = vpop.permute.xlu2 %1191  ;;  %v6307_v56 = vpop.f32.mrf.mxu2  ;;  %4548 = vmatmul.msk.f32.gmra.mxu3 %vm381_vm0, %v6283_v21  ;;  %v1838_v1 = vld [vmem:[%s5691_s18 + $0x2c0] sm:$0xff] }
 0x141   : > { %v1197_v10 = vadd.f32 %v1192_v9, %v1177_v62  ;;  %v1847_v62 = vld [vmem:[%s5691_s18 + $0x4c8] sm:$0xff]  ;;  %1876 = vmatpush.msra.mxu0 %v1838_v1 }
 0x142   : > { %1171 = vst [vmem:[%s5991_s0 + $0x248] sm:$0xff] %v1167_v3  ;;  %v1051_v25 = vpop.f32.mrf.mxu1  ;;  %v999_v55 = vpop.f32.mrf.mxu3  ;;  %1904 = vmatpush.msra.mxu1 %v1847_v62  ;;  %v1839_v3 = vld [vmem:[%s5691_s18 + $0x2c8] sm:$0xff]  ;;  %v1841_v62 = vld [vmem:[%s5691_s18 + $0x2d8] sm:$0xff] }
 0x143   : > { %1201 = vst [vmem:[%s5991_s0 + $0x650] sm:$0xff] %v1197_v10  ;;  %v1205_v28 = vadd.f32 %v999_v55, %v6037_v7  ;;  %v1831_v9 = vld [vmem:[%s5691_s18 + $0xc8] sm:$0xff]  ;;  %v1259_v10 = vadd.f32 %v1051_v25, %v5996_v43  ;;  %1877 = vmatpush.msra.mxu0 %v1830_v5  ;;  %v5423_v5 = vmov 24  }
 0x144   : > { %v6274_v15 = vpop.f32.mrf.mxu0  ;;  %1905 = vmatpush.msra.mxu1 %v1839_v3  ;;  %4549 = vmatmul.msk.f32.vlgmr.msra.gmra.mxu0 %vm381_vm0, %v6217_v50  ;;  %v1833_v3 = vld [vmem:[%s5691_s18 + $0xd8] sm:$0xff] }
 0x145   : > { %4961 = vset.pattern.permute.xlu1 %v5419_v19  ;;  %1647 = vperm.xlu2 %4958, %v6260_v8  }
 0x146   : > { %1667 = vperm.xlu1 %4961, %v6224_v42   ;;  %1906 = vmatpush.msra.mxu1 %v1831_v9 }
 0x147   : > { %v1164_v6 = vpop.permute.xlu1 %1163  ;;  %4971 = vset.pattern.permute.xlu0 %v5421_v26  ;;  %4553 = vmatmul.msk.f32.vlgmr.msra.gmra.mxu1 %vm381_vm0, %v6217_v50 }
 0x148   : > { %v1169_v29 = vadd.f32 %v1164_v6, %v1149_v11  ;;  %1759 = vperm.xlu0 %4971, %v6260_v8   ;;  %v5422_v11 = vmov 22  }
 0x149   : > { %v1212_v22 = vpop.permute.xlu2 %1211 }
 0x14a   : > { %1173 = vst [vmem:[%s5991_s0 + $0x648] sm:$0xff] %v1169_v29  ;;  %v1223_v23 = vadd.f32 %v1212_v22, %v1203_v16  ;;  %v6312_v59 = vpop.f32.mrf.mxu1  ;;  %v1106_v14 = vpop.f32.mrf.mxu3  ;;  %v1231_v22 = vadd.f32 %v6274_v15, %v5996_v43 }
 0x14b   : > { %v6332_v16 = vpop.f32.mrf.mxu2  ;;  %v1314_v1 = vadd.f32 %v1106_v14, %v5972_v31 }
 0x14c   : > { %1227 = vst [vmem:[%s5991_s0 + $0x258] sm:$0xff] %v1223_v23  ;;  %v1025_v44 = vpop.f32.mrf.mxu0  ;;  %4550 = vmatmul.msk.f32.gmra.mxu0 %vm381_vm0, %v6245_v2 }
 0x14d   : > { %4962 = vset.pattern.permute.xlu2 %v5419_v19  ;;  %v1232_v48 = vadd.f32 %v1025_v44, %v6013_v53  ;;  %v1258_v44 = vadd.f32 %v6269_v18, %v5972_v31 }
 0x14e   : > { %1675 = vperm.xlu1 %4961, %v6260_v8   ;;  %1671 = vperm.xlu2 %4962, %v6238_v58  }
 0x14f   : > { %4554 = vmatmul.msk.f32.gmra.mxu1 %vm381_vm0, %v6245_v2 }
 0x150   : > { %v1188_v24 = vpop.permute.xlu1 %1187  ;;  %4974 = vset.pattern.permute.xlu0 %v5422_v11 }
 0x151   : > { %v1196_v35 = vadd.f32 %v1188_v24, %v1176_v20  ;;  %1791 = vperm.xlu0 %4974, %v6207_v41  }
 0x152   : > { %v1236_v33 = vpop.permute.xlu2 %1235 }
 0x153   : > { %1200 = vst [vmem:[%s5991_s0 + $0x450] sm:$0xff] %v1196_v35  ;;  %v1250_v37 = vadd.f32 %v1236_v33, %v1230_v39  ;;  %v1057_v29 = vpop.f32.mrf.mxu1  ;;  %v6346_v39 = vpop.f32.mrf.mxu3  ;;  %v1848_v33 = vld [vmem:[%s5691_s18 + $0x4d0] sm:$0xff] }
 0x154   : > { %v1261_v23 = vadd.f32 %v1057_v29, %v6037_v7  ;;  %v1083_v25 = vpop.f32.mrf.mxu2  ;;  %4551 = vmatmul.msk.f32.gmra.mxu0 %vm381_vm0, %v6264_v0  ;;  %v6370_v55 = vpop.f32.mrf.mxu0 }
 0x155   : > { %1254 = vst [vmem:[%s5991_s0 + $0x60] sm:$0xff] %v1250_v37  ;;  %v1840_v37 = vld [vmem:[%s5691_s18 + $0x2d0] sm:$0xff]  ;;  %v1288_v47 = vadd.f32 %v1083_v25, %v6013_v53 }
 0x156   : > { %4964 = vset.pattern.permute.xlu1 %v5418_v32  ;;  %1679 = vperm.xlu2 %4962, %v6207_v41  }
 0x157   : > { %1699 = vperm.xlu1 %4964, %v6238_v58   ;;  %4555 = vmatmul.msk.f32.gmra.mxu1 %vm381_vm0, %v6264_v0 }
 0x159   : > { %v1208_v49 = vpop.permute.xlu1 %1207  ;;  %4977 = vset.pattern.permute.xlu0 %v5423_v5 }
 0x15a   : > { %v1222_v54 = vadd.f32 %v1208_v49, %v1202_v45  ;;  %v1244_v38 = vpop.permute.xlu2 %1243  ;;  %v1832_v45 = vld [vmem:[%s5691_s18 + $0xd0] sm:$0xff]  ;;  %2099 = vperm.xlu0 %4977, %v6224_v42  }
 0x15b   : > { %v1252_v57 = vadd.f32 %v1244_v38, %v1232_v48  ;;  %v6367_v52 = vpop.f32.mrf.mxu3  ;;  %v1260_v38 = vadd.f32 %v6312_v59, %v6013_v53 }
 0x15c   : > { %1226 = vst [vmem:[%s5991_s0 + $0x58] sm:$0xff] %v1222_v54  ;;  %v1857_v54 = vld [vmem:[%s5691_s18 + $0x6d8] sm:$0xff]  ;;  %4552 = vmatmul.msk.f32.gmra.mxu0 %vm381_vm0, %v6283_v21 }
 0x15d   : > { %1256 = vst [vmem:[%s5991_s0 + $0x460] sm:$0xff] %v1252_v57  ;;  %1961 = vmatpush.msra.mxu3 %v1857_v54  ;;  %v1849_v57 = vld [vmem:[%s5691_s18 + $0x4d8] sm:$0xff] }
 0x15e   : > { %4965 = vset.pattern.permute.xlu2 %v5418_v32 }
 0x15f   : > { %1707 = vperm.xlu1 %4964, %v6207_v41   ;;  %1703 = vperm.xlu2 %4965, %v6260_v8  }
 0x160   : > { %1962 = vmatpush.msra.mxu3 %v1849_v57  ;;  %4556 = vmatmul.msk.f32.gmra.mxu1 %vm381_vm0, %v6283_v21 }
 0x161   : > { %v1220_v63 = vpop.permute.xlu1 %1219 }
 0x162   : > { %v1225_v19 = vadd.f32 %v1220_v63, %v1205_v28  ;;  %1963 = vmatpush.msra.mxu3 %v1841_v62  ;;  %v1287_v63 = vadd.f32 %v6332_v16, %v5996_v43  ;;  %v1086_v16 = vpop.f32.mrf.mxu2 }
 0x163   : > { %v1268_v32 = vpop.permute.xlu2 %1267  ;;  %v1115_v9 = vpop.f32.mrf.mxu3 }
 0x164   : > { %1229 = vst [vmem:[%s5991_s0 + $0x658] sm:$0xff] %v1225_v19  ;;  %v1279_v6 = vadd.f32 %v1268_v32, %v1259_v10  ;;  %1964 = vmatpush.msra.mxu3 %v1833_v3  ;;  %v6397_v10 = vpop.f32.mrf.mxu0  ;;  %v1317_v19 = vadd.f32 %v1115_v9, %v6037_v7  ;;  %v1858_v32 = vld [vmem:[%s5691_s18 + $0x6e0] sm:$0xff]  ;;  %v1852_v3 = vld [vmem:[%s5691_s18 + $0x4f0] sm:$0xff] }
 0x165   : > { %4561 = vmatmul.msk.f32.vlgmr.msra.gmra.mxu3 %vm381_vm0, %v6217_v50  ;;  %1990 = vmatpush.msrb.mxu0 %v1858_v32  ;;  %v6459_v9 = vld [vmem:[%s5702_s28 + $0x10] sm:$0xff] }
 0x166   : > { %1283 = vst [vmem:[%s5991_s0 + $0x268] sm:$0xff] %v1279_v6 }
 0x167   : > { %4968 = vset.pattern.permute.xlu1 %v5420_v12  ;;  %4966 = vset.pattern.permute.xlu2 %v5420_v12  ;;  %v1856_v12 = vld [vmem:[%s5691_s18 + $0x6d0] sm:$0xff] }
 0x168   : > { %1731 = vperm.xlu1 %4968, %v6260_v8   ;;  %1723 = vperm.xlu2 %4966, %v6224_v42  }
 0x169   : > { %1932 = vmatpush.msra.mxu2 %v1856_v12 }
 0x16a   : > { %v1240_v20 = vpop.permute.xlu1 %1239 }
 0x16b   : > { %v1251_v24 = vadd.f32 %v1240_v20, %v1231_v22  ;;  %v1276_v15 = vpop.permute.xlu2 %1275  ;;  %1933 = vmatpush.msra.mxu2 %v1848_v33  ;;  %v1289_v20 = vadd.f32 %v1086_v16, %v6037_v7 }
 0x16c   : > { %v1281_v35 = vadd.f32 %v1276_v15, %v1261_v23  ;;  %v1834_v15 = vld [vmem:[%s5691_s18 + $0xe0] sm:$0xff]  ;;  %v1394_v12 = vpop.f32.mrf.mxu0 }
 0x16d   : > { %1255 = vst [vmem:[%s5991_s0 + $0x260] sm:$0xff] %v1251_v24  ;;  %1934 = vmatpush.msra.mxu2 %v1840_v37  ;;  %4562 = vmatmul.msk.f32.gmra.mxu3 %vm381_vm0, %v6245_v2  ;;  %v1842_v24 = vld [vmem:[%s5691_s18 + $0x2e0] sm:$0xff]  ;;  %v1607_v33 = vadd.f32 %v1394_v12, %v5996_v43  ;;  %v5425_v37 = vmov 25   ;;  %v6486_v12 = vld [vmem:[%s5702_s28 + $0x8] sm:$0xff] }
 0x16e   : > { %1285 = vst [vmem:[%s5991_s0 + $0x668] sm:$0xff] %v1281_v35  ;;  %v5424_v35 = vmov 23   ;;  %4981 = vset.pattern.permute.xlu0 %v5425_v37 }
 0x16f   : > { %1935 = vmatpush.msra.mxu2 %v1832_v45  ;;  %2131 = vperm.xlu0 %4981, %v6238_v58  }
 0x170   : > { %4969 = vset.pattern.permute.xlu1 %v5421_v26  ;;  %1735 = vperm.xlu2 %4966, %v6207_v41  }
 0x171   : > { %1751 = vperm.xlu1 %4969, %v6224_v42   ;;  %4557 = vmatmul.msk.f32.vlgmr.msra.gmra.mxu2 %vm381_vm0, %v6217_v50 }
 0x173   : > { %v1264_v48 = vpop.permute.xlu1 %1263 }
 0x174   : > { %v1278_v18 = vadd.f32 %v1264_v48, %v1258_v44  ;;  %v1300_v49 = vpop.permute.xlu2 %1299  ;;  %v1316_v48 = vadd.f32 %v6367_v52, %v6013_v53  ;;  %v6439_v54 = vpop.f32.mrf.mxu0  ;;  %v5426_v52 = vmov 26  }
 0x175   : > { %v1308_v17 = vadd.f32 %v1300_v49, %v1288_v47  ;;  %4563 = vmatmul.msk.f32.gmra.mxu3 %vm381_vm0, %v6264_v0  ;;  %v6436_v49 = vld [vmem:[%s5702_s28] sm:$0xff] }
 0x176   : > { %1282 = vst [vmem:[%s5991_s0 + $0x68] sm:$0xff] %v1278_v18  ;;  %v1420_v22 = vpop.f32.mrf.mxu1 }
 0x177   : > { %1312 = vst [vmem:[%s5991_s0 + $0x470] sm:$0xff] %v1308_v17  ;;  %v1634_v17 = vadd.f32 %v6436_v49, %v1420_v22  ;;  %4985 = vset.pattern.permute.xlu0 %v5426_v52 }
 0x178   : > { %4970 = vset.pattern.permute.xlu2 %v5421_v26  ;;  %2163 = vperm.xlu0 %4985, %v6260_v8  }
 0x179   : > { %1763 = vperm.xlu1 %4969, %v6207_v41   ;;  %1755 = vperm.xlu2 %4970, %v6238_v58  }
 0x17a   : > { %4558 = vmatmul.msk.f32.gmra.mxu2 %vm381_vm0, %v6245_v2 }
 0x17b   : > { %v1272_v28 = vpop.permute.xlu1 %1271 }
 0x17c   : > { %v1280_v59 = vadd.f32 %v1272_v28, %v1260_v38 }
 0x17d   : > { %v1320_v26 = vpop.permute.xlu2 %1319  ;;  %4564 = vmatmul.msk.f32.gmra.mxu3 %vm381_vm0, %v6283_v21 }
 0x17e   : > { %1284 = vst [vmem:[%s5991_s0 + $0x468] sm:$0xff] %v1280_v59  ;;  %v1334_v31 = vadd.f32 %v1320_v26, %v1314_v1  ;;  %v6426_v43 = vpop.f32.mrf.mxu1  ;;  %v1860_v1 = vld [vmem:[%s5691_s18 + $0x6f0] sm:$0xff]  ;;  %v1606_v59 = vadd.f32 %v6436_v49, %v6397_v10  ;;  %v1859_v26 = vld [vmem:[%s5691_s18 + $0x6e8] sm:$0xff] }
 0x17f   : > { %v6418_v44 = vpop.f32.mrf.mxu2  ;;  %2048 = vmatpush.msrb.mxu2 %v1860_v1  ;;  %2019 = vmatpush.msrb.mxu1 %v1859_v26 }
 0x180   : > { %1338 = vst [vmem:[%s5991_s0 + $0x78] sm:$0xff] %v1334_v31  ;;  %v1844_v31 = vld [vmem:[%s5691_s18 + $0x2f0] sm:$0xff]  ;;  %v1662_v26 = vadd.f32 %v6436_v49, %v6418_v44 }
 0x181   : > { %4973 = vset.pattern.permute.xlu1 %v5422_v11  ;;  %4972 = vset.pattern.permute.xlu2 %v5422_v11  ;;  %v1850_v11 = vld [vmem:[%s5691_s18 + $0x4e0] sm:$0xff] }
 0x182   : > { %1783 = vperm.xlu1 %4973, %v6238_v58   ;;  %1779 = vperm.xlu2 %4972, %v6224_v42  }
 0x183   : > { %4559 = vmatmul.msk.f32.gmra.mxu2 %vm381_vm0, %v6264_v0  ;;  %1991 = vmatpush.msrb.mxu0 %v1850_v11  ;;  %v1843_v11 = vld [vmem:[%s5691_s18 + $0x2e8] sm:$0xff] }
 0x184   : > { %v1296_v14 = vpop.permute.xlu1 %1295  ;;  %2049 = vmatpush.msrb.mxu2 %v1852_v3  ;;  %v1845_v3 = vld [vmem:[%s5691_s18 + $0x2f8] sm:$0xff] }
 0x185   : > { %v1307_v6 = vadd.f32 %v1296_v14, %v1287_v63  ;;  %v1332_v29 = vpop.permute.xlu2 %1331  ;;  %1992 = vmatpush.msrb.mxu0 %v1842_v24  ;;  %v1851_v14 = vld [vmem:[%s5691_s18 + $0x4e8] sm:$0xff] }
 0x186   : > { %v1337_v23 = vadd.f32 %v1332_v29, %v1317_v19  ;;  %v1836_v19 = vld [vmem:[%s5691_s18 + $0xf0] sm:$0xff]  ;;  %2050 = vmatpush.msrb.mxu2 %v1844_v31  ;;  %v6466_v29 = vpop.f32.mrf.mxu3  ;;  %2020 = vmatpush.msrb.mxu1 %v1851_v14  ;;  %v1837_v31 = vld [vmem:[%s5691_s18 + $0xf8] sm:$0xff] }
 0x187   : > { %1311 = vst [vmem:[%s5991_s0 + $0x270] sm:$0xff] %v1307_v6  ;;  %1993 = vmatpush.msrb.mxu0 %v1834_v15  ;;  %v1452_v38 = vpop.f32.mrf.mxu2  ;;  %v1426_v28 = vpop.f32.mrf.mxu1  ;;  %v1835_v15 = vld [vmem:[%s5691_s18 + $0xe8] sm:$0xff] }
 0x188   : > { %1341 = vst [vmem:[%s5991_s0 + $0x678] sm:$0xff] %v1337_v23  ;;  %4565 = vmatmul.msk.f32.vlgmr.msrb.gmra.mxu0 %vm381_vm0, %v6217_v50  ;;  %v1636_v63 = vadd.f32 %v6459_v9, %v1426_v28  ;;  %v1400_v6 = vpop.f32.mrf.mxu0  ;;  %2051 = vmatpush.msrb.mxu2 %v1836_v19 }
 0x189   : > { %2021 = vmatpush.msrb.mxu1 %v1843_v11 }
 0x18a   : > { %4975 = vset.pattern.permute.xlu1 %v5424_v35  ;;  %1787 = vperm.xlu2 %4972, %v6260_v8  }
 0x18b   : > { %1807 = vperm.xlu1 %4975, %v6224_v42   ;;  %4560 = vmatmul.msk.f32.gmra.mxu2 %vm381_vm0, %v6283_v21 }
 0x18c   : > { %v1304_v25 = vpop.permute.xlu1 %1303  ;;  %2022 = vmatpush.msrb.mxu1 %v1835_v15  ;;  %v5428_v15 = vmov 29  }
 0x18d   : > { %v1309_v7 = vadd.f32 %v1304_v25, %v1289_v20  ;;  %v6475_v20 = vld [vmem:[%s5702_s28 + $0x18] sm:$0xff]  ;;  %v1663_v25 = vadd.f32 %v6486_v12, %v1452_v38  ;;  %4569 = vmatmul.msk.f32.vlgmr.msrb.gmra.mxu1 %vm381_vm0, %v6217_v50 }
 0x18e   : > { %v1616_v45 = vpop.permute.xlu2 %1615  ;;  %v1609_v24 = vadd.f32 %v6475_v20, %v1400_v6 }
 0x18f   : > { %1313 = vst [vmem:[%s5991_s0 + $0x670] sm:$0xff] %v1309_v7  ;;  %v1627_v47 = vadd.f32 %v1616_v45, %v1607_v33  ;;  %v6469_v23 = vpop.f32.mrf.mxu2  ;;  %v5427_v33 = vmov 27   ;;  %v6533_v6 = vpop.f32.mrf.mxu1 }
 0x190   : > { %4566 = vmatmul.msk.f32.gmra.mxu0 %vm381_vm0, %v6245_v2  ;;  %4988 = vset.pattern.permute.xlu0 %v5427_v33  ;;  %v1507_v45 = vpop.f32.mrf.mxu0 }
 0x191   : > { %1631 = vst [vmem:[%s5991_s0 + $0x280] sm:$0xff] %v1627_v47  ;;  %2195 = vperm.xlu0 %4988, %v6207_v41  }
 0x192   : > { %4976 = vset.pattern.permute.xlu2 %v5424_v35 }
 0x193   : > { %1815 = vperm.xlu1 %4975, %v6260_v8   ;;  %1811 = vperm.xlu2 %4976, %v6238_v58  }
 0x194   : > { %4573 = vmatmul.msk.f32.vlgmr.msrb.gmra.mxu2 %vm381_vm0, %v6217_v50 }
 0x195   : > { %v1328_v18 = vpop.permute.xlu1 %1327  ;;  %4570 = vmatmul.msk.f32.gmra.mxu1 %vm381_vm0, %v6245_v2 }
 0x196   : > { %v1336_v53 = vadd.f32 %v1328_v18, %v1316_v48  ;;  %v6494_v48 = vpop.f32.mrf.mxu3 }
 0x197   : > { %v1640_v57 = vpop.permute.xlu2 %1639  ;;  %v1458_v18 = vpop.f32.mrf.mxu2 }
 0x198   : > { %1340 = vst [vmem:[%s5991_s0 + $0x478] sm:$0xff] %v1336_v53  ;;  %v1654_v62 = vadd.f32 %v1640_v57, %v1634_v17  ;;  %4567 = vmatmul.msk.f32.gmra.mxu0 %vm381_vm0, %v6264_v0  ;;  %v1635_v17 = vadd.f32 %v6486_v12, %v6426_v43  ;;  %v1665_v53 = vadd.f32 %v6475_v20, %v1458_v18  ;;  %v2318_v18 = vld [vmem:[%s5691_s18 + $0x100] sm:$0xff] }
 0x199   : > { %4991 = vset.pattern.permute.xlu0 %v5428_v15 }
 0x19a   : > { %1658 = vst [vmem:[%s5991_s0 + $0x88] sm:$0xff] %v1654_v62  ;;  %v6508_v62 = vpop.f32.mrf.mxu0  ;;  %2239 = vperm.xlu0 %4991, %v6224_v42  }
 0x19b   : > { %4978 = vset.pattern.permute.xlu1 %v5423_v5  ;;  %1819 = vperm.xlu2 %4976, %v6207_v41  }
 0x19c   : > { %2103 = vperm.xlu1 %4978, %v6238_v58   ;;  %4574 = vmatmul.msk.f32.gmra.mxu2 %vm381_vm0, %v6245_v2 }
 0x19d   : > { %4571 = vmatmul.msk.f32.gmra.mxu1 %vm381_vm0, %v6264_v0 }
 0x19e   : > { %v1612_v10 = vpop.permute.xlu1 %1611  ;;  %v1484_v28 = vpop.f32.mrf.mxu3 }
 0x19f   : > { %v1626_v32 = vadd.f32 %v1612_v10, %v1606_v59  ;;  %v1648_v16 = vpop.permute.xlu2 %1647  ;;  %v1853_v59 = vld [vmem:[%s5691_s18 + $0x4f8] sm:$0xff] }
 0x1a0   : > { %v1656_v22 = vadd.f32 %v1648_v16, %v1636_v63  ;;  %4568 = vmatmul.msk.f32.gmra.mxu0 %vm381_vm0, %v6283_v21  ;;  %v1692_v63 = vadd.f32 %v6459_v9, %v1484_v28  ;;  %v1664_v16 = vadd.f32 %v6459_v9, %v6469_v23 }
 0x1a1   : > { %1630 = vst [vmem:[%s5991_s0 + $0x80] sm:$0xff] %v1626_v32 }
 0x1a2   : > { %1660 = vst [vmem:[%s5991_s0 + $0x488] sm:$0xff] %v1656_v22  ;;  %v6531_v32 = vpop.f32.mrf.mxu0  ;;  %v1718_v22 = vadd.f32 %v6436_v49, %v1507_v45  ;;  %v2326_v45 = vld [vmem:[%s5691_s18 + $0x300] sm:$0xff] }
 0x1a3   : > { %4979 = vset.pattern.permute.xlu2 %v5423_v5 }
 0x1a4   : > { %2111 = vperm.xlu1 %4978, %v6207_v41   ;;  %2107 = vperm.xlu2 %4979, %v6260_v8  }
 0x1a5   : > { %4575 = vmatmul.msk.f32.gmra.mxu2 %vm381_vm0, %v6264_v0  ;;  %4572 = vmatmul.msk.f32.gmra.mxu1 %vm381_vm0, %v6283_v21 }
 0x1a6   : > { %v1624_v35 = vpop.permute.xlu1 %1623 }
 0x1a7   : > { %v1629_v7 = vadd.f32 %v1624_v35, %v1609_v24  ;;  %v2342_v24 = vld [vmem:[%s5691_s18 + $0x700] sm:$0xff] }
 0x1a8   : > { %v1672_v5 = vpop.permute.xlu2 %1671  ;;  %2362 = vmatpush.msra.mxu0 %v2342_v24  ;;  %v2334_v35 = vld [vmem:[%s5691_s18 + $0x500] sm:$0xff]  ;;  %v1720_v24 = vadd.f32 %v6459_v9, %v6531_v32 }
 0x1a9   : > { %1633 = vst [vmem:[%s5991_s0 + $0x680] sm:$0xff] %v1629_v7  ;;  %v1683_v47 = vadd.f32 %v1672_v5, %v1663_v25  ;;  %v1691_v5 = vadd.f32 %v6486_v12, %v6494_v48 }
 0x1aa   : > { %2363 = vmatpush.msra.mxu0 %v2334_v35  ;;  %v1516_v7 = vpop.f32.mrf.mxu0 }
 0x1ab   : > { %1687 = vst [vmem:[%s5991_s0 + $0x290] sm:$0xff] %v1683_v47  ;;  %v6556_v47 = vpop.f32.mrf.mxu1 }
 0x1ac   : > { %4982 = vset.pattern.permute.xlu1 %v5425_v37  ;;  %4980 = vset.pattern.permute.xlu2 %v5425_v37  ;;  %v1861_v37 = vld [vmem:[%s5691_s18 + $0x6f8] sm:$0xff] }
 0x1ad   : > { %2135 = vperm.xlu1 %4982, %v6260_v8   ;;  %2127 = vperm.xlu2 %4980, %v6224_v42  }
 0x1ae   : > { %2077 = vmatpush.msrb.mxu3 %v1861_v37  ;;  %4576 = vmatmul.msk.f32.gmra.mxu2 %vm381_vm0, %v6283_v21  ;;  %v2335_v37 = vld [vmem:[%s5691_s18 + $0x508] sm:$0xff] }
 0x1af   : > { %v1644_v38 = vpop.permute.xlu1 %1643  ;;  %2364 = vmatpush.msra.mxu0 %v2326_v45  ;;  %v5431_v45 = vmov 31  }
 0x1b0   : > { %v1655_v57 = vadd.f32 %v1644_v38, %v1635_v17  ;;  %v1680_v43 = vpop.permute.xlu2 %1679  ;;  %2078 = vmatpush.msrb.mxu3 %v1853_v59  ;;  %v1721_v17 = vadd.f32 %v6475_v20, %v1516_v7  ;;  %v2327_v59 = vld [vmem:[%s5691_s18 + $0x308] sm:$0xff] }
 0x1b1   : > { %v1685_v1 = vadd.f32 %v1680_v43, %v1665_v53  ;;  %2365 = vmatpush.msra.mxu0 %v2318_v18  ;;  %v2343_v53 = vld [vmem:[%s5691_s18 + $0x708] sm:$0xff]  ;;  %v1565_v43 = vpop.f32.mrf.mxu2 }
 0x1b2   : > { %1659 = vst [vmem:[%s5991_s0 + $0x288] sm:$0xff] %v1655_v57  ;;  %2079 = vmatpush.msrb.mxu3 %v1845_v3  ;;  %4581 = vmatmul.msk.f32.vlgmr.msra.gmra.mxu0 %vm381_vm0, %v6217_v50  ;;  %v1487_v57 = vpop.f32.mrf.mxu3  ;;  %v2319_v3 = vld [vmem:[%s5691_s18 + $0x108] sm:$0xff]  ;;  %v1774_v35 = vadd.f32 %v6436_v49, %v1565_v43  ;;  %v2329_v43 = vld [vmem:[%s5691_s18 + $0x318] sm:$0xff] }
 0x1b3   : > { %1689 = vst [vmem:[%s5991_s0 + $0x690] sm:$0xff] %v1685_v1  ;;  %2391 = vmatpush.msra.mxu1 %v2343_v53  ;;  %v1693_v28 = vadd.f32 %v6475_v20, %v1487_v57  ;;  %v2336_v53 = vld [vmem:[%s5691_s18 + $0x510] sm:$0xff]  ;;  %v2337_v57 = vld [vmem:[%s5691_s18 + $0x518] sm:$0xff] }
 0x1b4   : > { %2080 = vmatpush.msrb.mxu3 %v1837_v31  ;;  %v1539_v31 = vpop.f32.mrf.mxu1 }
 0x1b5   : > { %4983 = vset.pattern.permute.xlu1 %v5426_v52  ;;  %2139 = vperm.xlu2 %4980, %v6207_v41  }
 0x1b6   : > { %2155 = vperm.xlu1 %4983, %v6224_v42   ;;  %4577 = vmatmul.msk.f32.vlgmr.msrb.gmra.mxu3 %vm381_vm0, %v6217_v50 }
 0x1b7   : > { %2392 = vmatpush.msra.mxu1 %v2335_v37  ;;  %v2320_v37 = vld [vmem:[%s5691_s18 + $0x110] sm:$0xff] }
 0x1b8   : > { %v1668_v10 = vpop.permute.xlu1 %1667 }
 0x1b9   : > { %v1682_v19 = vadd.f32 %v1668_v10, %v1662_v26  ;;  %v1704_v44 = vpop.permute.xlu2 %1703  ;;  %v5429_v26 = vmov 28   ;;  %2393 = vmatpush.msra.mxu1 %v2327_v59  ;;  %v1747_v10 = vadd.f32 %v6486_v12, %v1539_v31 }
 0x1ba   : > { %v1712_v14 = vadd.f32 %v1704_v44, %v1692_v63  ;;  %4582 = vmatmul.msk.f32.gmra.mxu0 %vm381_vm0, %v6245_v2  ;;  %v6579_v44 = vpop.f32.mrf.mxu3 }
 0x1bb   : > { %1686 = vst [vmem:[%s5991_s0 + $0x90] sm:$0xff] %v1682_v19  ;;  %2394 = vmatpush.msra.mxu1 %v2319_v3 }
 0x1bc   : > { %1716 = vst [vmem:[%s5991_s0 + $0x498] sm:$0xff] %v1712_v14  ;;  %4585 = vmatmul.msk.f32.vlgmr.msra.gmra.mxu1 %vm381_vm0, %v6217_v50  ;;  %v5430_v14 = vmov 30  }
 0x1bd   : > { %4984 = vset.pattern.permute.xlu2 %v5426_v52  ;;  %4995 = vset.pattern.permute.xlu0 %v5430_v14 }
 0x1be   : > { %2167 = vperm.xlu1 %4983, %v6207_v41   ;;  %2159 = vperm.xlu2 %4984, %v6238_v58  }
 0x1bf   : > { %4578 = vmatmul.msk.f32.gmra.mxu3 %vm381_vm0, %v6245_v2  ;;  %2271 = vperm.xlu0 %4995, %v6238_v58  }
 0x1c0   : > { %v1676_v11 = vpop.permute.xlu1 %1675 }
 0x1c1   : > { %v1684_v23 = vadd.f32 %v1676_v11, %v1664_v16  ;;  %v6588_v11 = vpop.f32.mrf.mxu2 }
 0x1c2   : > { %v1724_v52 = vpop.permute.xlu2 %1723  ;;  %4583 = vmatmul.msk.f32.gmra.mxu0 %vm381_vm0, %v6264_v0  ;;  %v1597_v7 = vpop.f32.mrf.mxu3 }
 0x1c3   : > { %1688 = vst [vmem:[%s5991_s0 + $0x490] sm:$0xff] %v1684_v23  ;;  %v1738_v25 = vadd.f32 %v1724_v52, %v1718_v22  ;;  %v6598_v52 = vpop.f32.mrf.mxu1 }
 0x1c4   : > { %4586 = vmatmul.msk.f32.gmra.mxu1 %vm381_vm0, %v6245_v2 }
 0x1c5   : > { %1742 = vst [vmem:[%s5991_s0 + $0xa0] sm:$0xff] %v1738_v25  ;;  %v2344_v25 = vld [vmem:[%s5691_s18 + $0x710] sm:$0xff] }
 0x1c6   : > { %4987 = vset.pattern.permute.xlu1 %v5427_v33  ;;  %4986 = vset.pattern.permute.xlu2 %v5427_v33 }
 0x1c7   : > { %2187 = vperm.xlu1 %4987, %v6238_v58   ;;  %2183 = vperm.xlu2 %4986, %v6224_v42  }
 0x1c8   : > { %4579 = vmatmul.msk.f32.gmra.mxu3 %vm381_vm0, %v6264_v0  ;;  %2420 = vmatpush.msra.mxu2 %v2344_v25  ;;  %v1775_v25 = vadd.f32 %v6486_v12, %v6588_v11 }
 0x1c9   : > { %v1700_v48 = vpop.permute.xlu1 %1699  ;;  %4999 = vset.pattern.permute.xlu0 %v5431_v45 }
 0x1ca   : > { %v1711_v38 = vadd.f32 %v1700_v48, %v1691_v5  ;;  %v1736_v33 = vpop.permute.xlu2 %1735  ;;  %2303 = vperm.xlu0 %4999, %v6260_v8   ;;  %v1571_v48 = vpop.f32.mrf.mxu2  ;;  %2421 = vmatpush.msra.mxu2 %v2336_v53 }
 0x1cb   : > { %v1741_v1 = vadd.f32 %v1736_v33, %v1721_v17  ;;  %v2345_v17 = vld [vmem:[%s5691_s18 + $0x718] sm:$0xff]  ;;  %v2328_v33 = vld [vmem:[%s5691_s18 + $0x310] sm:$0xff]  ;;  %4584 = vmatmul.msk.f32.gmra.mxu0 %vm381_vm0, %v6283_v21 }
 0x1cc   : > { %1715 = vst [vmem:[%s5991_s0 + $0x298] sm:$0xff] %v1711_v38  ;;  %2449 = vmatpush.msra.mxu3 %v2345_v17  ;;  %v1746_v38 = vadd.f32 %v6436_v49, %v6556_v47  ;;  %4587 = vmatmul.msk.f32.gmra.mxu1 %vm381_vm0, %v6264_v0  ;;  %v1802_v17 = vadd.f32 %v6436_v49, %v6579_v44 }
 0x1cd   : > { %1745 = vst [vmem:[%s5991_s0 + $0x6a0] sm:$0xff] %v1741_v1  ;;  %v1776_v1 = vadd.f32 %v6459_v9, %v1571_v48  ;;  %2422 = vmatpush.msra.mxu2 %v2328_v33  ;;  %v6670_v48 = vld [vmem:[%s5709_s14 + $0x18] sm:$0xff] }
 0x1ce   : > { %2450 = vmatpush.msra.mxu3 %v2337_v57 }
 0x1cf   : > { %4989 = vset.pattern.permute.xlu1 %v5429_v26  ;;  %2191 = vperm.xlu2 %4986, %v6260_v8  }
 0x1d0   : > { %2211 = vperm.xlu1 %4989, %v6224_v42   ;;  %4580 = vmatmul.msk.f32.gmra.mxu3 %vm381_vm0, %v6283_v21 }
 0x1d1   : > { %v1708_v63 = vpop.permute.xlu1 %1707  ;;  %2451 = vmatpush.msra.mxu3 %v2329_v43  ;;  %2423 = vmatpush.msra.mxu2 %v2320_v37 }
 0x1d2   : > { %v1713_v19 = vadd.f32 %v1708_v63, %v1693_v28  ;;  %v2321_v28 = vld [vmem:[%s5691_s18 + $0x118] sm:$0xff]  ;;  %v1600_v63 = vpop.f32.mrf.mxu3  ;;  %4589 = vmatmul.msk.f32.vlgmr.msra.gmra.mxu2 %vm381_vm0, %v6217_v50  ;;  %v6682_v43 = vpop.f32.mrf.mxu2 }
 0x1d3   : > { %v1756_v16 = vpop.permute.xlu2 %1755  ;;  %2452 = vmatpush.msra.mxu3 %v2321_v28  ;;  %v1804_v37 = vadd.f32 %v6459_v9, %v1600_v63  ;;  %v2339_v63 = vld [vmem:[%s5691_s18 + $0x528] sm:$0xff] }
 0x1d4   : > { %1717 = vst [vmem:[%s5991_s0 + $0x698] sm:$0xff] %v1713_v19  ;;  %v1767_v22 = vadd.f32 %v1756_v16, %v1747_v10  ;;  %4588 = vmatmul.msk.f32.gmra.mxu1 %vm381_vm0, %v6283_v21  ;;  %v1803_v16 = vadd.f32 %v6486_v12, %v1597_v7 }
 0x1d6   : > { %1771 = vst [vmem:[%s5991_s0 + $0x2a8] sm:$0xff] %v1767_v22  ;;  %v5432_v22 = vmov 32  }
 0x1d7   : > { %4990 = vset.pattern.permute.xlu2 %v5429_v26  ;;  %v6624_v26 = vpop.f32.mrf.mxu0  ;;  %5002 = vset.pattern.permute.xlu0 %v5432_v22 }
 0x1d8   : > { %2219 = vperm.xlu1 %4989, %v6260_v8   ;;  %2215 = vperm.xlu2 %4990, %v6238_v58  }
 0x1d9   : > { %4593 = vmatmul.msk.f32.vlgmr.msra.gmra.mxu3 %vm381_vm0, %v6217_v50  ;;  %2599 = vperm.xlu0 %5002, %v6207_v41  }
 0x1da   : > { %v1732_v23 = vpop.permute.xlu1 %1731  ;;  %4590 = vmatmul.msk.f32.gmra.mxu2 %vm381_vm0, %v6245_v2 }
 0x1db   : > { %v1740_v32 = vadd.f32 %v1732_v23, %v1720_v24 }
 0x1dc   : > { %v1780_v5 = vpop.permute.xlu2 %1779 }
 0x1dd   : > { %1744 = vst [vmem:[%s5991_s0 + $0x4a0] sm:$0xff] %v1740_v32  ;;  %v1794_v18 = vadd.f32 %v1780_v5, %v1774_v35  ;;  %v1603_v32 = vpop.f32.mrf.mxu3 }
 0x1df   : > { %1798 = vst [vmem:[%s5991_s0 + $0xb0] sm:$0xff] %v1794_v18  ;;  %v6644_v35 = vpop.f32.mrf.mxu0 }
 0x1e0   : > { %4992 = vset.pattern.permute.xlu1 %v5428_v15  ;;  %2223 = vperm.xlu2 %4990, %v6207_v41  }
 0x1e1   : > { %2243 = vperm.xlu1 %4992, %v6238_v58   ;;  %v1545_v58 = vpop.f32.mrf.mxu1  ;;  %4594 = vmatmul.msk.f32.gmra.mxu3 %vm381_vm0, %v6245_v2 }
 0x1e2   : > { %v1749_v10 = vadd.f32 %v6475_v20, %v1545_v58  ;;  %4591 = vmatmul.msk.f32.gmra.mxu2 %vm381_vm0, %v6264_v0  ;;  %v6695_v58 = vld [vmem:[#allocation5] sm:$0xff] }
 0x1e3   : > { %v1752_v47 = vpop.permute.xlu1 %1751 }
 0x1e4   : > { %v1766_v59 = vadd.f32 %v1752_v47, %v1746_v38  ;;  %v1788_v3 = vpop.permute.xlu2 %1787  ;;  %v2338_v38 = vld [vmem:[%s5691_s18 + $0x520] sm:$0xff] }
 0x1e5   : > { %v1796_v31 = vadd.f32 %v1788_v3, %v1776_v1  ;;  %v2330_v1 = vld [vmem:[%s5691_s18 + $0x320] sm:$0xff]  ;;  %v2347_v3 = vld [vmem:[%s5691_s18 + $0x728] sm:$0xff] }
 0x1e6   : > { %1770 = vst [vmem:[%s5991_s0 + $0xa8] sm:$0xff] %v1766_v59  ;;  %v2322_v47 = vld [vmem:[%s5691_s18 + $0x120] sm:$0xff]  ;;  %2507 = vmatpush.msrb.mxu1 %v2347_v3 }
 0x1e7   : > { %1800 = vst [vmem:[%s5991_s0 + $0x4b0] sm:$0xff] %v1796_v31  ;;  %v5433_v31 = vmov 34  }
 0x1e8   : > { %4993 = vset.pattern.permute.xlu2 %v5428_v15  ;;  %5005 = vset.pattern.permute.xlu0 %v5433_v31 }
 0x1e9   : > { %2251 = vperm.xlu1 %4992, %v6207_v41   ;;  %2247 = vperm.xlu2 %4993, %v6260_v8   ;;  %v1908_v24 = vpop.f32.mrf.mxu1  ;;  %v1805_v41 = vadd.f32 %v6475_v20, %v1603_v32 }
 0x1ea   : > { %4595 = vmatmul.msk.f32.gmra.mxu3 %vm381_vm0, %v6264_v0  ;;  %4592 = vmatmul.msk.f32.gmra.mxu2 %vm381_vm0, %v6283_v21  ;;  %v2122_v28 = vadd.f32 %v6436_v49, %v1908_v24 }
 0x1eb   : > { %v1764_v19 = vpop.permute.xlu1 %1763  ;;  %2508 = vmatpush.msrb.mxu1 %v2339_v63  ;;  %v627_v63 = vadd.f32 %v6486_v12, %v5999_v46  ;;  %v6765_v46 = vld [vmem:[#allocation5 + $0x18] sm:$0xff] }
 0x1ec   : > { %v1769_v50 = vadd.f32 %v1764_v19, %v1749_v10  ;;  %v6703_v10 = vld [vmem:[%s5709_s14] sm:$0xff] }
 0x1ed   : > { %v1812_v23 = vpop.permute.xlu2 %1811  ;;  %2643 = vperm.xlu0 %5005, %v6703_v10  }
 0x1ee   : > { %1773 = vst [vmem:[%s5991_s0 + $0x6a8] sm:$0xff] %v1769_v50  ;;  %v1823_v15 = vadd.f32 %v1812_v23, %v1803_v16  ;;  %v2348_v50 = vld [vmem:[%s5691_s18 + $0x730] sm:$0xff]  ;;  %v2331_v23 = vld [vmem:[%s5691_s18 + $0x328] sm:$0xff] }
 0x1ef   : > { %2536 = vmatpush.msrb.mxu2 %v2348_v50  ;;  %2509 = vmatpush.msrb.mxu1 %v2331_v23 }
 0x1f0   : > { %1827 = vst [vmem:[%s5991_s0 + $0x2b8] sm:$0xff] %v1823_v15  ;;  %v2095_v15 = vadd.f32 %v6486_v12, %v6644_v35 }
 0x1f1   : > { %4996 = vset.pattern.permute.xlu1 %v5430_v14  ;;  %4994 = vset.pattern.permute.xlu2 %v5430_v14  ;;  %v6656_v18 = vpop.f32.mrf.mxu1  ;;  %v2346_v14 = vld [vmem:[%s5691_s18 + $0x720] sm:$0xff] }
 0x1f2   : > { %2275 = vperm.xlu1 %4996, %v6260_v8   ;;  %2267 = vperm.xlu2 %4994, %v6224_v42   ;;  %v1885_v8 = vpop.f32.mrf.mxu0 }
 0x1f3   : > { %2478 = vmatpush.msrb.mxu0 %v2346_v14  ;;  %v2096_v0 = vadd.f32 %v6459_v9, %v1885_v8  ;;  %4596 = vmatmul.msk.f32.gmra.mxu3 %vm381_vm0, %v6283_v21  ;;  %v6691_v21 = vld [vmem:[%s5709_s14 + $0x8] sm:$0xff] }
 0x1f4   : > { %v1784_v7 = vpop.permute.xlu1 %1783  ;;  %v6713_v32 = vpop.f32.mrf.mxu2 }
 0x1f5   : > { %v1795_v2 = vadd.f32 %v1784_v7, %v1775_v25  ;;  %v1820_v5 = vpop.permute.xlu2 %1819  ;;  %2479 = vmatpush.msrb.mxu0 %v2338_v38  ;;  %v2340_v25 = vld [vmem:[%s5691_s18 + $0x530] sm:$0xff] }
 0x1f6   : > { %v1825_v11 = vadd.f32 %v1820_v5, %v1805_v41  ;;  %v2323_v41 = vld [vmem:[%s5691_s18 + $0x128] sm:$0xff]  ;;  %v2332_v7 = vld [vmem:[%s5691_s18 + $0x330] sm:$0xff]  ;;  %2537 = vmatpush.msrb.mxu2 %v2340_v25 }
 0x1f7   : > { %1799 = vst [vmem:[%s5991_s0 + $0x2b0] sm:$0xff] %v1795_v2  ;;  %2480 = vmatpush.msrb.mxu0 %v2330_v1  ;;  %v6722_v5 = vld [vmem:[#allocation5 + $0x8] sm:$0xff]  ;;  %2510 = vmatpush.msrb.mxu1 %v2323_v41  ;;  %v5435_v1 = vmov 35  }
 0x1f8   : > { %1829 = vst [vmem:[%s5991_s0 + $0x6b8] sm:$0xff] %v1825_v11  ;;  %v2324_v11 = vld [vmem:[%s5691_s18 + $0x130] sm:$0xff]  ;;  %4601 = vmatmul.msk.f32.vlgmr.msrb.gmra.mxu1 %vm381_vm0, %v6695_v58  ;;  %2538 = vmatpush.msrb.mxu2 %v2332_v7 }
 0x1f9   : > { %v6680_v33 = vpop.f32.mrf.mxu1  ;;  %2481 = vmatpush.msrb.mxu0 %v2322_v47  ;;  %5009 = vset.pattern.permute.xlu0 %v5435_v1 }
 0x1fa   : > { %4997 = vset.pattern.permute.xlu1 %v5431_v45  ;;  %2279 = vperm.xlu2 %4994, %v6670_v48   ;;  %v1888_v14 = vpop.f32.mrf.mxu0 }
 0x1fb   : > { %2295 = vperm.xlu1 %4997, %v6224_v42   ;;  %4597 = vmatmul.msk.f32.vlgmr.msrb.gmra.mxu0 %vm381_vm0, %v6695_v58  ;;  %v2097_v38 = vadd.f32 %v6475_v20, %v1888_v14 }
 0x1fc   : > { %2539 = vmatpush.msrb.mxu2 %v2324_v11  ;;  %2675 = vperm.xlu0 %5009, %v6691_v21  }
 0x1fd   : > { %v1808_v53 = vpop.permute.xlu1 %1807  ;;  %4605 = vmatmul.msk.f32.vlgmr.msrb.gmra.mxu2 %vm381_vm0, %v6695_v58 }
 0x1fe   : > { %v1822_v57 = vadd.f32 %v1808_v53, %v1802_v17  ;;  %v2108_v44 = vpop.permute.xlu2 %2107 }
 0x1ff   : > { %v2116_v42 = vadd.f32 %v2108_v44, %v2096_v0  ;;  %v1966_v0 = vpop.f32.mrf.mxu3  ;;  %v5434_v44 = vmov 33  }
 0x200   : > { %1826 = vst [vmem:[%s5991_s0 + $0xb8] sm:$0xff] %v1822_v57  ;;  %v633_v57 = vpop.permute.xlu0 %632  ;;  %4602 = vmatmul.msk.f32.gmra.mxu1 %vm381_vm0, %v6722_v5  ;;  %v2178_v41 = vadd.f32 %v6436_v49, %v1966_v0  ;;  %v2341_v0 = vld [vmem:[%s5691_s18 + $0x538] sm:$0xff] }
 0x201   : > { %2120 = vst [vmem:[%s5991_s0 + $0x4c0] sm:$0xff] %v2116_v42  ;;  %v1917_v24 = vpop.f32.mrf.mxu1 }
 0x202   : > { %4998 = vset.pattern.permute.xlu2 %v5431_v45  ;;  %v2125_v2 = vadd.f32 %v6475_v20, %v1917_v24  ;;  %v2124_v24 = vadd.f32 %v6459_v9, %v6680_v33  ;;  %v5436_v33 = vmov 36  }
 0x203   : > { %2307 = vperm.xlu1 %4997, %v6670_v48   ;;  %2299 = vperm.xlu2 %4998, %v6691_v21  }
 0x204   : > { %4598 = vmatmul.msk.f32.gmra.mxu0 %vm381_vm0, %v6722_v5  ;;  %5013 = vset.pattern.permute.xlu0 %v5436_v33 }
 0x205   : > { %v1816_v59 = vpop.permute.xlu1 %1815  ;;  %4606 = vmatmul.msk.f32.gmra.mxu2 %vm381_vm0, %v6722_v5 }
 0x206   : > { %v1824_v45 = vadd.f32 %v1816_v59, %v1804_v37  ;;  %v1940_v37 = vpop.f32.mrf.mxu2  ;;  %v6743_v59 = vld [vmem:[#allocation5 + $0x10] sm:$0xff] }
 0x207   : > { %v2128_v19 = vpop.permute.xlu2 %2127  ;;  %v6756_v50 = vpop.f32.mrf.mxu3 }
 0x208   : > { %1828 = vst [vmem:[%s5991_s0 + $0x4b8] sm:$0xff] %v1824_v45  ;;  %v2142_v16 = vadd.f32 %v2128_v19, %v2122_v28  ;;  %v2151_v28 = vadd.f32 %v6486_v12, %v1940_v37  ;;  %v6749_v45 = vpop.f32.mrf.mxu0  ;;  %v638_v23 = vpop.permute.xlu0 %637  ;;  %4603 = vmatmul.msk.f32.gmra.mxu1 %vm381_vm0, %v6743_v59  ;;  %v2830_v37 = vld [vmem:[%s5691_s18 + $0x740] sm:$0xff] }
 0x209   : > { %2850 = vmatpush.msra.mxu0 %v2830_v37 }
 0x20a   : > { %2146 = vst [vmem:[%s5991_s0 + $0xc8] sm:$0xff] %v2142_v16 }
 0x20b   : > { %5001 = vset.pattern.permute.xlu1 %v5432_v22  ;;  %5000 = vset.pattern.permute.xlu2 %v5432_v22  ;;  %v626_v22 = vadd.f32 %v6436_v49, %v5979_v34  ;;  %v6739_v34 = vld [vmem:[%s5709_s14 + $0x10] sm:$0xff] }
 0x20c   : > { %2591 = vperm.xlu1 %5001, %v6691_v21   ;;  %2587 = vperm.xlu2 %5000, %v6703_v10  }
 0x20d   : > { %v650_v42 = vadd.f32 %v633_v57, %v626_v22  ;;  %4599 = vmatmul.msk.f32.gmra.mxu0 %vm381_vm0, %v6743_v59  ;;  %2707 = vperm.xlu0 %5013, %v6739_v34  }
 0x20e   : > { %v2104_v35 = vpop.permute.xlu1 %2103  ;;  %v6770_v7 = vpop.f32.mrf.mxu2  ;;  %4607 = vmatmul.msk.f32.gmra.mxu2 %vm381_vm0, %v6743_v59 }
 0x20f   : > { %v2115_v8 = vadd.f32 %v2104_v35, %v2095_v15  ;;  %v2140_v17 = vpop.permute.xlu2 %2139  ;;  %654 = vst [vmem:[%s5991_s0] sm:$0xff] %v650_v42  ;;  %v651_v15 = vadd.f32 %v638_v23, %v627_v63  ;;  %v2349_v35 = vld [vmem:[%s5691_s18 + $0x738] sm:$0xff]  ;;  %v2822_v23 = vld [vmem:[%s5691_s18 + $0x540] sm:$0xff] }
 0x210   : > { %v2145_v53 = vadd.f32 %v2140_v17, %v2125_v2  ;;  %v1998_v11 = vpop.f32.mrf.mxu0  ;;  %2565 = vmatpush.msrb.mxu3 %v2349_v35  ;;  %v1972_v17 = vpop.f32.mrf.mxu3  ;;  %4604 = vmatmul.msk.f32.gmra.mxu1 %vm381_vm0, %v6765_v46 }
 0x211   : > { %2119 = vst [vmem:[%s5991_s0 + $0x2c0] sm:$0xff] %v2115_v8  ;;  %v660_v8 = vadd.f32 %v6459_v9, %v6022_v61  ;;  %v2333_v61 = vld [vmem:[%s5691_s18 + $0x338] sm:$0xff]  ;;  %v2180_v42 = vadd.f32 %v6459_v9, %v1972_v17  ;;  %2851 = vmatpush.msra.mxu0 %v2822_v23 }
 0x212   : > { %2149 = vst [vmem:[%s5991_s0 + $0x6c8] sm:$0xff] %v2145_v53  ;;  %v2150_v53 = vadd.f32 %v6436_v49, %v6713_v32  ;;  %2566 = vmatpush.msrb.mxu3 %v2341_v0 }
 0x213   : > { %655 = vst [vmem:[%s5991_s0 + $0x200] sm:$0xff] %v651_v15 }
 0x214   : > { %5003 = vset.pattern.permute.xlu1 %v5434_v44  ;;  %2595 = vperm.xlu2 %5000, %v6739_v34  }
 0x215   : > { %2615 = vperm.xlu1 %5003, %v6703_v10   ;;  %4600 = vmatmul.msk.f32.gmra.mxu0 %vm381_vm0, %v6765_v46 }
 0x216   : > { %v2112_v47 = vpop.permute.xlu1 %2111  ;;  %2567 = vmatpush.msrb.mxu3 %v2333_v61  ;;  %4608 = vmatmul.msk.f32.gmra.mxu2 %vm381_vm0, %v6765_v46  ;;  %v2179_v61 = vadd.f32 %v6486_v12, %v6756_v50  ;;  %v771_v50 = vadd.f32 %v6486_v12, %v6090_v60 }
 0x217   : > { %v2117_v3 = vadd.f32 %v2112_v47, %v2097_v38  ;;  %v672_v38 = vpop.permute.xlu0 %671 }
 0x218   : > { %v2160_v19 = vpop.permute.xlu2 %2159  ;;  %v680_v57 = vadd.f32 %v672_v38, %v660_v8  ;;  %v2207_v8 = vadd.f32 %v6486_v12, %v1998_v11 }
 0x219   : > { %2121 = vst [vmem:[%s5991_s0 + $0x6c0] sm:$0xff] %v2117_v3  ;;  %v2171_v16 = vadd.f32 %v2160_v19, %v2151_v28  ;;  %v1946_v28 = vpop.f32.mrf.mxu2  ;;  %v689_v3 = vadd.f32 %v6475_v20, %v6063_v36  ;;  %v6799_v19 = vpop.f32.mrf.mxu1  ;;  %v2814_v36 = vld [vmem:[%s5691_s18 + $0x340] sm:$0xff] }
 0x21a   : > { %684 = vst [vmem:[%s5991_s0 + $0x408] sm:$0xff] %v680_v57  ;;  %v2153_v15 = vadd.f32 %v6475_v20, %v1946_v28  ;;  %2852 = vmatpush.msra.mxu0 %v2814_v36 }
 0x21b   : > { %2175 = vst [vmem:[%s5991_s0 + $0x2d0] sm:$0xff] %v2171_v16 }
 0x21c   : > { %5004 = vset.pattern.permute.xlu2 %v5434_v44  ;;  %v2325_v44 = vld [vmem:[%s5691_s18 + $0x138] sm:$0xff] }
 0x21d   : > { %2623 = vperm.xlu1 %5003, %v6739_v34   ;;  %2619 = vperm.xlu2 %5004, %v6691_v21  }
 0x21e   : > { %2568 = vmatpush.msrb.mxu3 %v2325_v44 }
 0x21f   : > { %v2136_v25 = vpop.permute.xlu1 %2135  ;;  %4609 = vmatmul.msk.f32.vlgmr.msrb.gmra.mxu3 %vm381_vm0, %v6695_v58 }
 0x220   : > { %v2144_v2 = vadd.f32 %v2136_v25, %v2124_v24  ;;  %v6806_v24 = vpop.f32.mrf.mxu0  ;;  %v704_v25 = vpop.permute.xlu0 %703 }
 0x221   : > { %v2184_v14 = vpop.permute.xlu2 %2183  ;;  %v6819_v17 = vpop.f32.mrf.mxu2 }
 0x222   : > { %2148 = vst [vmem:[%s5991_s0 + $0x4c8] sm:$0xff] %v2144_v2  ;;  %v2198_v22 = vadd.f32 %v2184_v14, %v2178_v41  ;;  %v709_v41 = vadd.f32 %v704_v25, %v689_v3  ;;  %v2806_v2 = vld [vmem:[%s5691_s18 + $0x140] sm:$0xff]  ;;  %v5437_v14 = vmov 37   ;;  %v800_v25 = vadd.f32 %v6459_v9, %v6122_v4  ;;  %v2824_v4 = vld [vmem:[%s5691_s18 + $0x550] sm:$0xff] }
 0x223   : > { %5016 = vset.pattern.permute.xlu0 %v5437_v14  ;;  %2853 = vmatpush.msra.mxu0 %v2806_v2 }
 0x224   : > { %2202 = vst [vmem:[%s5991_s0 + $0xd8] sm:$0xff] %v2198_v22  ;;  %2739 = vperm.xlu0 %5016, %v6670_v48   ;;  %4613 = vmatmul.msk.f32.vlgmr.msra.gmra.mxu0 %vm381_vm0, %v6695_v58 }
 0x225   : > { %5006 = vset.pattern.permute.xlu1 %v5433_v31  ;;  %2627 = vperm.xlu2 %5004, %v6670_v48   ;;  %713 = vst [vmem:[%s5991_s0 + $0x610] sm:$0xff] %v709_v41 }
 0x226   : > { %2647 = vperm.xlu1 %5006, %v6691_v21  }
 0x227   : > { %4610 = vmatmul.msk.f32.gmra.mxu3 %vm381_vm0, %v6722_v5 }
 0x228   : > { %v2156_v32 = vpop.permute.xlu1 %2155  ;;  %v2004_v38 = vpop.f32.mrf.mxu0 }
 0x229   : > { %v2170_v47 = vadd.f32 %v2156_v32, %v2150_v53  ;;  %v2192_v63 = vpop.permute.xlu2 %2191  ;;  %v6829_v53 = vpop.f32.mrf.mxu1  ;;  %v2209_v44 = vadd.f32 %v6475_v20, %v2004_v38  ;;  %v2807_v38 = vld [vmem:[%s5691_s18 + $0x148] sm:$0xff] }
 0x22a   : > { %v2200_v16 = vadd.f32 %v2192_v63, %v2180_v42  ;;  %v748_v57 = vpop.permute.xlu0 %747  ;;  %v6846_v37 = vpop.f32.mrf.mxu2  ;;  %v2831_v63 = vld [vmem:[%s5691_s18 + $0x748] sm:$0xff] }
 0x22b   : > { %2174 = vst [vmem:[%s5991_s0 + $0xd0] sm:$0xff] %v2170_v47  ;;  %2879 = vmatpush.msra.mxu1 %v2831_v63  ;;  %v2817_v63 = vld [vmem:[%s5691_s18 + $0x358] sm:$0xff] }
 0x22c   : > { %2204 = vst [vmem:[%s5991_s0 + $0x4d8] sm:$0xff] %v2200_v16  ;;  %4614 = vmatmul.msk.f32.gmra.mxu0 %vm381_vm0, %v6722_v5  ;;  %v2206_v16 = vadd.f32 %v6436_v49, %v6749_v45  ;;  %v2823_v45 = vld [vmem:[%s5691_s18 + $0x548] sm:$0xff] }
 0x22d   : > { %5007 = vset.pattern.permute.xlu2 %v5433_v31  ;;  %v742_v31 = vadd.f32 %v6436_v49, %v6067_v40  ;;  %2880 = vmatpush.msra.mxu1 %v2823_v45 }
 0x22e   : > { %2655 = vperm.xlu1 %5006, %v6670_v48   ;;  %2651 = vperm.xlu2 %5007, %v6739_v34  }
 0x22f   : > { %v762_v40 = vadd.f32 %v748_v57, %v742_v31  ;;  %4611 = vmatmul.msk.f32.gmra.mxu3 %vm381_vm0, %v6743_v59  ;;  %v2815_v31 = vld [vmem:[%s5691_s18 + $0x348] sm:$0xff]  ;;  %v2816_v57 = vld [vmem:[%s5691_s18 + $0x350] sm:$0xff] }
 0x230   : > { %v2168_v35 = vpop.permute.xlu1 %2167  ;;  %2881 = vmatpush.msra.mxu1 %v2815_v31  ;;  %v5440_v31 = vmov 40  }
 0x231   : > { %v2173_v22 = vadd.f32 %v2168_v35, %v2153_v15  ;;  %766 = vst [vmem:[%s5991_s0 + $0x20] sm:$0xff] %v762_v40  ;;  %v2030_v28 = vpop.f32.mrf.mxu1  ;;  %v2262_v40 = vadd.f32 %v6436_v49, %v6819_v17 }
 0x232   : > { %v2216_v11 = vpop.permute.xlu2 %2215  ;;  %v780_v3 = vpop.permute.xlu0 %779  ;;  %v2236_v60 = vadd.f32 %v6459_v9, %v2030_v28  ;;  %2882 = vmatpush.msra.mxu1 %v2807_v38 }
 0x233   : > { %2177 = vst [vmem:[%s5991_s0 + $0x6d0] sm:$0xff] %v2173_v22  ;;  %v2227_v0 = vadd.f32 %v2216_v11, %v2207_v8  ;;  %v791_v23 = vadd.f32 %v780_v3, %v771_v50  ;;  %v6866_v35 = vpop.f32.mrf.mxu2  ;;  %v2832_v8 = vld [vmem:[%s5691_s18 + $0x750] sm:$0xff]  ;;  %v6869_v22 = vpop.f32.mrf.mxu3  ;;  %v2208_v11 = vadd.f32 %v6459_v9, %v6806_v24  ;;  %4617 = vmatmul.msk.f32.vlgmr.msra.gmra.mxu1 %vm381_vm0, %v6695_v58  ;;  %v2825_v3 = vld [vmem:[%s5691_s18 + $0x558] sm:$0xff] }
 0x234   : > { %4615 = vmatmul.msk.f32.gmra.mxu0 %vm381_vm0, %v6743_v59  ;;  %2908 = vmatpush.msra.mxu2 %v2832_v8  ;;  %v2808_v24 = vld [vmem:[%s5691_s18 + $0x150] sm:$0xff]  ;;  %v5439_v8 = vmov 38  }
 0x235   : > { %2231 = vst [vmem:[%s5991_s0 + $0x2e0] sm:$0xff] %v2227_v0 }
 0x236   : > { %5010 = vset.pattern.permute.xlu1 %v5435_v1  ;;  %5008 = vset.pattern.permute.xlu2 %v5435_v1  ;;  %795 = vst [vmem:[%s5991_s0 + $0x228] sm:$0xff] %v791_v23  ;;  %v6914_v23 = vld [vmem:[%s5702_s28] sm:$0xff] }
 0x237   : > { %2679 = vperm.xlu1 %5010, %v6739_v34   ;;  %2671 = vperm.xlu2 %5008, %v6703_v10  }
 0x238   : > { %4612 = vmatmul.msk.f32.gmra.mxu3 %vm381_vm0, %v6765_v46  ;;  %2909 = vmatpush.msra.mxu2 %v2824_v4  ;;  %v6933_v4 = vld [vmem:[%s5702_s28 + $0x8] sm:$0xff] }
 0x239   : > { %v2188_v42 = vpop.permute.xlu1 %2187 }
 0x23a   : > { %v2199_v32 = vadd.f32 %v2188_v42, %v2179_v61  ;;  %v2224_v1 = vpop.permute.xlu2 %2223  ;;  %v812_v0 = vpop.permute.xlu0 %811  ;;  %2910 = vmatpush.msra.mxu2 %v2816_v57  ;;  %v5438_v42 = vmov 39  }
 0x23b   : > { %v2229_v47 = vadd.f32 %v2224_v1, %v2209_v44  ;;  %v820_v61 = vadd.f32 %v812_v0, %v800_v25  ;;  %5019 = vset.pattern.permute.xlu0 %v5438_v42  ;;  %v2062_v50 = vpop.f32.mrf.mxu2  ;;  %4618 = vmatmul.msk.f32.gmra.mxu1 %vm381_vm0, %v6722_v5 }
 0x23c   : > { %2203 = vst [vmem:[%s5991_s0 + $0x2d8] sm:$0xff] %v2199_v32  ;;  %4616 = vmatmul.msk.f32.gmra.mxu0 %vm381_vm0, %v6765_v46  ;;  %2911 = vmatpush.msra.mxu2 %v2808_v24  ;;  %v2833_v32 = vld [vmem:[%s5691_s18 + $0x758] sm:$0xff] }
 0x23d   : > { %2233 = vst [vmem:[%s5991_s0 + $0x6e0] sm:$0xff] %v2229_v47  ;;  %2783 = vperm.xlu0 %5019, %v6703_v10   ;;  %4621 = vmatmul.msk.f32.vlgmr.msra.gmra.mxu2 %vm381_vm0, %v6695_v58  ;;  %v6901_v47 = vpop.f32.mrf.mxu3 }
 0x23e   : > { %824 = vst [vmem:[%s5991_s0 + $0x430] sm:$0xff] %v820_v61  ;;  %2937 = vmatpush.msra.mxu3 %v2833_v32  ;;  %v1175_v61 = vadd.f32 %v6933_v4, %v6179_v13 }
 0x23f   : > { %5011 = vset.pattern.permute.xlu1 %v5436_v33  ;;  %2683 = vperm.xlu2 %5008, %v6670_v48  }
 0x240   : > { %2699 = vperm.xlu1 %5011, %v6703_v10   ;;  %2938 = vmatpush.msra.mxu3 %v2825_v3 }
 0x242   : > { %v2212_v15 = vpop.permute.xlu1 %2211  ;;  %v844_v1 = vpop.permute.xlu0 %843  ;;  %2939 = vmatpush.msra.mxu3 %v2817_v63 }
 0x243   : > { %v2226_v36 = vadd.f32 %v2212_v15, %v2206_v16  ;;  %v2248_v41 = vpop.permute.xlu2 %2247  ;;  %v2265_v16 = vadd.f32 %v6475_v20, %v2062_v50  ;;  %v2033_v15 = vpop.f32.mrf.mxu1  ;;  %4619 = vmatmul.msk.f32.gmra.mxu1 %vm381_vm0, %v6743_v59 }
 0x244   : > { %v2256_v2 = vadd.f32 %v2248_v41, %v2236_v60  ;;  %v6924_v41 = vld [vmem:[%s5702_s28 + $0x18] sm:$0xff] }
 0x245   : > { %2230 = vst [vmem:[%s5991_s0 + $0xe0] sm:$0xff] %v2226_v36  ;;  %v2367_v36 = vpop.f32.mrf.mxu0  ;;  %4622 = vmatmul.msk.f32.gmra.mxu2 %vm381_vm0, %v6722_v5  ;;  %5023 = vset.pattern.permute.xlu0 %v5440_v31 }
 0x246   : > { %2260 = vst [vmem:[%s5991_s0 + $0x4e8] sm:$0xff] %v2256_v2  ;;  %3079 = vperm.xlu0 %5023, %v6691_v21  }
 0x247   : > { %5012 = vset.pattern.permute.xlu2 %v5436_v33  ;;  %v829_v33 = vadd.f32 %v6475_v20, %v6198_v30  ;;  %v2235_v30 = vadd.f32 %v6486_v12, %v6829_v53  ;;  %v2809_v53 = vld [vmem:[%s5691_s18 + $0x158] sm:$0xff] }
 0x248   : > { %2711 = vperm.xlu1 %5011, %v6670_v48   ;;  %2703 = vperm.xlu2 %5012, %v6691_v21  }
 0x249   : > { %v849_v28 = vadd.f32 %v844_v1, %v829_v33  ;;  %2940 = vmatpush.msra.mxu3 %v2809_v53  ;;  %v2582_v1 = vadd.f32 %v6914_v23, %v2367_v36 }
 0x24a   : > { %v2220_v9 = vpop.permute.xlu1 %2219  ;;  %4625 = vmatmul.msk.f32.vlgmr.msra.gmra.mxu3 %vm381_vm0, %v6695_v58  ;;  %v1152_v25 = vpop.permute.xlu0 %1151 }
 0x24b   : > { %v2228_v44 = vadd.f32 %v2220_v9, %v2208_v11  ;;  %853 = vst [vmem:[%s5991_s0 + $0x638] sm:$0xff] %v849_v28  ;;  %v2085_v11 = vpop.f32.mrf.mxu3  ;;  %4620 = vmatmul.msk.f32.gmra.mxu1 %vm381_vm0, %v6765_v46 }
 0x24c   : > { %v2268_v49 = vpop.permute.xlu2 %2267  ;;  %v2291_v38 = vadd.f32 %v6933_v4, %v2085_v11 }
 0x24d   : > { %2232 = vst [vmem:[%s5991_s0 + $0x4e0] sm:$0xff] %v2228_v44  ;;  %v2282_v17 = vadd.f32 %v2268_v49, %v2262_v40  ;;  %v6941_v40 = vpop.f32.mrf.mxu1  ;;  %4623 = vmatmul.msk.f32.gmra.mxu2 %vm381_vm0, %v6743_v59  ;;  %v6946_v44 = vpop.f32.mrf.mxu0 }
 0x24f   : > { %2286 = vst [vmem:[%s5991_s0 + $0xf0] sm:$0xff] %v2282_v17  ;;  %v6951_v17 = vld [vmem:[%s5702_s28 + $0x10] sm:$0xff] }
 0x250   : > { %5015 = vset.pattern.permute.xlu1 %v5437_v14  ;;  %5014 = vset.pattern.permute.xlu2 %v5437_v14  ;;  %v1146_v14 = vadd.f32 %v6914_v23, %v6149_v51  ;;  %v2237_v51 = vadd.f32 %v6924_v41, %v2033_v15  ;;  %v2264_v13 = vadd.f32 %v6951_v17, %v6866_v35  ;;  %v5441_v35 = vmov 41  }
 0x251   : > { %2731 = vperm.xlu1 %5015, %v6691_v21   ;;  %2727 = vperm.xlu2 %5014, %v6703_v10   ;;  %v1204_v32 = vadd.f32 %v6951_v17, %v6288_v27  ;;  %v1233_v15 = vadd.f32 %v6924_v41, %v6370_v55 }
 0x252   : > { %v1166_v2 = vadd.f32 %v1152_v25, %v1146_v14  ;;  %4626 = vmatmul.msk.f32.gmra.mxu3 %vm381_vm0, %v6722_v5  ;;  %v1184_v33 = vpop.permute.xlu0 %1183  ;;  %5027 = vset.pattern.permute.xlu0 %v5441_v35  ;;  %v2290_v14 = vadd.f32 %v6914_v23, %v6901_v47  ;;  %v2826_v47 = vld [vmem:[%s5691_s18 + $0x560] sm:$0xff] }
 0x253   : > { %v2244_v12 = vpop.permute.xlu1 %2243  ;;  %v1195_v49 = vadd.f32 %v1184_v33, %v1175_v61  ;;  %3111 = vperm.xlu0 %5027, %v6739_v34   ;;  %v2827_v61 = vld [vmem:[%s5691_s18 + $0x568] sm:$0xff]  ;;  %v2810_v33 = vld [vmem:[%s5691_s18 + $0x160] sm:$0xff] }
 0x254   : > { %v2255_v60 = vadd.f32 %v2244_v12, %v2235_v30  ;;  %v2280_v45 = vpop.permute.xlu2 %2279  ;;  %1170 = vst [vmem:[%s5991_s0 + $0x48] sm:$0xff] %v1166_v2  ;;  %v6964_v30 = vpop.f32.mrf.mxu3 }
 0x255   : > { %v2285_v20 = vadd.f32 %v2280_v45, %v2265_v16  ;;  %1199 = vst [vmem:[%s5991_s0 + $0x250] sm:$0xff] %v1195_v49  ;;  %v2399_v3 = vpop.f32.mrf.mxu1  ;;  %4624 = vmatmul.msk.f32.gmra.mxu2 %vm381_vm0, %v6765_v46  ;;  %v2373_v53 = vpop.f32.mrf.mxu0  ;;  %v2811_v49 = vld [vmem:[%s5691_s18 + $0x168] sm:$0xff] }
 0x256   : > { %2259 = vst [vmem:[%s5991_s0 + $0x2e8] sm:$0xff] %v2255_v60  ;;  %v2834_v60 = vld [vmem:[%s5691_s18 + $0x760] sm:$0xff]  ;;  %v2584_v45 = vadd.f32 %v6951_v17, %v2373_v53  ;;  %v6986_v2 = vpop.f32.mrf.mxu2  ;;  %v2583_v53 = vadd.f32 %v6933_v4, %v6946_v44 }
 0x257   : > { %2289 = vst [vmem:[%s5991_s0 + $0x6f0] sm:$0xff] %v2285_v20  ;;  %2966 = vmatpush.msrb.mxu0 %v2834_v60  ;;  %v2835_v20 = vld [vmem:[%s5691_s18 + $0x768] sm:$0xff] }
 0x258   : > { %2995 = vmatpush.msrb.mxu1 %v2835_v20 }
 0x259   : > { %5017 = vset.pattern.permute.xlu1 %v5439_v8  ;;  %2735 = vperm.xlu2 %5014, %v6739_v34  }
 0x25a   : > { %2755 = vperm.xlu1 %5017, %v6703_v10   ;;  %4627 = vmatmul.msk.f32.gmra.mxu3 %vm381_vm0, %v6743_v59  ;;  %v1216_v63 = vpop.permute.xlu0 %1215 }
 0x25b   : > { %v2252_v0 = vpop.permute.xlu1 %2251  ;;  %v1224_v12 = vadd.f32 %v1216_v63, %v1204_v32  ;;  %2967 = vmatpush.msrb.mxu0 %v2826_v47  ;;  %2996 = vmatpush.msrb.mxu1 %v2827_v61  ;;  %v2836_v47 = vld [vmem:[%s5691_s18 + $0x770] sm:$0xff] }
 0x25c   : > { %v2257_v57 = vadd.f32 %v2252_v0, %v2237_v51  ;;  %v2091_v51 = vpop.f32.mrf.mxu3  ;;  %3024 = vmatpush.msrb.mxu2 %v2836_v47 }
 0x25d   : > { %v2300_v9 = vpop.permute.xlu2 %2299  ;;  %1228 = vst [vmem:[%s5991_s0 + $0x458] sm:$0xff] %v1224_v12  ;;  %v6991_v0 = vpop.f32.mrf.mxu1 }
 0x25e   : > { %2261 = vst [vmem:[%s5991_s0 + $0x6e8] sm:$0xff] %v2257_v57  ;;  %v2311_v24 = vadd.f32 %v2300_v9, %v2291_v38  ;;  %v2818_v57 = vld [vmem:[%s5691_s18 + $0x360] sm:$0xff]  ;;  %v2293_v9 = vadd.f32 %v6924_v41, %v2091_v51  ;;  %v2828_v51 = vld [vmem:[%s5691_s18 + $0x570] sm:$0xff] }
 0x25f   : > { %2968 = vmatpush.msrb.mxu0 %v2818_v57  ;;  %3025 = vmatpush.msrb.mxu2 %v2828_v51 }
 0x260   : > { %2315 = vst [vmem:[%s5991_s0 + $0x2f8] sm:$0xff] %v2311_v24  ;;  %v2819_v24 = vld [vmem:[%s5691_s18 + $0x368] sm:$0xff] }
 0x261   : > { %5018 = vset.pattern.permute.xlu2 %v5439_v8  ;;  %2997 = vmatpush.msrb.mxu1 %v2819_v24 }
 0x262   : > { %2763 = vperm.xlu1 %5017, %v6739_v34   ;;  %2759 = vperm.xlu2 %5018, %v6691_v21   ;;  %v1248_v55 = vpop.permute.xlu0 %1247 }
 0x263   : > { %4628 = vmatmul.msk.f32.gmra.mxu3 %vm381_vm0, %v6765_v46  ;;  %v1253_v38 = vadd.f32 %v1248_v55, %v1233_v15  ;;  %2969 = vmatpush.msrb.mxu0 %v2810_v33  ;;  %v1608_v55 = vadd.f32 %v6951_v17, %v6439_v54 }
 0x264   : > { %v2276_v50 = vpop.permute.xlu1 %2275  ;;  %4629 = vmatmul.msk.f32.vlgmr.msrb.gmra.mxu0 %vm381_vm0, %v6695_v58  ;;  %2998 = vmatpush.msrb.mxu1 %v2811_v49 }
 0x265   : > { %v2284_v28 = vadd.f32 %v2276_v50, %v2264_v13  ;;  %1257 = vst [vmem:[%s5991_s0 + $0x660] sm:$0xff] %v1253_v38  ;;  %v1286_v13 = vadd.f32 %v6914_v23, %v6307_v56  ;;  %v2611_v50 = vadd.f32 %v6933_v4, %v2399_v3  ;;  %4633 = vmatmul.msk.f32.vlgmr.msrb.gmra.mxu1 %vm381_vm0, %v6695_v58  ;;  %v2405_v12 = vpop.f32.mrf.mxu1  ;;  %v2812_v38 = vld [vmem:[%s5691_s18 + $0x170] sm:$0xff] }
 0x266   : > { %v2588_v27 = vpop.permute.xlu2 %2587  ;;  %v2613_v60 = vadd.f32 %v6924_v41, %v2405_v12  ;;  %v5443_v12 = vmov 44  }
 0x267   : > { %2288 = vst [vmem:[%s5991_s0 + $0x4f0] sm:$0xff] %v2284_v28  ;;  %v2602_v16 = vadd.f32 %v2588_v27, %v2582_v1  ;;  %v5442_v1 = vmov 42  }
 0x268   : > { %5030 = vset.pattern.permute.xlu0 %v5442_v1 }
 0x269   : > { %2606 = vst [vmem:[%s5991_s0 + $0x100] sm:$0xff] %v2602_v16  ;;  %3143 = vperm.xlu0 %5030, %v6670_v48   ;;  %v7016_v16 = vpop.f32.mrf.mxu2 }
 0x26a   : > { %5020 = vset.pattern.permute.xlu1 %v5438_v42  ;;  %2767 = vperm.xlu2 %5018, %v6670_v48   ;;  %v1292_v56 = vpop.permute.xlu0 %1291 }
 0x26b   : > { %2787 = vperm.xlu1 %5020, %v6691_v21   ;;  %v1306_v27 = vadd.f32 %v1292_v56, %v1286_v13  ;;  %v2837_v13 = vld [vmem:[%s5691_s18 + $0x778] sm:$0xff] }
 0x26c   : > { %4630 = vmatmul.msk.f32.gmra.mxu0 %vm381_vm0, %v6722_v5  ;;  %3053 = vmatpush.msrb.mxu3 %v2837_v13  ;;  %v2829_v56 = vld [vmem:[%s5691_s18 + $0x578] sm:$0xff] }
 0x26d   : > { %v2296_v36 = vpop.permute.xlu1 %2295  ;;  %1310 = vst [vmem:[%s5991_s0 + $0x70] sm:$0xff] %v1306_v27  ;;  %4634 = vmatmul.msk.f32.gmra.mxu1 %vm381_vm0, %v6722_v5 }
 0x26e   : > { %v2310_v25 = vadd.f32 %v2296_v36, %v2290_v14  ;;  %v2596_v8 = vpop.permute.xlu2 %2595  ;;  %v1315_v14 = vadd.f32 %v6933_v4, %v6346_v39  ;;  %3054 = vmatpush.msrb.mxu3 %v2829_v56 }
 0x26f   : > { %v2604_v11 = vadd.f32 %v2596_v8, %v2584_v45  ;;  %v2820_v8 = vld [vmem:[%s5691_s18 + $0x370] sm:$0xff] }
 0x270   : > { %2314 = vst [vmem:[%s5991_s0 + $0xf8] sm:$0xff] %v2310_v25  ;;  %3026 = vmatpush.msrb.mxu2 %v2820_v8  ;;  %v3310_v8 = vld [vmem:[%s5691_s18 + $0x580] sm:$0xff] }
 0x271   : > { %2608 = vst [vmem:[%s5991_s0 + $0x500] sm:$0xff] %v2604_v11  ;;  %v2431_v25 = vpop.f32.mrf.mxu2  ;;  %v2610_v11 = vadd.f32 %v6914_v23, %v6941_v40  ;;  %5033 = vset.pattern.permute.xlu0 %v5443_v12 }
 0x272   : > { %5021 = vset.pattern.permute.xlu2 %v5438_v42  ;;  %v7008_v42 = vpop.f32.mrf.mxu3  ;;  %v1324_v39 = vpop.permute.xlu0 %1323  ;;  %v2640_v61 = vadd.f32 %v6951_v17, %v2431_v25  ;;  %3027 = vmatpush.msrb.mxu2 %v2812_v38  ;;  %v3294_v38 = vld [vmem:[%s5691_s18 + $0x180] sm:$0xff] }
 0x273   : > { %2795 = vperm.xlu1 %5020, %v6670_v48   ;;  %2791 = vperm.xlu2 %5021, %v6739_v34  }
 0x274   : > { %4631 = vmatmul.msk.f32.gmra.mxu0 %vm381_vm0, %v6743_v59  ;;  %4637 = vmatmul.msk.f32.vlgmr.msrb.gmra.mxu2 %vm381_vm0, %v6695_v58 }
 0x275   : > { %v2308_v32 = vpop.permute.xlu1 %2307  ;;  %4635 = vmatmul.msk.f32.gmra.mxu1 %vm381_vm0, %v6743_v59  ;;  %3187 = vperm.xlu0 %5033, %v6703_v10  }
 0x276   : > { %v2313_v28 = vadd.f32 %v2308_v32, %v2293_v9  ;;  %v7060_v32 = vpop.f32.mrf.mxu0 }
 0x277   : > { %v2620_v3 = vpop.permute.xlu2 %2619 }
 0x278   : > { %2317 = vst [vmem:[%s5991_s0 + $0x6f8] sm:$0xff] %v2313_v28  ;;  %v2631_v63 = vadd.f32 %v2620_v3, %v2611_v50  ;;  %v1637_v50 = vadd.f32 %v6924_v41, %v6533_v6  ;;  %v2612_v28 = vadd.f32 %v6951_v17, %v6991_v0  ;;  %v2821_v3 = vld [vmem:[%s5691_s18 + $0x378] sm:$0xff]  ;;  %v2666_v6 = vadd.f32 %v6914_v23, %v7008_v42 }
 0x279   : > { %3055 = vmatpush.msrb.mxu3 %v2821_v3  ;;  %v2434_v47 = vpop.f32.mrf.mxu2 }
 0x27a   : > { %2635 = vst [vmem:[%s5991_s0 + $0x308] sm:$0xff] %v2631_v63  ;;  %v7033_v36 = vpop.f32.mrf.mxu3  ;;  %v1620_v40 = vpop.permute.xlu0 %1619 }
 0x27b   : > { %5024 = vset.pattern.permute.xlu1 %v5440_v31  ;;  %5022 = vset.pattern.permute.xlu2 %v5440_v31  ;;  %v1335_v31 = vadd.f32 %v1324_v39, %v1315_v14  ;;  %v1628_v9 = vadd.f32 %v1620_v40, %v1608_v55  ;;  %v1690_v14 = vadd.f32 %v6914_v23, %v6466_v29 }
 0x27c   : > { %3083 = vperm.xlu1 %5024, %v6739_v34   ;;  %3075 = vperm.xlu2 %5022, %v6703_v10   ;;  %v2641_v55 = vadd.f32 %v6924_v41, %v2434_v47 }
 0x27d   : > { %1339 = vst [vmem:[%s5991_s0 + $0x278] sm:$0xff] %v1335_v31  ;;  %4632 = vmatmul.msk.f32.gmra.mxu0 %vm381_vm0, %v6765_v46  ;;  %4636 = vmatmul.msk.f32.gmra.mxu1 %vm381_vm0, %v6765_v46  ;;  %v3318_v31 = vld [vmem:[%s5691_s18 + $0x780] sm:$0xff] }
 0x27e   : > { %v2592_v44 = vpop.permute.xlu1 %2591  ;;  %1632 = vst [vmem:[%s5991_s0 + $0x480] sm:$0xff] %v1628_v9  ;;  %4638 = vmatmul.msk.f32.gmra.mxu2 %vm381_vm0, %v6722_v5  ;;  %3338 = vmatpush.msra.mxu0 %v3318_v31  ;;  %v5445_v9 = vmov 45  }
 0x27f   : > { %v2603_v15 = vadd.f32 %v2592_v44, %v2583_v53  ;;  %v2628_v45 = vpop.permute.xlu2 %2627  ;;  %v2639_v44 = vadd.f32 %v6933_v4, %v7016_v16  ;;  %5037 = vset.pattern.permute.xlu0 %v5445_v9 }
 0x280   : > { %v2633_v20 = vadd.f32 %v2628_v45, %v2613_v60  ;;  %3339 = vmatpush.msra.mxu0 %v3310_v8  ;;  %3219 = vperm.xlu0 %5037, %v6691_v21   ;;  %v3295_v8 = vld [vmem:[%s5691_s18 + $0x188] sm:$0xff] }
 0x281   : > { %2607 = vst [vmem:[%s5991_s0 + $0x300] sm:$0xff] %v2603_v15  ;;  %v7094_v15 = vpop.f32.mrf.mxu0 }
 0x282   : > { %2637 = vst [vmem:[%s5991_s0 + $0x708] sm:$0xff] %v2633_v20  ;;  %v7057_v49 = vpop.f32.mrf.mxu3  ;;  %v1652_v0 = vpop.permute.xlu0 %1651 }
 0x283   : > { %v1657_v63 = vadd.f32 %v1652_v0, %v1637_v50 }
 0x284   : > { %5025 = vset.pattern.permute.xlu1 %v5441_v35  ;;  %3087 = vperm.xlu2 %5022, %v6670_v48  }
 0x285   : > { %3103 = vperm.xlu1 %5025, %v6703_v10   ;;  %1661 = vst [vmem:[%s5991_s0 + $0x688] sm:$0xff] %v1657_v63  ;;  %v2694_v63 = vadd.f32 %v6914_v23, %v7094_v15 }
 0x286   : > { %4639 = vmatmul.msk.f32.gmra.mxu2 %vm381_vm0, %v6743_v59 }
 0x287   : > { %v2616_v54 = vpop.permute.xlu1 %2615 }
 0x288   : > { %v2630_v57 = vadd.f32 %v2616_v54, %v2610_v11  ;;  %v2652_v24 = vpop.permute.xlu2 %2651  ;;  %v3302_v11 = vld [vmem:[%s5691_s18 + $0x380] sm:$0xff] }
 0x289   : > { %v2660_v33 = vadd.f32 %v2652_v24, %v2640_v61  ;;  %v5444_v61 = vmov 43   ;;  %3340 = vmatpush.msra.mxu0 %v3302_v11  ;;  %v2486_v54 = vpop.f32.mrf.mxu0 }
 0x28a   : > { %2634 = vst [vmem:[%s5991_s0 + $0x108] sm:$0xff] %v2630_v57  ;;  %v2463_v60 = vpop.f32.mrf.mxu3  ;;  %v1696_v39 = vpop.permute.xlu0 %1695  ;;  %v2695_v57 = vadd.f32 %v6933_v4, %v2486_v54 }
 0x28b   : > { %2664 = vst [vmem:[%s5991_s0 + $0x510] sm:$0xff] %v2660_v33  ;;  %v2669_v29 = vadd.f32 %v6924_v41, %v2463_v60  ;;  %v1710_v16 = vadd.f32 %v1696_v39, %v1690_v14  ;;  %3341 = vmatpush.msra.mxu0 %v3294_v38  ;;  %v7116_v33 = vpop.f32.mrf.mxu2  ;;  %v7155_v14 = vld [vmem:[%s5709_s14 + $0x18] sm:$0xff]  ;;  %v3304_v60 = vld [vmem:[%s5691_s18 + $0x390] sm:$0xff]  ;;  %v3311_v39 = vld [vmem:[%s5691_s18 + $0x588] sm:$0xff]  ;;  %v5447_v38 = vmov 47  }
 0x28c   : > { %5026 = vset.pattern.permute.xlu2 %v5441_v35  ;;  %v2813_v35 = vld [vmem:[%s5691_s18 + $0x178] sm:$0xff]  ;;  %4645 = vmatmul.msk.f32.vlgmr.msra.gmra.mxu0 %vm381_vm0, %v6695_v58 }
 0x28d   : > { %3115 = vperm.xlu1 %5025, %v6670_v48   ;;  %3107 = vperm.xlu2 %5026, %v6691_v21   ;;  %1714 = vst [vmem:[%s5991_s0 + $0x98] sm:$0xff] %v1710_v16 }
 0x28e   : > { %3056 = vmatpush.msrb.mxu3 %v2813_v35  ;;  %4640 = vmatmul.msk.f32.gmra.mxu2 %vm381_vm0, %v6765_v46  ;;  %v3312_v35 = vld [vmem:[%s5691_s18 + $0x590] sm:$0xff] }
 0x28f   : > { %v2624_v27 = vpop.permute.xlu1 %2623  ;;  %4641 = vmatmul.msk.f32.vlgmr.msrb.gmra.mxu3 %vm381_vm0, %v6695_v58 }
 0x290   : > { %v2632_v48 = vadd.f32 %v2624_v27, %v2612_v28  ;;  %v2668_v28 = vadd.f32 %v6951_v17, %v7057_v49  ;;  %v5446_v49 = vmov 46  }
 0x291   : > { %v2672_v42 = vpop.permute.xlu2 %2671  ;;  %v7134_v3 = vpop.f32.mrf.mxu0  ;;  %5041 = vset.pattern.permute.xlu0 %v5446_v49 }
 0x292   : > { %2636 = vst [vmem:[%s5991_s0 + $0x508] sm:$0xff] %v2632_v48  ;;  %v2686_v53 = vadd.f32 %v2672_v42, %v2666_v6  ;;  %3251 = vperm.xlu0 %5041, %v6739_v34   ;;  %v3320_v48 = vld [vmem:[%s5691_s18 + $0x790] sm:$0xff]  ;;  %v3319_v42 = vld [vmem:[%s5691_s18 + $0x788] sm:$0xff] }
 0x293   : > { %v2544_v27 = vpop.f32.mrf.mxu2  ;;  %3396 = vmatpush.msra.mxu2 %v3320_v48  ;;  %3367 = vmatpush.msra.mxu1 %v3319_v42  ;;  %v7220_v48 = vld [vmem:[#allocation5 + $0x10] sm:$0xff] }
 0x294   : > { %2690 = vst [vmem:[%s5991_s0 + $0x118] sm:$0xff] %v2686_v53  ;;  %4646 = vmatmul.msk.f32.gmra.mxu0 %vm381_vm0, %v6722_v5  ;;  %v7151_v53 = vld [vmem:[%s5709_s14 + $0x8] sm:$0xff]  ;;  %v2751_v11 = vadd.f32 %v6933_v4, %v2544_v27 }
 0x295   : > { %5029 = vset.pattern.permute.xlu1 %v5442_v1  ;;  %5028 = vset.pattern.permute.xlu2 %v5442_v1  ;;  %v2512_v1 = vpop.f32.mrf.mxu1 }
 0x296   : > { %3135 = vperm.xlu1 %5029, %v6691_v21   ;;  %3131 = vperm.xlu2 %5028, %v6703_v10   ;;  %v2722_v56 = vadd.f32 %v6914_v23, %v2512_v1  ;;  %v3303_v1 = vld [vmem:[%s5691_s18 + $0x388] sm:$0xff] }
 0x297   : > { %4642 = vmatmul.msk.f32.gmra.mxu3 %vm381_vm0, %v6722_v5  ;;  %3397 = vmatpush.msra.mxu2 %v3312_v35 }
 0x298   : > { %v2648_v45 = vpop.permute.xlu1 %2647  ;;  %3368 = vmatpush.msra.mxu1 %v3311_v39 }
 0x299   : > { %v2659_v20 = vadd.f32 %v2648_v45, %v2639_v44  ;;  %v2684_v25 = vpop.permute.xlu2 %2683  ;;  %v2492_v16 = vpop.f32.mrf.mxu0  ;;  %3398 = vmatpush.msra.mxu2 %v3304_v60  ;;  %v3305_v60 = vld [vmem:[%s5691_s18 + $0x398] sm:$0xff] }
 0x29a   : > { %v2689_v51 = vadd.f32 %v2684_v25, %v2669_v29  ;;  %v3296_v29 = vld [vmem:[%s5691_s18 + $0x190] sm:$0xff]  ;;  %3369 = vmatpush.msra.mxu1 %v3303_v1  ;;  %5044 = vset.pattern.permute.xlu0 %v5447_v38 }
 0x29b   : > { %2663 = vst [vmem:[%s5991_s0 + $0x310] sm:$0xff] %v2659_v20  ;;  %v7167_v25 = vpop.f32.mrf.mxu2  ;;  %3399 = vmatpush.msra.mxu2 %v3296_v29  ;;  %3283 = vperm.xlu0 %5044, %v7155_v14  }
 0x29c   : > { %2693 = vst [vmem:[%s5991_s0 + $0x718] sm:$0xff] %v2689_v51  ;;  %4647 = vmatmul.msk.f32.gmra.mxu0 %vm381_vm0, %v6743_v59  ;;  %v2697_v51 = vadd.f32 %v6924_v41, %v2492_v16  ;;  %3370 = vmatpush.msra.mxu1 %v3295_v8 }
 0x29d   : > { %v7124_v50 = vpop.f32.mrf.mxu1 }
 0x29e   : > { %5031 = vset.pattern.permute.xlu1 %v5444_v61  ;;  %3139 = vperm.xlu2 %5028, %v6739_v34  }
 0x29f   : > { %3159 = vperm.xlu1 %5031, %v6703_v10   ;;  %4643 = vmatmul.msk.f32.gmra.mxu3 %vm381_vm0, %v6743_v59  ;;  %v7169_v59 = vld [vmem:[#allocation5] sm:$0xff] }
 0x2a0   : > { %v2656_v40 = vpop.permute.xlu1 %2655  ;;  %4653 = vmatmul.msk.f32.vlgmr.msra.gmra.mxu2 %vm381_vm0, %v7169_v59  ;;  %4649 = vmatmul.msk.f32.vlgmr.msra.gmra.mxu1 %vm381_vm0, %v7169_v59 }
 0x2a1   : > { %v2661_v24 = vadd.f32 %v2656_v40, %v2641_v55  ;;  %v7184_v54 = vpop.f32.mrf.mxu0 }
 0x2a2   : > { %v2704_v10 = vpop.permute.xlu2 %2703  ;;  %v7164_v20 = vpop.f32.mrf.mxu3 }
 0x2a3   : > { %2665 = vst [vmem:[%s5991_s0 + $0x710] sm:$0xff] %v2661_v24  ;;  %v2715_v13 = vadd.f32 %v2704_v10, %v2695_v57  ;;  %v7194_v57 = vld [vmem:[#allocation5 + $0x8] sm:$0xff]  ;;  %v2550_v24 = vpop.f32.mrf.mxu2  ;;  %v1728_v10 = vpop.permute.xlu0 %1727 }
 0x2a4   : > { %4648 = vmatmul.msk.f32.gmra.mxu0 %vm381_vm0, %v6765_v46 }
 0x2a5   : > { %2719 = vst [vmem:[%s5991_s0 + $0x320] sm:$0xff] %v2715_v13  ;;  %v2518_v5 = vpop.f32.mrf.mxu1  ;;  %v2723_v13 = vadd.f32 %v6933_v4, %v7124_v50 }
 0x2a6   : > { %5032 = vset.pattern.permute.xlu2 %v5444_v61  ;;  %v2724_v44 = vadd.f32 %v6951_v17, %v2518_v5  ;;  %v3321_v5 = vld [vmem:[%s5691_s18 + $0x798] sm:$0xff] }
 0x2a7   : > { %3167 = vperm.xlu1 %5031, %v6739_v34   ;;  %3163 = vperm.xlu2 %5032, %v6691_v21  }
 0x2a8   : > { %4644 = vmatmul.msk.f32.gmra.mxu3 %vm381_vm0, %v6765_v46  ;;  %4654 = vmatmul.msk.f32.gmra.mxu2 %vm381_vm0, %v7194_v57 }
 0x2a9   : > { %v2680_v58 = vpop.permute.xlu1 %2679  ;;  %4650 = vmatmul.msk.f32.gmra.mxu1 %vm381_vm0, %v7194_v57  ;;  %3425 = vmatpush.msra.mxu3 %v3321_v5 }
 0x2aa   : > { %v2688_v6 = vadd.f32 %v2680_v58, %v2668_v28  ;;  %v7192_v40 = vpop.f32.mrf.mxu3  ;;  %v7203_v28 = vld [vmem:[%s5709_s14 + $0x10] sm:$0xff]  ;;  %v7208_v58 = vld [vmem:[%s5709_s14] sm:$0xff] }
 0x2ab   : > { %v2728_v21 = vpop.permute.xlu2 %2727 }
 0x2ac   : > { %2692 = vst [vmem:[%s5991_s0 + $0x518] sm:$0xff] %v2688_v6  ;;  %v2742_v0 = vadd.f32 %v2728_v21, %v2722_v56  ;;  %v2753_v56 = vadd.f32 %v6924_v41, %v2550_v24  ;;  %v1748_v6 = vadd.f32 %v6951_v17, %v6598_v52  ;;  %v3313_v52 = vld [vmem:[%s5691_s18 + $0x598] sm:$0xff] }
 0x2ad   : > { %3426 = vmatpush.msra.mxu3 %v3313_v52 }
 0x2ae   : > { %2746 = vst [vmem:[%s5991_s0 + $0x128] sm:$0xff] %v2742_v0 }
 0x2af   : > { %5034 = vset.pattern.permute.xlu1 %v5443_v12  ;;  %3171 = vperm.xlu2 %5032, %v7155_v14  }
 0x2b0   : > { %3191 = vperm.xlu1 %5034, %v7151_v53   ;;  %4655 = vmatmul.msk.f32.gmra.mxu2 %vm381_vm0, %v7220_v48 }
 0x2b1   : > { %4651 = vmatmul.msk.f32.gmra.mxu1 %vm381_vm0, %v7220_v48  ;;  %3427 = vmatpush.msra.mxu3 %v3305_v60  ;;  %v3315_v60 = vld [vmem:[%s5691_s18 + $0x5a8] sm:$0xff] }
 0x2b2   : > { %v2700_v15 = vpop.permute.xlu1 %2699  ;;  %v2576_v35 = vpop.f32.mrf.mxu3 }
 0x2b3   : > { %v2714_v45 = vadd.f32 %v2700_v15, %v2694_v63  ;;  %v2736_v31 = vpop.permute.xlu2 %2735  ;;  %v1760_v63 = vpop.permute.xlu0 %1759  ;;  %v3297_v15 = vld [vmem:[%s5691_s18 + $0x198] sm:$0xff]  ;;  %v2780_v29 = vadd.f32 %v6951_v17, %v2576_v35 }
 0x2b4   : > { %v2744_v47 = vadd.f32 %v2736_v31, %v2724_v44  ;;  %v1768_v42 = vadd.f32 %v1760_v63, %v1748_v6  ;;  %v2750_v44 = vadd.f32 %v6914_v23, %v7116_v33  ;;  %v1777_v33 = vadd.f32 %v6924_v41, %v6682_v43  ;;  %3428 = vmatpush.msra.mxu3 %v3297_v15  ;;  %v7240_v31 = vld [vmem:[#allocation5 + $0x18] sm:$0xff]  ;;  %v7249_v43 = vpop.f32.mrf.mxu1  ;;  %v3298_v6 = vld [vmem:[%s5691_s18 + $0x1a0] sm:$0xff]  ;;  %v3307_v15 = vld [vmem:[%s5691_s18 + $0x3a8] sm:$0xff] }
 0x2b5   : > { %2718 = vst [vmem:[%s5991_s0 + $0x120] sm:$0xff] %v2714_v45  ;;  %4657 = vmatmul.msk.f32.vlgmr.msra.gmra.mxu3 %vm381_vm0, %v7169_v59 }
 0x2b6   : > { %2748 = vst [vmem:[%s5991_s0 + $0x528] sm:$0xff] %v2744_v47 }
 0x2b7   : > { %5035 = vset.pattern.permute.xlu2 %v5443_v12  ;;  %1772 = vst [vmem:[%s5991_s0 + $0x4a8] sm:$0xff] %v1768_v42 }
 0x2b8   : > { %3199 = vperm.xlu1 %5034, %v7155_v14   ;;  %3195 = vperm.xlu2 %5035, %v6739_v34   ;;  %v1719_v34 = vadd.f32 %v6933_v4, %v6508_v62 }
 0x2b9   : > { %4656 = vmatmul.msk.f32.gmra.mxu2 %vm381_vm0, %v7240_v31  ;;  %4652 = vmatmul.msk.f32.gmra.mxu1 %vm381_vm0, %v7240_v31 }
 0x2ba   : > { %v2712_v55 = vpop.permute.xlu1 %2711  ;;  %v1739_v62 = vadd.f32 %v1728_v10, %v1719_v34 }
 0x2bb   : > { %v2717_v61 = vadd.f32 %v2712_v55, %v2697_v51  ;;  %v1792_v51 = vpop.permute.xlu0 %1791  ;;  %v2752_v55 = vadd.f32 %v6951_v17, %v7167_v25  ;;  %v3322_v25 = vld [vmem:[%s5691_s18 + $0x7a0] sm:$0xff]  ;;  %v2579_v5 = vpop.f32.mrf.mxu3 }
 0x2bc   : > { %v2760_v46 = vpop.permute.xlu2 %2759  ;;  %1743 = vst [vmem:[%s5991_s0 + $0x2a0] sm:$0xff] %v1739_v62  ;;  %v1797_v8 = vadd.f32 %v1792_v51, %v1777_v33  ;;  %3454 = vmatpush.msrb.mxu0 %v3322_v25  ;;  %v3306_v62 = vld [vmem:[%s5691_s18 + $0x3a0] sm:$0xff]  ;;  %v5449_v33 = vmov 48  }
 0x2bd   : > { %2721 = vst [vmem:[%s5991_s0 + $0x720] sm:$0xff] %v2717_v61  ;;  %v2771_v12 = vadd.f32 %v2760_v46, %v2751_v11  ;;  %v2094_v11 = vadd.f32 %v6914_v23, %v6624_v26  ;;  %v3070_v61 = vadd.f32 %v6914_v23, %v7184_v54  ;;  %v5448_v46 = vmov 49   ;;  %4658 = vmatmul.msk.f32.gmra.mxu3 %vm381_vm0, %v7194_v57 }
 0x2be   : > { %1801 = vst [vmem:[%s5991_s0 + $0x6b0] sm:$0xff] %v1797_v8  ;;  %5047 = vset.pattern.permute.xlu0 %v5448_v46 }
 0x2bf   : > { %2775 = vst [vmem:[%s5991_s0 + $0x330] sm:$0xff] %v2771_v12  ;;  %v3314_v12 = vld [vmem:[%s5691_s18 + $0x5a0] sm:$0xff]  ;;  %3591 = vperm.xlu0 %5047, %v7208_v58  }
 0x2c0   : > { %5038 = vset.pattern.permute.xlu1 %v5445_v9  ;;  %5036 = vset.pattern.permute.xlu2 %v5445_v9  ;;  %v7217_v9 = vpop.f32.mrf.mxu0  ;;  %v2913_v63 = vpop.f32.mrf.mxu2 }
 0x2c1   : > { %3223 = vperm.xlu1 %5038, %v7203_v28   ;;  %3215 = vperm.xlu2 %5036, %v7208_v58  }
 0x2c2   : > { %3455 = vmatpush.msrb.mxu0 %v3314_v12  ;;  %v2181_v12 = vadd.f32 %v6924_v41, %v6869_v22 }
 0x2c3   : > { %v2732_v50 = vpop.permute.xlu1 %2731  ;;  %v2100_v54 = vpop.permute.xlu0 %2099 }
 0x2c4   : > { %v2743_v27 = vadd.f32 %v2732_v50, %v2723_v13  ;;  %v2768_v21 = vpop.permute.xlu2 %2767  ;;  %v2114_v10 = vadd.f32 %v2100_v54, %v2094_v11  ;;  %v7276_v50 = vpop.f32.mrf.mxu1  ;;  %3456 = vmatpush.msrb.mxu0 %v3306_v62  ;;  %v3126_v54 = vadd.f32 %v6914_v23, %v2913_v63  ;;  %v3317_v63 = vld [vmem:[%s5691_s18 + $0x5b8] sm:$0xff] }
 0x2c5   : > { %v2773_v0 = vadd.f32 %v2768_v21, %v2753_v56  ;;  %v2779_v56 = vadd.f32 %v6933_v4, %v7192_v40  ;;  %4659 = vmatmul.msk.f32.gmra.mxu3 %vm381_vm0, %v7220_v48 }
 0x2c6   : > { %2747 = vst [vmem:[%s5991_s0 + $0x328] sm:$0xff] %v2743_v27  ;;  %v2123_v27 = vadd.f32 %v6933_v4, %v6656_v18  ;;  %3457 = vmatpush.msrb.mxu0 %v3298_v6 }
 0x2c7   : > { %2777 = vst [vmem:[%s5991_s0 + $0x730] sm:$0xff] %v2773_v0  ;;  %4661 = vmatmul.msk.f32.vlgmr.msrb.gmra.mxu0 %vm381_vm0, %v7169_v59  ;;  %v3323_v0 = vld [vmem:[%s5691_s18 + $0x7a8] sm:$0xff] }
 0x2c8   : > { %v7247_v1 = vpop.f32.mrf.mxu0  ;;  %2118 = vst [vmem:[%s5991_s0 + $0xc0] sm:$0xff] %v2114_v10  ;;  %3483 = vmatpush.msrb.mxu1 %v3323_v0  ;;  %v7314_v25 = vpop.f32.mrf.mxu2  ;;  %v3324_v10 = vld [vmem:[%s5691_s18 + $0x7b0] sm:$0xff] }
 0x2c9   : > { %5039 = vset.pattern.permute.xlu1 %v5446_v49  ;;  %3227 = vperm.xlu2 %5036, %v7155_v14   ;;  %v3316_v0 = vld [vmem:[%s5691_s18 + $0x5b0] sm:$0xff] }
 0x2ca   : > { %3243 = vperm.xlu1 %5039, %v7208_v58   ;;  %3484 = vmatpush.msrb.mxu1 %v3315_v60 }
 0x2cb   : > { %v2132_v35 = vpop.permute.xlu0 %2131  ;;  %3512 = vmatpush.msrb.mxu2 %v3324_v10 }
 0x2cc   : > { %v2756_v39 = vpop.permute.xlu1 %2755  ;;  %v2143_v52 = vadd.f32 %v2132_v35, %v2123_v27  ;;  %3485 = vmatpush.msrb.mxu1 %v3307_v15  ;;  %v3309_v35 = vld [vmem:[%s5691_s18 + $0x3b8] sm:$0xff] }
 0x2cd   : > { %v2770_v45 = vadd.f32 %v2756_v39, %v2750_v44  ;;  %v2792_v16 = vpop.permute.xlu2 %2791  ;;  %v2781_v44 = vadd.f32 %v6924_v41, %v2579_v5  ;;  %v2152_v39 = vadd.f32 %v6951_v17, %v6770_v7  ;;  %v7305_v8 = vpop.f32.mrf.mxu3  ;;  %4660 = vmatmul.msk.f32.gmra.mxu3 %vm381_vm0, %v7240_v31  ;;  %v3098_v5 = vadd.f32 %v6914_v23, %v7276_v50 }
 0x2ce   : > { %v2800_v47 = vadd.f32 %v2792_v16, %v2780_v29  ;;  %v3299_v29 = vld [vmem:[%s5691_s18 + $0x1a8] sm:$0xff]  ;;  %2147 = vst [vmem:[%s5991_s0 + $0x2c8] sm:$0xff] %v2143_v52  ;;  %3513 = vmatpush.msrb.mxu2 %v3316_v0  ;;  %v3301_v52 = vld [vmem:[%s5691_s18 + $0x1b8] sm:$0xff]  ;;  %v7417_v0 = vld [vmem:[%s5702_s28] sm:$0xff] }
 0x2cf   : > { %2774 = vst [vmem:[%s5991_s0 + $0x130] sm:$0xff] %v2770_v45  ;;  %v2887_v45 = vpop.f32.mrf.mxu1  ;;  %4662 = vmatmul.msk.f32.gmra.mxu0 %vm381_vm0, %v7194_v57  ;;  %3486 = vmatpush.msrb.mxu1 %v3299_v29 }
 0x2d0   : > { %2804 = vst [vmem:[%s5991_s0 + $0x538] sm:$0xff] %v2800_v47  ;;  %v2864_v13 = vpop.f32.mrf.mxu0  ;;  %v3099_v47 = vadd.f32 %v6933_v4, %v2887_v45  ;;  %4665 = vmatmul.msk.f32.vlgmr.msrb.gmra.mxu1 %vm381_vm0, %v7169_v59 }
 0x2d1   : > { %5040 = vset.pattern.permute.xlu2 %v5446_v49  ;;  %v3073_v40 = vadd.f32 %v6924_v41, %v2864_v13 }
 0x2d2   : > { %3255 = vperm.xlu1 %5039, %v7155_v14   ;;  %3247 = vperm.xlu2 %5040, %v7151_v53  }
 0x2d3   : > { %v2164_v7 = vpop.permute.xlu0 %2163 }
 0x2d4   : > { %v2764_v34 = vpop.permute.xlu1 %2763 }
 0x2d5   : > { %v2772_v49 = vadd.f32 %v2764_v34, %v2752_v55  ;;  %v5450_v55 = vmov 50   ;;  %v2945_v13 = vpop.f32.mrf.mxu3 }
 0x2d6   : > { %v3076_v26 = vpop.permute.xlu2 %3075  ;;  %5051 = vset.pattern.permute.xlu0 %v5450_v55 }
 0x2d7   : > { %2776 = vst [vmem:[%s5991_s0 + $0x530] sm:$0xff] %v2772_v49  ;;  %v3090_v24 = vadd.f32 %v3076_v26, %v3070_v61  ;;  %v2172_v61 = vadd.f32 %v2164_v7, %v2152_v39  ;;  %3623 = vperm.xlu0 %5051, %v7151_v53   ;;  %v3072_v49 = vadd.f32 %v6951_v17, %v7247_v1 }
 0x2d8   : > { %4663 = vmatmul.msk.f32.gmra.mxu0 %vm381_vm0, %v7220_v48  ;;  %4666 = vmatmul.msk.f32.gmra.mxu1 %vm381_vm0, %v7194_v57  ;;  %v3155_v7 = vadd.f32 %v6933_v4, %v2945_v13 }
 0x2d9   : > { %3094 = vst [vmem:[%s5991_s0 + $0x140] sm:$0xff] %v3090_v24  ;;  %v7327_v24 = vpop.f32.mrf.mxu1 }
 0x2da   : > { %5043 = vset.pattern.permute.xlu1 %v5447_v38  ;;  %5042 = vset.pattern.permute.xlu2 %v5447_v38  ;;  %2176 = vst [vmem:[%s5991_s0 + $0x4d0] sm:$0xff] %v2172_v61 }
 0x2db   : > { %3275 = vperm.xlu1 %5043, %v7151_v53   ;;  %3271 = vperm.xlu2 %5042, %v7208_v58   ;;  %v2196_v1 = vpop.permute.xlu0 %2195 }
 0x2dc   : > { %v2201_v62 = vadd.f32 %v2196_v1, %v2181_v12  ;;  %v2292_v12 = vadd.f32 %v6951_v17, %v6964_v30  ;;  %v7401_v1 = vld [vmem:[%s5702_s28 + $0x18] sm:$0xff] }
 0x2dd   : > { %v2788_v21 = vpop.permute.xlu1 %2787  ;;  %v7359_v45 = vpop.f32.mrf.mxu3 }
 0x2de   : > { %v2799_v38 = vadd.f32 %v2788_v21, %v2779_v56  ;;  %v3088_v18 = vpop.permute.xlu2 %3087  ;;  %v5451_v56 = vmov 51   ;;  %2205 = vst [vmem:[%s5991_s0 + $0x6d8] sm:$0xff] %v2201_v62  ;;  %v2919_v21 = vpop.f32.mrf.mxu2 }
 0x2df   : > { %v3093_v42 = vadd.f32 %v3088_v18, %v3073_v40  ;;  %5055 = vset.pattern.permute.xlu0 %v5451_v56  ;;  %v3325_v40 = vld [vmem:[%s5691_s18 + $0x7b8] sm:$0xff]  ;;  %v3308_v18 = vld [vmem:[%s5691_s18 + $0x3b0] sm:$0xff] }
 0x2e0   : > { %2803 = vst [vmem:[%s5991_s0 + $0x338] sm:$0xff] %v2799_v38  ;;  %3655 = vperm.xlu0 %5055, %v7203_v28   ;;  %3541 = vmatpush.msrb.mxu3 %v3325_v40  ;;  %v2234_v38 = vadd.f32 %v6914_v23, %v6799_v19  ;;  %v3300_v19 = vld [vmem:[%s5691_s18 + $0x1b0] sm:$0xff] }
 0x2e1   : > { %3097 = vst [vmem:[%s5991_s0 + $0x740] sm:$0xff] %v3093_v42  ;;  %v3128_v42 = vadd.f32 %v6951_v17, %v2919_v21  ;;  %4667 = vmatmul.msk.f32.gmra.mxu1 %vm381_vm0, %v7220_v48  ;;  %3514 = vmatpush.msrb.mxu2 %v3308_v18  ;;  %v3806_v21 = vld [vmem:[%s5691_s18 + $0x7c0] sm:$0xff] }
 0x2e2   : > { %3542 = vmatpush.msrb.mxu3 %v3317_v63  ;;  %4664 = vmatmul.msk.f32.gmra.mxu0 %vm381_vm0, %v7240_v31  ;;  %v7425_v63 = vld [vmem:[%s5702_s28 + $0x10] sm:$0xff] }
 0x2e3   : > { %5045 = vset.pattern.permute.xlu1 %v5449_v33  ;;  %3279 = vperm.xlu2 %5042, %v7203_v28   ;;  %v2240_v50 = vpop.permute.xlu0 %2239 }
 0x2e4   : > { %3563 = vperm.xlu1 %5045, %v7208_v58   ;;  %v2254_v15 = vadd.f32 %v2240_v50, %v2234_v38  ;;  %3543 = vmatpush.msrb.mxu3 %v3309_v35  ;;  %v3154_v38 = vadd.f32 %v7417_v0, %v7305_v8 }
 0x2e5   : > { %v2796_v16 = vpop.permute.xlu1 %2795  ;;  %3515 = vmatpush.msrb.mxu2 %v3300_v19  ;;  %3826 = vmatpush.msra.mxu0 %v3806_v21 }
 0x2e6   : > { %v2801_v51 = vadd.f32 %v2796_v16, %v2781_v44  ;;  %v2893_v44 = vpop.f32.mrf.mxu1  ;;  %4669 = vmatmul.msk.f32.vlgmr.msrb.gmra.mxu2 %vm381_vm0, %v7169_v59  ;;  %3544 = vmatpush.msrb.mxu3 %v3301_v52  ;;  %2258 = vst [vmem:[%s5991_s0 + $0xe8] sm:$0xff] %v2254_v15  ;;  %v2263_v16 = vadd.f32 %v6933_v4, %v6846_v37  ;;  %v5452_v37 = vmov 52  }
 0x2e7   : > { %v3108_v11 = vpop.permute.xlu2 %3107  ;;  %4673 = vmatmul.msk.f32.vlgmr.msrb.gmra.mxu3 %vm381_vm0, %v7169_v59  ;;  %v3156_v15 = vadd.f32 %v7425_v63, %v7359_v45 }
 0x2e8   : > { %2805 = vst [vmem:[%s5991_s0 + $0x738] sm:$0xff] %v2801_v51  ;;  %v3119_v34 = vadd.f32 %v3108_v11, %v3099_v47  ;;  %v3101_v47 = vadd.f32 %v6924_v41, %v2893_v44  ;;  %5058 = vset.pattern.permute.xlu0 %v5452_v37  ;;  %v3790_v44 = vld [vmem:[%s5691_s18 + $0x3c0] sm:$0xff] }
 0x2e9   : > { %4668 = vmatmul.msk.f32.gmra.mxu1 %vm381_vm0, %v7240_v31  ;;  %3687 = vperm.xlu0 %5058, %v7155_v14  }
 0x2ea   : > { %3123 = vst [vmem:[%s5991_s0 + $0x348] sm:$0xff] %v3119_v34 }
 0x2eb   : > { %5046 = vset.pattern.permute.xlu2 %v5449_v33  ;;  %v7356_v33 = vpop.f32.mrf.mxu0  ;;  %v2272_v11 = vpop.permute.xlu0 %2271 }
 0x2ec   : > { %3571 = vperm.xlu1 %5045, %v7203_v28   ;;  %3567 = vperm.xlu2 %5046, %v7151_v53   ;;  %v2283_v34 = vadd.f32 %v2272_v11, %v2263_v16 }
 0x2ee   : > { %v3084_v26 = vpop.permute.xlu1 %3083  ;;  %v7377_v61 = vpop.f32.mrf.mxu1  ;;  %4670 = vmatmul.msk.f32.gmra.mxu2 %vm381_vm0, %v7194_v57  ;;  %2287 = vst [vmem:[%s5991_s0 + $0x2f0] sm:$0xff] %v2283_v34  ;;  %v3808_v34 = vld [vmem:[%s5691_s18 + $0x7d0] sm:$0xff] }
 0x2ef   : > { %v3092_v22 = vadd.f32 %v3084_v26, %v3072_v49  ;;  %4674 = vmatmul.msk.f32.gmra.mxu3 %vm381_vm0, %v7194_v57  ;;  %v2951_v26 = vpop.f32.mrf.mxu3  ;;  %v3210_v16 = vadd.f32 %v7417_v0, %v7377_v61  ;;  %3884 = vmatpush.msra.mxu2 %v3808_v34 }
 0x2f0   : > { %v3132_v6 = vpop.permute.xlu2 %3131  ;;  %v3157_v17 = vadd.f32 %v7401_v1, %v2951_v26 }
 0x2f1   : > { %3096 = vst [vmem:[%s5991_s0 + $0x540] sm:$0xff] %v3092_v22  ;;  %v3146_v27 = vadd.f32 %v3132_v6, %v3126_v54  ;;  %v7391_v54 = vld [vmem:[%s5702_s28 + $0x8] sm:$0xff] }
 0x2f2   : > { %v3127_v22 = vadd.f32 %v7391_v54, %v7314_v25  ;;  %v2667_v11 = vadd.f32 %v7391_v54, %v7033_v36 }
 0x2f3   : > { %3150 = vst [vmem:[%s5991_s0 + $0x150] sm:$0xff] %v3146_v27  ;;  %v7383_v4 = vpop.f32.mrf.mxu0  ;;  %v2304_v30 = vpop.permute.xlu0 %2303  ;;  %v2585_v27 = vadd.f32 %v7401_v1, %v7060_v32 }
 0x2f4   : > { %5048 = vset.pattern.permute.xlu1 %v5448_v46  ;;  %3575 = vperm.xlu2 %5046, %v7155_v14   ;;  %v2312_v25 = vadd.f32 %v2304_v30, %v2292_v12  ;;  %v3183_v12 = vadd.f32 %v7391_v54, %v7383_v4 }
 0x2f5   : > { %3595 = vperm.xlu1 %5048, %v7151_v53  }
 0x2f6   : > { %v7404_v6 = vpop.f32.mrf.mxu1  ;;  %2316 = vst [vmem:[%s5991_s0 + $0x4f8] sm:$0xff] %v2312_v25  ;;  %4671 = vmatmul.msk.f32.gmra.mxu2 %vm381_vm0, %v7220_v48 }
 0x2f7   : > { %v3104_v23 = vpop.permute.xlu1 %3103  ;;  %4675 = vmatmul.msk.f32.gmra.mxu3 %vm381_vm0, %v7220_v48 }
 0x2f8   : > { %v3118_v60 = vadd.f32 %v3104_v23, %v3098_v5  ;;  %v3140_v29 = vpop.permute.xlu2 %3139  ;;  %v2638_v23 = vadd.f32 %v7417_v0, %v6986_v2 }
 0x2f9   : > { %v3148_v39 = vadd.f32 %v3140_v29, %v3128_v42  ;;  %v3798_v42 = vld [vmem:[%s5691_s18 + $0x5c0] sm:$0xff] }
 0x2fa   : > { %3122 = vst [vmem:[%s5991_s0 + $0x148] sm:$0xff] %v3118_v60  ;;  %3827 = vmatpush.msra.mxu0 %v3798_v42  ;;  %v7439_v60 = vpop.f32.mrf.mxu2  ;;  %v3782_v29 = vld [vmem:[%s5691_s18 + $0x1c0] sm:$0xff] }
 0x2fb   : > { %3152 = vst [vmem:[%s5991_s0 + $0x550] sm:$0xff] %v3148_v39  ;;  %v2977_v40 = vpop.f32.mrf.mxu0  ;;  %v2600_v5 = vpop.permute.xlu0 %2599 }
 0x2fc   : > { %5049 = vset.pattern.permute.xlu2 %v5448_v46  ;;  %v3184_v32 = vadd.f32 %v7425_v63, %v2977_v40  ;;  %v2605_v18 = vadd.f32 %v2600_v5, %v2585_v27  ;;  %3828 = vmatpush.msra.mxu0 %v3790_v44 }
 0x2fd   : > { %3603 = vperm.xlu1 %5048, %v7155_v14   ;;  %3599 = vperm.xlu2 %5049, %v7203_v28  }
 0x2fe   : > { %2609 = vst [vmem:[%s5991_s0 + $0x700] sm:$0xff] %v2605_v18  ;;  %4672 = vmatmul.msk.f32.gmra.mxu2 %vm381_vm0, %v7240_v31  ;;  %v7437_v52 = vpop.f32.mrf.mxu1  ;;  %3829 = vmatpush.msra.mxu0 %v3782_v29 }
 0x2ff   : > { %v3116_v51 = vpop.permute.xlu1 %3115  ;;  %4676 = vmatmul.msk.f32.gmra.mxu3 %vm381_vm0, %v7240_v31  ;;  %4677 = vmatmul.msk.f32.vlgmr.msra.gmra.mxu0 %vm381_vm0, %v7169_v59 }
 0x300   : > { %v3121_v41 = vadd.f32 %v3116_v51, %v3101_v47  ;;  %v3807_v47 = vld [vmem:[%s5691_s18 + $0x7c8] sm:$0xff]  ;;  %v5453_v51 = vmov 54  }
 0x301   : > { %v3164_v46 = vpop.permute.xlu2 %3163  ;;  %5061 = vset.pattern.permute.xlu0 %v5453_v51  ;;  %3855 = vmatpush.msra.mxu1 %v3807_v47 }
 0x302   : > { %3125 = vst [vmem:[%s5991_s0 + $0x748] sm:$0xff] %v3121_v41  ;;  %v3175_v49 = vadd.f32 %v3164_v46, %v3155_v7  ;;  %v3799_v7 = vld [vmem:[%s5691_s18 + $0x5c8] sm:$0xff]  ;;  %3731 = vperm.xlu0 %5061, %v7208_v58   ;;  %v7467_v26 = vpop.f32.mrf.mxu2 }
 0x303   : > { %v2644_v2 = vpop.permute.xlu0 %2643  ;;  %3856 = vmatpush.msra.mxu1 %v3799_v7 }
 0x304   : > { %3179 = vst [vmem:[%s5991_s0 + $0x358] sm:$0xff] %v3175_v49  ;;  %v2658_v39 = vadd.f32 %v2644_v2, %v2638_v23  ;;  %v3791_v49 = vld [vmem:[%s5691_s18 + $0x3c8] sm:$0xff] }
 0x305   : > { %5052 = vset.pattern.permute.xlu1 %v5450_v55  ;;  %5050 = vset.pattern.permute.xlu2 %v5450_v55 }
 0x306   : > { %3627 = vperm.xlu1 %5052, %v7203_v28   ;;  %3619 = vperm.xlu2 %5050, %v7208_v58   ;;  %2662 = vst [vmem:[%s5991_s0 + $0x110] sm:$0xff] %v2658_v39  ;;  %v3009_v46 = vpop.f32.mrf.mxu1  ;;  %v3212_v39 = vadd.f32 %v7425_v63, %v7437_v52  ;;  %v2778_v52 = vadd.f32 %v7417_v0, %v7164_v20 }
 0x307   : > { %3857 = vmatpush.msra.mxu1 %v3791_v49  ;;  %v3213_v4 = vadd.f32 %v7401_v1, %v3009_v46  ;;  %4678 = vmatmul.msk.f32.gmra.mxu0 %vm381_vm0, %v7194_v57 }
 0x308   : > { %v3136_v10 = vpop.permute.xlu1 %3135 }
 0x309   : > { %v3147_v13 = vadd.f32 %v3136_v10, %v3127_v22  ;;  %v3172_v62 = vpop.permute.xlu2 %3171  ;;  %v3800_v22 = vld [vmem:[%s5691_s18 + $0x5d0] sm:$0xff] }
 0x30a   : > { %v3177_v55 = vadd.f32 %v3172_v62, %v3157_v17  ;;  %v3783_v17 = vld [vmem:[%s5691_s18 + $0x1c8] sm:$0xff]  ;;  %v3792_v10 = vld [vmem:[%s5691_s18 + $0x3d0] sm:$0xff]  ;;  %3885 = vmatpush.msra.mxu2 %v3800_v22  ;;  %v3793_v22 = vld [vmem:[%s5691_s18 + $0x3d8] sm:$0xff] }
 0x30b   : > { %3151 = vst [vmem:[%s5991_s0 + $0x350] sm:$0xff] %v3147_v13  ;;  %v2676_v36 = vpop.permute.xlu0 %2675  ;;  %3858 = vmatpush.msra.mxu1 %v3783_v17  ;;  %v3784_v13 = vld [vmem:[%s5691_s18 + $0x1d0] sm:$0xff]  ;;  %v3785_v17 = vld [vmem:[%s5691_s18 + $0x1d8] sm:$0xff] }
 0x30c   : > { %3181 = vst [vmem:[%s5991_s0 + $0x758] sm:$0xff] %v3177_v55  ;;  %v2687_v30 = vadd.f32 %v2676_v36, %v2667_v11  ;;  %v2980_v55 = vpop.f32.mrf.mxu0  ;;  %4681 = vmatmul.msk.f32.vlgmr.msra.gmra.mxu1 %vm381_vm0, %v7169_v59  ;;  %3886 = vmatpush.msra.mxu2 %v3792_v10  ;;  %v5456_v11 = vmov 56   ;;  %v3238_v36 = vadd.f32 %v7417_v0, %v7467_v26  ;;  %v3810_v10 = vld [vmem:[%s5691_s18 + $0x7e0] sm:$0xff] }
 0x30d   : > { %3942 = vmatpush.msrb.mxu0 %v3810_v10 }
 0x30e   : > { %5053 = vset.pattern.permute.xlu1 %v5451_v56  ;;  %3631 = vperm.xlu2 %5050, %v7155_v14   ;;  %2691 = vst [vmem:[%s5991_s0 + $0x318] sm:$0xff] %v2687_v30 }
 0x30f   : > { %3647 = vperm.xlu1 %5053, %v7208_v58   ;;  %3887 = vmatpush.msra.mxu2 %v3784_v13 }
 0x310   : > { %4685 = vmatmul.msk.f32.vlgmr.msra.gmra.mxu2 %vm381_vm0, %v7169_v59  ;;  %4679 = vmatmul.msk.f32.gmra.mxu0 %vm381_vm0, %v7220_v48 }
 0x311   : > { %v3160_v35 = vpop.permute.xlu1 %3159 }
 0x312   : > { %v3174_v8 = vadd.f32 %v3160_v35, %v3154_v38  ;;  %v3196_v19 = vpop.permute.xlu2 %3195  ;;  %v3058_v40 = vpop.f32.mrf.mxu3  ;;  %v3185_v38 = vadd.f32 %v7401_v1, %v2980_v55  ;;  %v5455_v35 = vmov 55  }
 0x313   : > { %v3204_v50 = vadd.f32 %v3196_v19, %v3184_v32  ;;  %v2708_v5 = vpop.permute.xlu0 %2707  ;;  %v5454_v32 = vmov 53   ;;  %5065 = vset.pattern.permute.xlu0 %v5455_v35  ;;  %v3266_v47 = vadd.f32 %v7417_v0, %v3058_v40  ;;  %v3794_v40 = vld [vmem:[%s5691_s18 + $0x3e0] sm:$0xff] }
 0x314   : > { %3178 = vst [vmem:[%s5991_s0 + $0x158] sm:$0xff] %v3174_v8  ;;  %3763 = vperm.xlu0 %5065, %v7151_v53   ;;  %v7497_v23 = vpop.f32.mrf.mxu0  ;;  %4682 = vmatmul.msk.f32.gmra.mxu1 %vm381_vm0, %v7194_v57 }
 0x315   : > { %3208 = vst [vmem:[%s5991_s0 + $0x560] sm:$0xff] %v3204_v50  ;;  %v2725_v50 = vadd.f32 %v7401_v1, %v7249_v43 }
 0x316   : > { %5054 = vset.pattern.permute.xlu2 %v5451_v56 }
 0x317   : > { %3659 = vperm.xlu1 %5053, %v7155_v14   ;;  %3651 = vperm.xlu2 %5054, %v7151_v53  }
 0x318   : > { %4686 = vmatmul.msk.f32.gmra.mxu2 %vm381_vm0, %v7194_v57  ;;  %4680 = vmatmul.msk.f32.gmra.mxu0 %vm381_vm0, %v7240_v31 }
 0x319   : > { %v3168_v45 = vpop.permute.xlu1 %3167 }
 0x31a   : > { %v3176_v56 = vadd.f32 %v3168_v45, %v3156_v15  ;;  %v7504_v29 = vpop.f32.mrf.mxu3  ;;  %v3809_v45 = vld [vmem:[%s5691_s18 + $0x7d8] sm:$0xff] }
 0x31b   : > { %v3216_v41 = vpop.permute.xlu2 %3215  ;;  %v2740_v2 = vpop.permute.xlu0 %2739  ;;  %3913 = vmatpush.msra.mxu3 %v3809_v45  ;;  %v3811_v45 = vld [vmem:[%s5691_s18 + $0x7e8] sm:$0xff] }
 0x31c   : > { %3180 = vst [vmem:[%s5991_s0 + $0x558] sm:$0xff] %v3176_v56  ;;  %v3230_v61 = vadd.f32 %v3216_v41, %v3210_v16  ;;  %v2745_v16 = vadd.f32 %v2740_v2, %v2725_v50  ;;  %4683 = vmatmul.msk.f32.gmra.mxu1 %vm381_vm0, %v7220_v48  ;;  %5069 = vset.pattern.permute.xlu0 %v5456_v11  ;;  %v3346_v41 = vpop.f32.mrf.mxu0 }
 0x31d   : > { %4059 = vperm.xlu0 %5069, %v7203_v28   ;;  %v7543_v13 = vpop.f32.mrf.mxu1  ;;  %v3267_v50 = vadd.f32 %v7391_v54, %v7504_v29  ;;  %3971 = vmatpush.msrb.mxu1 %v3811_v45 }
 0x31e   : > { %3234 = vst [vmem:[%s5991_s0 + $0x168] sm:$0xff] %v3230_v61 }
 0x31f   : > { %5057 = vset.pattern.permute.xlu1 %v5452_v37  ;;  %5056 = vset.pattern.permute.xlu2 %v5452_v37  ;;  %v2696_v37 = vadd.f32 %v7425_v63, %v7134_v3  ;;  %v3032_v3 = vpop.f32.mrf.mxu2  ;;  %2749 = vst [vmem:[%s5991_s0 + $0x728] sm:$0xff] %v2745_v16  ;;  %v3813_v16 = vld [vmem:[%s5691_s18 + $0x7f8] sm:$0xff] }
 0x320   : > { %3679 = vperm.xlu1 %5057, %v7151_v53   ;;  %3675 = vperm.xlu2 %5056, %v7208_v58   ;;  %v3239_v8 = vadd.f32 %v7391_v54, %v3032_v3 }
 0x321   : > { %v2716_v18 = vadd.f32 %v2708_v5, %v2696_v37  ;;  %4687 = vmatmul.msk.f32.gmra.mxu2 %vm381_vm0, %v7220_v48  ;;  %v3802_v37 = vld [vmem:[%s5691_s18 + $0x5e0] sm:$0xff]  ;;  %v3559_v5 = vadd.f32 %v7391_v54, %v3346_v41 }
 0x322   : > { %v3192_v25 = vpop.permute.xlu1 %3191  ;;  %v3064_v49 = vpop.f32.mrf.mxu3  ;;  %3943 = vmatpush.msrb.mxu0 %v3802_v37  ;;  %v5458_v37 = vmov 59  }
 0x323   : > { %v3203_v62 = vadd.f32 %v3192_v25, %v3183_v12  ;;  %v3228_v27 = vpop.permute.xlu2 %3227  ;;  %2720 = vst [vmem:[%s5991_s0 + $0x520] sm:$0xff] %v2716_v18  ;;  %v2784_v46 = vpop.permute.xlu0 %2783  ;;  %v3801_v12 = vld [vmem:[%s5691_s18 + $0x5d8] sm:$0xff]  ;;  %v3268_v30 = vadd.f32 %v7425_v63, %v3064_v49  ;;  %v3804_v49 = vld [vmem:[%s5691_s18 + $0x5f0] sm:$0xff] }
 0x324   : > { %v3233_v21 = vadd.f32 %v3228_v27, %v3213_v4  ;;  %v2798_v20 = vadd.f32 %v2784_v46, %v2778_v52  ;;  %3914 = vmatpush.msra.mxu3 %v3801_v12  ;;  %4684 = vmatmul.msk.f32.gmra.mxu1 %vm381_vm0, %v7240_v31  ;;  %v7550_v55 = vpop.f32.mrf.mxu0  ;;  %v7616_v12 = vld [vmem:[%s5709_s14 + $0x18] sm:$0xff] }
 0x325   : > { %3207 = vst [vmem:[%s5991_s0 + $0x360] sm:$0xff] %v3203_v62  ;;  %3944 = vmatpush.msrb.mxu0 %v3794_v40  ;;  %v3560_v46 = vadd.f32 %v7425_v63, %v7550_v55 }
 0x326   : > { %3237 = vst [vmem:[%s5991_s0 + $0x768] sm:$0xff] %v3233_v21  ;;  %3915 = vmatpush.msra.mxu3 %v3793_v22  ;;  %v3786_v21 = vld [vmem:[%s5691_s18 + $0x1e0] sm:$0xff]  ;;  %v3796_v22 = vld [vmem:[%s5691_s18 + $0x3f0] sm:$0xff] }
 0x327   : > { %v7518_v56 = vpop.f32.mrf.mxu2  ;;  %2802 = vst [vmem:[%s5991_s0 + $0x138] sm:$0xff] %v2798_v20  ;;  %3945 = vmatpush.msrb.mxu0 %v3786_v21  ;;  %v3805_v20 = vld [vmem:[%s5691_s18 + $0x5f8] sm:$0xff] }
 0x328   : > { %5059 = vset.pattern.permute.xlu1 %v5454_v32  ;;  %3683 = vperm.xlu2 %5056, %v7203_v28  }
 0x329   : > { %3703 = vperm.xlu1 %5059, %v7208_v58   ;;  %3916 = vmatpush.msra.mxu3 %v3785_v17 }
 0x32a   : > { %v3200_v42 = vpop.permute.xlu1 %3199  ;;  %4688 = vmatmul.msk.f32.gmra.mxu2 %vm381_vm0, %v7240_v31  ;;  %4689 = vmatmul.msk.f32.vlgmr.msra.gmra.mxu3 %vm381_vm0, %v7169_v59 }
 0x32b   : > { %v3205_v19 = vadd.f32 %v3200_v42, %v3185_v38  ;;  %4693 = vmatmul.msk.f32.vlgmr.msrb.gmra.mxu0 %vm381_vm0, %v7169_v59  ;;  %4029 = vmatpush.msrb.mxu3 %v3813_v16 }
 0x32c   : > { %v3248_v44 = vpop.permute.xlu2 %3247 }
 0x32d   : > { %3209 = vst [vmem:[%s5991_s0 + $0x760] sm:$0xff] %v3205_v19  ;;  %v3259_v15 = vadd.f32 %v3248_v44, %v3239_v8  ;;  %v7570_v8 = vpop.f32.mrf.mxu1  ;;  %v3352_v19 = vpop.f32.mrf.mxu0  ;;  %4030 = vmatpush.msrb.mxu3 %v3805_v20 }
 0x32e   : > { %v3561_v59 = vadd.f32 %v7401_v1, %v3352_v19  ;;  %v3587_v40 = vadd.f32 %v7391_v54, %v7570_v8  ;;  %v5129_v8 = vld [vmem:[#allocation5 + $0x8] sm:$0xff] }
 0x32f   : > { %3263 = vst [vmem:[%s5991_s0 + $0x370] sm:$0xff] %v3259_v15  ;;  %v3038_v25 = vpop.f32.mrf.mxu2 }
 0x330   : > { %5060 = vset.pattern.permute.xlu2 %v5454_v32  ;;  %v3241_v27 = vadd.f32 %v7401_v1, %v3038_v25  ;;  %v5457_v32 = vmov 57   ;;  %v3797_v25 = vld [vmem:[%s5691_s18 + $0x3f8] sm:$0xff] }
 0x331   : > { %3711 = vperm.xlu1 %5059, %v7203_v28   ;;  %3707 = vperm.xlu2 %5060, %v7151_v53  }
 0x332   : > { %5072 = vset.pattern.permute.xlu0 %v5457_v32  ;;  %4690 = vmatmul.msk.f32.gmra.mxu3 %vm381_vm0, %v7194_v57 }
 0x333   : > { %v3224_v43 = vpop.permute.xlu1 %3223  ;;  %4091 = vperm.xlu0 %5072, %v7155_v14   ;;  %4694 = vmatmul.msk.f32.gmra.mxu0 %vm381_vm0, %v7194_v57 }
 0x334   : > { %v3232_v7 = vadd.f32 %v3224_v43, %v3212_v39  ;;  %v3812_v39 = vld [vmem:[%s5691_s18 + $0x7f0] sm:$0xff]  ;;  %v3558_v43 = vadd.f32 %v7417_v0, %v7497_v23  ;;  %v3803_v23 = vld [vmem:[%s5691_s18 + $0x5e8] sm:$0xff]  ;;  %4031 = vmatpush.msrb.mxu3 %v3797_v25 }
 0x335   : > { %v3272_v61 = vpop.permute.xlu2 %3271  ;;  %4000 = vmatpush.msrb.mxu2 %v3812_v39  ;;  %3972 = vmatpush.msrb.mxu1 %v3803_v23  ;;  %v3182_v23 = vadd.f32 %v7417_v0, %v7356_v33  ;;  %v5461_v33 = vmov 61  }
 0x336   : > { %3236 = vst [vmem:[%s5991_s0 + $0x568] sm:$0xff] %v3232_v7  ;;  %v3286_v34 = vadd.f32 %v3272_v61, %v3266_v47 }
 0x337   : > { %v7562_v3 = vpop.f32.mrf.mxu2  ;;  %4001 = vmatpush.msrb.mxu2 %v3804_v49 }
 0x338   : > { %3290 = vst [vmem:[%s5991_s0 + $0x178] sm:$0xff] %v3286_v34  ;;  %v7607_v34 = vpop.f32.mrf.mxu3 }
 0x339   : > { %5062 = vset.pattern.permute.xlu1 %v5453_v51  ;;  %3715 = vperm.xlu2 %5060, %v7155_v14  }
 0x33a   : > { %3735 = vperm.xlu1 %5062, %v7151_v53   ;;  %4691 = vmatmul.msk.f32.gmra.mxu3 %vm381_vm0, %v7220_v48 }
 0x33b   : > { %4695 = vmatmul.msk.f32.gmra.mxu0 %vm381_vm0, %v7220_v48  ;;  %v3795_v48 = vld [vmem:[%s5691_s18 + $0x3e8] sm:$0xff]  ;;  %4002 = vmatpush.msrb.mxu2 %v3796_v22 }
 0x33c   : > { %v3244_v26 = vpop.permute.xlu1 %3243  ;;  %3973 = vmatpush.msrb.mxu1 %v3795_v48  ;;  %5075 = vset.pattern.permute.xlu0 %v5458_v37 }
 0x33d   : > { %v3258_v4 = vadd.f32 %v3244_v26, %v3238_v36  ;;  %v3280_v53 = vpop.permute.xlu2 %3279  ;;  %v3787_v36 = vld [vmem:[%s5691_s18 + $0x1e8] sm:$0xff]  ;;  %v3614_v26 = vadd.f32 %v7417_v0, %v7562_v3  ;;  %4135 = vperm.xlu0 %5075, %v7208_v58   ;;  %v3789_v3 = vld [vmem:[%s5691_s18 + $0x1f8] sm:$0xff] }
 0x33e   : > { %v3288_v62 = vadd.f32 %v3280_v53, %v3268_v30  ;;  %v7623_v30 = vld [vmem:[%s5709_s14 + $0x8] sm:$0xff]  ;;  %3974 = vmatpush.msrb.mxu1 %v3787_v36  ;;  %v5128_v53 = vld [vmem:[#allocation5] sm:$0xff]  ;;  %4032 = vmatpush.msrb.mxu3 %v3789_v3  ;;  %v5133_v36 = vld [vmem:[#allocation5 + $0x18] sm:$0xff] }
 0x33f   : > { %3262 = vst [vmem:[%s5991_s0 + $0x170] sm:$0xff] %v3258_v4  ;;  %v7584_v2 = vpop.f32.mrf.mxu2  ;;  %4697 = vmatmul.msk.f32.vlgmr.msrb.gmra.mxu1 %vm381_vm0, %v5128_v53 }
 0x340   : > { %3292 = vst [vmem:[%s5991_s0 + $0x578] sm:$0xff] %v3288_v62  ;;  %v3100_v62 = vadd.f32 %v7425_v63, %v7327_v24  ;;  %v7644_v24 = vpop.f32.mrf.mxu3 }
 0x341   : > { %5063 = vset.pattern.permute.xlu2 %v5453_v51 }
 0x342   : > { %3743 = vperm.xlu1 %5062, %v7155_v14   ;;  %3739 = vperm.xlu2 %5063, %v7203_v28  }
 0x343   : > { %4692 = vmatmul.msk.f32.gmra.mxu3 %vm381_vm0, %v7240_v31  ;;  %4696 = vmatmul.msk.f32.gmra.mxu0 %vm381_vm0, %v7240_v31 }
 0x344   : > { %v3256_v38 = vpop.permute.xlu1 %3255 }
 0x345   : > { %v3261_v18 = vadd.f32 %v3256_v38, %v3241_v27 }
 0x346   : > { %v3568_v51 = vpop.permute.xlu2 %3567 }
 0x347   : > { %3265 = vst [vmem:[%s5991_s0 + $0x770] sm:$0xff] %v3261_v18  ;;  %v3579_v42 = vadd.f32 %v3568_v51, %v3559_v5  ;;  %v7605_v61 = vpop.f32.mrf.mxu2  ;;  %4698 = vmatmul.msk.f32.gmra.mxu1 %vm381_vm0, %v5129_v8 }
 0x348   : > { %v3433_v39 = vpop.f32.mrf.mxu3 }
 0x349   : > { %3583 = vst [vmem:[%s5991_s0 + $0x380] sm:$0xff] %v3579_v42  ;;  %v3643_v45 = vadd.f32 %v7391_v54, %v3433_v39  ;;  %v5463_v39 = vmov 63  }
 0x34a   : > { %5066 = vset.pattern.permute.xlu1 %v5455_v35  ;;  %5064 = vset.pattern.permute.xlu2 %v5455_v35  ;;  %v3378_v35 = vpop.f32.mrf.mxu1 }
 0x34b   : > { %3767 = vperm.xlu1 %5066, %v7203_v28   ;;  %3759 = vperm.xlu2 %5064, %v7208_v58   ;;  %v3588_v57 = vadd.f32 %v7425_v63, %v3378_v35  ;;  %v7666_v35 = vld [vmem:[%s5709_s14 + $0x10] sm:$0xff] }
 0x34c   : > { %4705 = vmatmul.msk.f32.vlgmr.msrb.gmra.mxu3 %vm381_vm0, %v5128_v53 }
 0x34d   : > { %v3276_v44 = vpop.permute.xlu1 %3275 }
 0x34e   : > { %v3287_v15 = vadd.f32 %v3276_v44, %v3267_v50  ;;  %v3576_v29 = vpop.permute.xlu2 %3575  ;;  %v3459_v50 = vpop.f32.mrf.mxu0 }
 0x34f   : > { %v3581_v28 = vadd.f32 %v3576_v29, %v3561_v59  ;;  %v3410_v27 = vpop.f32.mrf.mxu2  ;;  %v3670_v20 = vadd.f32 %v7417_v0, %v3459_v50 }
 0x350   : > { %3291 = vst [vmem:[%s5991_s0 + $0x378] sm:$0xff] %v3287_v15  ;;  %v3617_v5 = vadd.f32 %v7401_v1, %v3410_v27  ;;  %v5459_v15 = vmov 58   ;;  %v3240_v27 = vadd.f32 %v7425_v63, %v7518_v56  ;;  %v5462_v56 = vmov 62  }
 0x351   : > { %3585 = vst [vmem:[%s5991_s0 + $0x780] sm:$0xff] %v3581_v28  ;;  %v5460_v28 = vmov 60  }
 0x352   : > { %v3381_v42 = vpop.f32.mrf.mxu1  ;;  %5079 = vset.pattern.permute.xlu0 %v5460_v28 }
 0x353   : > { %5067 = vset.pattern.permute.xlu1 %v5456_v11  ;;  %3771 = vperm.xlu2 %5064, %v7155_v14   ;;  %v3071_v14 = vadd.f32 %v7391_v54, %v7217_v9  ;;  %v3080_v9 = vpop.permute.xlu0 %3079  ;;  %v3589_v59 = vadd.f32 %v7401_v1, %v3381_v42 }
 0x354   : > { %4051 = vperm.xlu1 %5067, %v7208_v58   ;;  %4167 = vperm.xlu0 %5079, %v7623_v30  }
 0x355   : > { %v3091_v17 = vadd.f32 %v3080_v9, %v3071_v14  ;;  %4706 = vmatmul.msk.f32.gmra.mxu3 %vm381_vm0, %v5129_v8  ;;  %v7689_v9 = vpop.f32.mrf.mxu3 }
 0x356   : > { %v3564_v47 = vpop.permute.xlu1 %3563 }
 0x357   : > { %v3578_v52 = vadd.f32 %v3564_v47, %v3558_v43  ;;  %v3600_v7 = vpop.permute.xlu2 %3599  ;;  %3095 = vst [vmem:[%s5991_s0 + $0x340] sm:$0xff] %v3091_v17  ;;  %v5132_v47 = vld [vmem:[#allocation5 + $0x10] sm:$0xff]  ;;  %v3211_v17 = vadd.f32 %v7391_v54, %v7404_v6 }
 0x358   : > { %v3608_v41 = vadd.f32 %v3600_v7, %v3588_v57  ;;  %4699 = vmatmul.msk.f32.gmra.mxu1 %vm381_vm0, %v5132_v47  ;;  %v7680_v7 = vpop.f32.mrf.mxu0 }
 0x359   : > { %3582 = vst [vmem:[%s5991_s0 + $0x180] sm:$0xff] %v3578_v52 }
 0x35a   : > { %3612 = vst [vmem:[%s5991_s0 + $0x588] sm:$0xff] %v3608_v41  ;;  %v7672_v57 = vpop.f32.mrf.mxu1  ;;  %v3616_v41 = vadd.f32 %v7425_v63, %v7605_v61 }
 0x35b   : > { %5068 = vset.pattern.permute.xlu2 %v5456_v11  ;;  %v3788_v11 = vld [vmem:[%s5691_s18 + $0x1f0] sm:$0xff]  ;;  %v3112_v21 = vpop.permute.xlu0 %3111 }
 0x35c   : > { %4063 = vperm.xlu1 %5067, %v7616_v12   ;;  %4055 = vperm.xlu2 %5068, %v7623_v30   ;;  %v3120_v38 = vadd.f32 %v3112_v21, %v3100_v62 }
 0x35d   : > { %4003 = vmatpush.msrb.mxu2 %v3788_v11  ;;  %5083 = vset.pattern.permute.xlu0 %v5461_v33 }
 0x35e   : > { %v3572_v10 = vpop.permute.xlu1 %3571  ;;  %4701 = vmatmul.msk.f32.vlgmr.msrb.gmra.mxu2 %vm381_vm0, %v5128_v53  ;;  %3124 = vst [vmem:[%s5991_s0 + $0x548] sm:$0xff] %v3120_v38  ;;  %4199 = vperm.xlu0 %5083, %v7666_v35  }
 0x35f   : > { %v3580_v4 = vadd.f32 %v3572_v10, %v3560_v46  ;;  %4707 = vmatmul.msk.f32.gmra.mxu3 %vm381_vm0, %v5132_v47 }
 0x360   : > { %v3620_v55 = vpop.permute.xlu2 %3619  ;;  %4700 = vmatmul.msk.f32.gmra.mxu1 %vm381_vm0, %v5133_v36  ;;  %v3465_v11 = vpop.f32.mrf.mxu0 }
 0x361   : > { %3584 = vst [vmem:[%s5991_s0 + $0x580] sm:$0xff] %v3580_v4  ;;  %v3634_v31 = vadd.f32 %v3620_v55, %v3614_v26  ;;  %v3642_v4 = vadd.f32 %v7417_v0, %v7644_v24  ;;  %v3672_v6 = vadd.f32 %v7425_v63, %v3465_v11  ;;  %v3644_v11 = vadd.f32 %v7425_v63, %v7689_v9 }
 0x362   : > { %v3491_v22 = vpop.f32.mrf.mxu1 }
 0x363   : > { %3638 = vst [vmem:[%s5991_s0 + $0x190] sm:$0xff] %v3634_v31  ;;  %v3144_v44 = vpop.permute.xlu0 %3143  ;;  %v3439_v31 = vpop.f32.mrf.mxu3  ;;  %v3699_v42 = vadd.f32 %v7391_v54, %v3491_v22 }
 0x364   : > { %5071 = vset.pattern.permute.xlu1 %v5457_v32  ;;  %5070 = vset.pattern.permute.xlu2 %v5457_v32  ;;  %v3129_v32 = vadd.f32 %v7401_v1, %v7439_v60  ;;  %v7662_v60 = vld [vmem:[%s5709_s14] sm:$0xff] }
 0x365   : > { %4083 = vperm.xlu1 %5071, %v7623_v30   ;;  %4079 = vperm.xlu2 %5070, %v7208_v58  }
 0x366   : > { %4702 = vmatmul.msk.f32.gmra.mxu2 %vm381_vm0, %v5129_v8  ;;  %v3149_v29 = vadd.f32 %v3144_v44, %v3129_v32  ;;  %5086 = vset.pattern.permute.xlu0 %v5462_v56  ;;  %v3671_v44 = vadd.f32 %v7391_v54, %v7680_v7  ;;  %v3698_v7 = vadd.f32 %v7417_v0, %v7672_v57 }
 0x367   : > { %v3596_v18 = vpop.permute.xlu1 %3595  ;;  %4708 = vmatmul.msk.f32.gmra.mxu3 %vm381_vm0, %v5133_v36  ;;  %4231 = vperm.xlu0 %5086, %v7616_v12  }
 0x368   : > { %v3607_v51 = vadd.f32 %v3596_v18, %v3587_v40  ;;  %v3632_v19 = vpop.permute.xlu2 %3631  ;;  %3153 = vst [vmem:[%s5991_s0 + $0x750] sm:$0xff] %v3149_v29 }
 0x369   : > { %v3637_v58 = vadd.f32 %v3632_v19, %v3617_v5  ;;  %v7710_v24 = vpop.f32.mrf.mxu2  ;;  %v3645_v5 = vadd.f32 %v7401_v1, %v3439_v31  ;;  %v3269_v19 = vadd.f32 %v7401_v1, %v7607_v34 }
 0x36a   : > { %3611 = vst [vmem:[%s5991_s0 + $0x388] sm:$0xff] %v3607_v51  ;;  %v3494_v38 = vpop.f32.mrf.mxu1 }
 0x36b   : > { %3641 = vst [vmem:[%s5991_s0 + $0x790] sm:$0xff] %v3637_v58  ;;  %v3188_v48 = vpop.permute.xlu0 %3187  ;;  %v3546_v32 = vpop.f32.mrf.mxu3 }
 0x36c   : > { %v3202_v46 = vadd.f32 %v3188_v48, %v3182_v23 }
 0x36d   : > { %5073 = vset.pattern.permute.xlu1 %v5459_v15  ;;  %4087 = vperm.xlu2 %5070, %v7666_v35  }
 0x36e   : > { %4107 = vperm.xlu1 %5073, %v7662_v60   ;;  %4703 = vmatmul.msk.f32.gmra.mxu2 %vm381_vm0, %v5132_v47  ;;  %3206 = vst [vmem:[%s5991_s0 + $0x160] sm:$0xff] %v3202_v46  ;;  %v3615_v46 = vadd.f32 %v7391_v54, %v7584_v2  ;;  %v3754_v2 = vadd.f32 %v7417_v0, %v3546_v32 }
 0x36f   : > { %v3604_v16 = vpop.permute.xlu1 %3603  ;;  %5089 = vset.pattern.permute.xlu0 %v5463_v39  ;;  %v3726_v32 = vadd.f32 %v7417_v0, %v7710_v24 }
 0x370   : > { %v3609_v43 = vadd.f32 %v3604_v16, %v3589_v59 }
 0x371   : > { %v3652_v52 = vpop.permute.xlu2 %3651  ;;  %v3520_v58 = vpop.f32.mrf.mxu2 }
 0x372   : > { %3613 = vst [vmem:[%s5991_s0 + $0x788] sm:$0xff] %v3609_v43  ;;  %v3663_v14 = vadd.f32 %v3652_v52, %v3643_v45  ;;  %v3497_v59 = vpop.f32.mrf.mxu1  ;;  %v3586_v43 = vadd.f32 %v7417_v0, %v7543_v13 }
 0x373   : > { %v3220_v25 = vpop.permute.xlu0 %3219  ;;  %v3701_v29 = vadd.f32 %v7401_v1, %v3497_v59  ;;  %v7737_v23 = vpop.f32.mrf.mxu3 }
 0x374   : > { %3667 = vst [vmem:[%s5991_s0 + $0x398] sm:$0xff] %v3663_v14  ;;  %v3231_v53 = vadd.f32 %v3220_v25, %v3211_v17  ;;  %v3700_v17 = vadd.f32 %v7425_v63, %v3494_v38  ;;  %v3755_v24 = vadd.f32 %v7391_v54, %v7737_v23 }
 0x375   : > { %5074 = vset.pattern.permute.xlu2 %v5459_v15 }
 0x376   : > { %4115 = vperm.xlu1 %5073, %v7666_v35   ;;  %4111 = vperm.xlu2 %5074, %v7623_v30   ;;  %3235 = vst [vmem:[%s5991_s0 + $0x368] sm:$0xff] %v3231_v53 }
 0x377   : > { %4704 = vmatmul.msk.f32.gmra.mxu2 %vm381_vm0, %v5133_v36 }
 0x378   : > { %v3628_v49 = vpop.permute.xlu1 %3627 }
 0x379   : > { %v3636_v61 = vadd.f32 %v3628_v49, %v3616_v41  ;;  %v3523_v52 = vpop.f32.mrf.mxu2 }
 0x37a   : > { %v3676_v26 = vpop.permute.xlu2 %3675  ;;  %v3728_v13 = vadd.f32 %v7425_v63, %v3523_v52 }
 0x37b   : > { %3640 = vst [vmem:[%s5991_s0 + $0x590] sm:$0xff] %v3636_v61  ;;  %v3690_v10 = vadd.f32 %v3676_v26, %v3670_v20  ;;  %v3252_v18 = vpop.permute.xlu0 %3251  ;;  %v3552_v36 = vpop.f32.mrf.mxu3 }
 0x37c   : > { %v3260_v3 = vadd.f32 %v3252_v18, %v3240_v27  ;;  %v3468_v61 = vpop.f32.mrf.mxu0 }
 0x37d   : > { %3694 = vst [vmem:[%s5991_s0 + $0x1a0] sm:$0xff] %v3690_v10 }
 0x37e   : > { %5076 = vset.pattern.permute.xlu1 %v5458_v37  ;;  %4119 = vperm.xlu2 %5074, %v7616_v12   ;;  %3264 = vst [vmem:[%s5991_s0 + $0x570] sm:$0xff] %v3260_v3 }
 0x37f   : > { %4139 = vperm.xlu1 %5076, %v7623_v30  }
 0x381   : > { %v3648_v62 = vpop.permute.xlu1 %3647  ;;  %v3526_v38 = vpop.f32.mrf.mxu2 }
 0x382   : > { %v3662_v55 = vadd.f32 %v3648_v62, %v3642_v4  ;;  %v3684_v40 = vpop.permute.xlu2 %3683 }
 0x383   : > { %v3692_v21 = vadd.f32 %v3684_v40, %v3672_v6  ;;  %v3284_v15 = vpop.permute.xlu0 %3283  ;;  %v3555_v62 = vpop.f32.mrf.mxu3  ;;  %v3673_v40 = vadd.f32 %v7401_v1, %v3468_v61  ;;  %v7807_v61 = vld [vmem:[%s5702_s28 + $0x8] sm:$0xff] }
 0x384   : > { %3666 = vst [vmem:[%s5991_s0 + $0x198] sm:$0xff] %v3662_v55  ;;  %v3289_v34 = vadd.f32 %v3284_v15, %v3269_v19  ;;  %v3831_v31 = vpop.f32.mrf.mxu0  ;;  %v3757_v9 = vadd.f32 %v7401_v1, %v3555_v62  ;;  %v7814_v62 = vld [vmem:[%s5702_s28] sm:$0xff] }
 0x385   : > { %3696 = vst [vmem:[%s5991_s0 + $0x5a0] sm:$0xff] %v3692_v21 }
 0x386   : > { %5077 = vset.pattern.permute.xlu2 %v5458_v37  ;;  %3293 = vst [vmem:[%s5991_s0 + $0x778] sm:$0xff] %v3289_v34  ;;  %v3756_v34 = vadd.f32 %v7425_v63, %v3552_v36  ;;  %v7802_v36 = vld [vmem:[%s5702_s28 + $0x18] sm:$0xff] }
 0x387   : > { %4147 = vperm.xlu1 %5076, %v7616_v12   ;;  %4143 = vperm.xlu2 %5077, %v7666_v35  }
 0x389   : > { %v3660_v51 = vpop.permute.xlu1 %3659  ;;  %v3860_v18 = vpop.f32.mrf.mxu1 }
 0x38a   : > { %v3665_v8 = vadd.f32 %v3660_v51, %v3645_v5 }
 0x38b   : > { %v3708_v37 = vpop.permute.xlu2 %3707  ;;  %v3592_v14 = vpop.permute.xlu0 %3591 }
 0x38c   : > { %3669 = vst [vmem:[%s5991_s0 + $0x798] sm:$0xff] %v3665_v8  ;;  %v3719_v50 = vadd.f32 %v3708_v37, %v3699_v42  ;;  %v3606_v41 = vadd.f32 %v3592_v14, %v3586_v43  ;;  %v3834_v8 = vpop.f32.mrf.mxu0 }
 0x38d   : > { %v4047_v37 = vadd.f32 %v7391_v54, %v3834_v8 }
 0x38e   : > { %3723 = vst [vmem:[%s5991_s0 + $0x3a8] sm:$0xff] %v3719_v50 }
 0x38f   : > { %5080 = vset.pattern.permute.xlu1 %v5460_v28  ;;  %5078 = vset.pattern.permute.xlu2 %v5460_v28  ;;  %3610 = vst [vmem:[%s5991_s0 + $0x188] sm:$0xff] %v3606_v41 }
 0x390   : > { %4171 = vperm.xlu1 %5080, %v7666_v35   ;;  %4163 = vperm.xlu2 %5078, %v7662_v60  }
 0x391   : > { %v3863_v15 = vpop.f32.mrf.mxu1 }
 0x392   : > { %v3680_v16 = vpop.permute.xlu1 %3679 }
 0x393   : > { %v3691_v45 = vadd.f32 %v3680_v16, %v3671_v44  ;;  %v3716_v47 = vpop.permute.xlu2 %3715  ;;  %v3624_v22 = vpop.permute.xlu0 %3623  ;;  %v4074_v16 = vadd.f32 %v7417_v0, %v3860_v18 }
 0x394   : > { %v3721_v28 = vadd.f32 %v3716_v47, %v3701_v29  ;;  %v3635_v26 = vadd.f32 %v3624_v22, %v3615_v46 }
 0x395   : > { %3695 = vst [vmem:[%s5991_s0 + $0x3a0] sm:$0xff] %v3691_v45  ;;  %v3837_v45 = vpop.f32.mrf.mxu0 }
 0x396   : > { %3725 = vst [vmem:[%s5991_s0 + $0x7a8] sm:$0xff] %v3721_v28 }
 0x397   : > { %3639 = vst [vmem:[%s5991_s0 + $0x390] sm:$0xff] %v3635_v26 }
 0x398   : > { %5081 = vset.pattern.permute.xlu1 %v5461_v33  ;;  %4175 = vperm.xlu2 %5078, %v7616_v12  }
 0x399   : > { %4191 = vperm.xlu1 %5081, %v7662_v60  }
 0x39b   : > { %v3704_v48 = vpop.permute.xlu1 %3703  ;;  %v3656_v6 = vpop.permute.xlu0 %3655 }
 0x39c   : > { %v3718_v49 = vadd.f32 %v3704_v48, %v3698_v7  ;;  %v3740_v20 = vpop.permute.xlu2 %3739  ;;  %v3664_v55 = vadd.f32 %v3656_v6, %v3644_v11  ;;  %v4046_v7 = vadd.f32 %v7417_v0, %v3831_v31  ;;  %v4075_v6 = vadd.f32 %v7807_v61, %v3863_v15 }
 0x39d   : > { %v3748_v57 = vadd.f32 %v3740_v20, %v3728_v13  ;;  %v3840_v13 = vpop.f32.mrf.mxu0 }
 0x39e   : > { %3722 = vst [vmem:[%s5991_s0 + $0x1a8] sm:$0xff] %v3718_v49 }
 0x39f   : > { %3752 = vst [vmem:[%s5991_s0 + $0x5b0] sm:$0xff] %v3748_v57 }
 0x3a0   : > { %5082 = vset.pattern.permute.xlu2 %v5461_v33  ;;  %v3727_v33 = vadd.f32 %v7391_v54, %v3520_v58  ;;  %3668 = vst [vmem:[%s5991_s0 + $0x598] sm:$0xff] %v3664_v55  ;;  %v7780_v58 = vpop.f32.mrf.mxu2  ;;  %v4048_v54 = vadd.f32 %v7425_v63, %v3837_v45 }
 0x3a1   : > { %4203 = vperm.xlu1 %5081, %v7616_v12   ;;  %4195 = vperm.xlu2 %5082, %v7623_v30  }
 0x3a3   : > { %v3712_v10 = vpop.permute.xlu1 %3711  ;;  %v3688_v51 = vpop.permute.xlu0 %3687 }
 0x3a4   : > { %v3720_v4 = vadd.f32 %v3712_v10, %v3700_v17  ;;  %v3693_v42 = vadd.f32 %v3688_v51, %v3673_v40 }
 0x3a5   : > { %v3760_v25 = vpop.permute.xlu2 %3759 }
 0x3a6   : > { %3724 = vst [vmem:[%s5991_s0 + $0x5a8] sm:$0xff] %v3720_v4  ;;  %v3774_v53 = vadd.f32 %v3760_v25, %v3754_v2 }
 0x3a7   : > { %3697 = vst [vmem:[%s5991_s0 + $0x7a0] sm:$0xff] %v3693_v42  ;;  %v4102_v42 = vadd.f32 %v7814_v62, %v7780_v58 }
 0x3a8   : > { %3778 = vst [vmem:[%s5991_s0 + $0x1b8] sm:$0xff] %v3774_v53  ;;  %v3892_v47 = vpop.f32.mrf.mxu2  ;;  %v3947_v26 = vpop.f32.mrf.mxu0 }
 0x3a9   : > { %5085 = vset.pattern.permute.xlu1 %v5462_v56  ;;  %5084 = vset.pattern.permute.xlu2 %v5462_v56  ;;  %v3729_v56 = vadd.f32 %v7401_v1, %v3526_v38  ;;  %v4103_v22 = vadd.f32 %v7807_v61, %v3892_v47  ;;  %v4158_v15 = vadd.f32 %v7814_v62, %v3947_v26 }
 0x3aa   : > { %4223 = vperm.xlu1 %5085, %v7623_v30   ;;  %4219 = vperm.xlu2 %5084, %v7662_v60  }
 0x3ab   : > { %v3732_v59 = vpop.permute.xlu0 %3731 }
 0x3ac   : > { %v3736_v27 = vpop.permute.xlu1 %3735 }
 0x3ad   : > { %v3747_v21 = vadd.f32 %v3736_v27, %v3727_v33  ;;  %v3772_v5 = vpop.permute.xlu2 %3771  ;;  %v3918_v49 = vpop.f32.mrf.mxu3 }
 0x3ae   : > { %v3777_v3 = vadd.f32 %v3772_v5, %v3757_v9  ;;  %v4130_v55 = vadd.f32 %v7814_v62, %v3918_v49 }
 0x3af   : > { %3751 = vst [vmem:[%s5991_s0 + $0x3b0] sm:$0xff] %v3747_v21 }
 0x3b0   : > { %3781 = vst [vmem:[%s5991_s0 + $0x7b8] sm:$0xff] %v3777_v3  ;;  %v3895_v57 = vpop.f32.mrf.mxu2  ;;  %v3950_v18 = vpop.f32.mrf.mxu0 }
 0x3b2   : > { %5087 = vset.pattern.permute.xlu1 %v5463_v39  ;;  %4227 = vperm.xlu2 %5084, %v7666_v35  }
 0x3b3   : > { %4247 = vperm.xlu1 %5087, %v7662_v60   ;;  %v3746_v60 = vadd.f32 %v3732_v59, %v3726_v32  ;;  %v3764_v28 = vpop.permute.xlu0 %3763 }
 0x3b4   : > { %v3744_v19 = vpop.permute.xlu1 %3743 }
 0x3b5   : > { %v3749_v50 = vadd.f32 %v3744_v19, %v3729_v56  ;;  %3750 = vst [vmem:[%s5991_s0 + $0x1b0] sm:$0xff] %v3746_v60  ;;  %v3921_v4 = vpop.f32.mrf.mxu3  ;;  %v7826_v56 = vld [vmem:[%s5702_s28 + $0x10] sm:$0xff] }
 0x3b6   : > { %v4056_v1 = vpop.permute.xlu2 %4055  ;;  %v4104_v59 = vadd.f32 %v7826_v56, %v3895_v57  ;;  %v4131_v45 = vadd.f32 %v7807_v61, %v3921_v4 }
 0x3b7   : > { %3753 = vst [vmem:[%s5991_s0 + $0x7b0] sm:$0xff] %v3749_v50  ;;  %v4067_v44 = vadd.f32 %v4056_v1, %v4047_v37 }
 0x3b8   : > { %v3898_v25 = vpop.f32.mrf.mxu2  ;;  %v3953_v1 = vpop.f32.mrf.mxu0 }
 0x3b9   : > { %4071 = vst [vmem:[%s5991_s0 + $0x3c0] sm:$0xff] %v4067_v44  ;;  %v4105_v31 = vadd.f32 %v7802_v36, %v3898_v25 }
 0x3ba   : > { %5088 = vset.pattern.permute.xlu2 %v5463_v39  ;;  %v3866_v39 = vpop.f32.mrf.mxu1 }
 0x3bb   : > { %4255 = vperm.xlu1 %5087, %v7666_v35   ;;  %4251 = vperm.xlu2 %5088, %v7623_v30   ;;  %v3775_v35 = vadd.f32 %v3764_v28, %v3755_v24  ;;  %v4076_v30 = vadd.f32 %v7425_v63, %v3866_v39  ;;  %v4060_v48 = vpop.permute.xlu0 %4059 }
 0x3bc   : > { %v4068_v20 = vadd.f32 %v4060_v48, %v4048_v54 }
 0x3bd   : > { %v3768_v29 = vpop.permute.xlu1 %3767  ;;  %3779 = vst [vmem:[%s5991_s0 + $0x3b8] sm:$0xff] %v3775_v35  ;;  %v3924_v51 = vpop.f32.mrf.mxu3 }
 0x3be   : > { %v3776_v43 = vadd.f32 %v3768_v29, %v3756_v34  ;;  %4072 = vst [vmem:[%s5991_s0 + $0x5c0] sm:$0xff] %v4068_v20  ;;  %v4132_v8 = vadd.f32 %v7826_v56, %v3924_v51 }
 0x3bf   : > { %v4080_v52 = vpop.permute.xlu2 %4079 }
 0x3c0   : > { %3780 = vst [vmem:[%s5991_s0 + $0x5b8] sm:$0xff] %v3776_v43  ;;  %v4094_v14 = vadd.f32 %v4080_v52, %v4074_v16  ;;  %v3956_v29 = vpop.f32.mrf.mxu0 }
 0x3c1   : > { %v4161_v43 = vadd.f32 %v7802_v36, %v3956_v29 }
 0x3c2   : > { %4098 = vst [vmem:[%s5991_s0 + $0x1c8] sm:$0xff] %v4094_v14  ;;  %v3869_v53 = vpop.f32.mrf.mxu1  ;;  %v4159_v14 = vadd.f32 %v7807_v61, %v3950_v18 }
 0x3c3   : > { %4259 = vperm.xlu2 %5088, %v7616_v12   ;;  %v4049_v12 = vadd.f32 %v7802_v36, %v3840_v13  ;;  %v4092_v2 = vpop.permute.xlu0 %4091  ;;  %v4077_v33 = vadd.f32 %v7802_v36, %v3869_v53 }
 0x3c5   : > { %v4097_v9 = vadd.f32 %v4092_v2, %v4077_v33 }
 0x3c6   : > { %v4052_v23 = vpop.permute.xlu1 %4051  ;;  %v3927_v35 = vpop.f32.mrf.mxu3 }
 0x3c7   : > { %v4066_v41 = vadd.f32 %v4052_v23, %v4046_v7  ;;  %v4088_v46 = vpop.permute.xlu2 %4087  ;;  %4101 = vst [vmem:[%s5991_s0 + $0x7c8] sm:$0xff] %v4097_v9  ;;  %v4133_v54 = vadd.f32 %v7802_v36, %v3927_v35 }
 0x3c8   : > { %v4096_v0 = vadd.f32 %v4088_v46, %v4076_v30 }
 0x3c9   : > { %4070 = vst [vmem:[%s5991_s0 + $0x1c0] sm:$0xff] %v4066_v41 }
 0x3ca   : > { %4100 = vst [vmem:[%s5991_s0 + $0x5c8] sm:$0xff] %v4096_v0  ;;  %v3976_v44 = vpop.f32.mrf.mxu1 }
 0x3cb   : > { %v4136_v40 = vpop.permute.xlu0 %4135 }
 0x3cc   : > { %v4150_v38 = vadd.f32 %v4136_v40, %v4130_v55 }
 0x3ce   : > { %v4064_v63 = vpop.permute.xlu1 %4063  ;;  %4154 = vst [vmem:[%s5991_s0 + $0x1d8] sm:$0xff] %v4150_v38 }
 0x3cf   : > { %v4069_v17 = vadd.f32 %v4064_v63, %v4049_v12  ;;  %v4034_v49 = vpop.f32.mrf.mxu3  ;;  %v4160_v63 = vadd.f32 %v7826_v56, %v3953_v1 }
 0x3d0   : > { %v4112_v10 = vpop.permute.xlu2 %4111 }
 0x3d1   : > { %4073 = vst [vmem:[%s5991_s0 + $0x7c0] sm:$0xff] %v4069_v17  ;;  %v4123_v11 = vadd.f32 %v4112_v10, %v4103_v22 }
 0x3d2   : > { %v3979_v28 = vpop.f32.mrf.mxu1 }
 0x3d3   : > { %4127 = vst [vmem:[%s5991_s0 + $0x3d0] sm:$0xff] %v4123_v11  ;;  %v4168_v30 = vpop.permute.xlu0 %4167  ;;  %v4187_v48 = vadd.f32 %v7807_v61, %v3979_v28 }
 0x3d4   : > { %v4179_v41 = vadd.f32 %v4168_v30, %v4159_v14 }
 0x3d6   : > { %4183 = vst [vmem:[%s5991_s0 + $0x3e0] sm:$0xff] %v4179_v41 }
 0x3d7   : > { %v4084_v27 = vpop.permute.xlu1 %4083 }
 0x3d8   : > { %v4095_v21 = vadd.f32 %v4084_v27, %v4075_v6  ;;  %v4120_v5 = vpop.permute.xlu2 %4119  ;;  %v4037_v4 = vpop.f32.mrf.mxu3  ;;  %v4186_v6 = vadd.f32 %v7814_v62, %v3976_v44 }
 0x3d9   : > { %v4125_v3 = vadd.f32 %v4120_v5, %v4105_v31 }
 0x3da   : > { %4099 = vst [vmem:[%s5991_s0 + $0x3c8] sm:$0xff] %v4095_v21  ;;  %v3982_v20 = vpop.f32.mrf.mxu1 }
 0x3db   : > { %4129 = vst [vmem:[%s5991_s0 + $0x7d0] sm:$0xff] %v4125_v3  ;;  %v4188_v57 = vadd.f32 %v7826_v56, %v3982_v20  ;;  %v4200_v22 = vpop.permute.xlu0 %4199 }
 0x3dd   : > { %v4208_v17 = vadd.f32 %v4200_v22, %v4188_v57 }
 0x3df   : > { %4212 = vst [vmem:[%s5991_s0 + $0x5e8] sm:$0xff] %v4208_v17 }
 0x3e0   : > { %v4108_v32 = vpop.permute.xlu1 %4107 }
 0x3e1   : > { %v4122_v19 = vadd.f32 %v4108_v32, %v4102_v42  ;;  %v4144_v37 = vpop.permute.xlu2 %4143  ;;  %v4005_v16 = vpop.f32.mrf.mxu2 }
 0x3e2   : > { %v4152_v50 = vadd.f32 %v4144_v37, %v4132_v8  ;;  %v4214_v10 = vadd.f32 %v7814_v62, %v4005_v16  ;;  %v3985_v40 = vpop.f32.mrf.mxu1  ;;  %v4040_v5 = vpop.f32.mrf.mxu3  ;;  %v4243_v8 = vadd.f32 %v7807_v61, %v4037_v4 }
 0x3e3   : > { %4126 = vst [vmem:[%s5991_s0 + $0x1d0] sm:$0xff] %v4122_v19  ;;  %v4232_v18 = vpop.permute.xlu0 %4231  ;;  %v4189_v3 = vadd.f32 %v7802_v36, %v3985_v40 }
 0x3e4   : > { %4156 = vst [vmem:[%s5991_s0 + $0x5d8] sm:$0xff] %v4152_v50 }
 0x3e8   : > { %v4116_v60 = vpop.permute.xlu1 %4115 }
 0x3e9   : > { %v4124_v58 = vadd.f32 %v4116_v60, %v4104_v59  ;;  %v4008_v23 = vpop.f32.mrf.mxu2 }
 0x3ea   : > { %v4164_v34 = vpop.permute.xlu2 %4163  ;;  %v4043_v50 = vpop.f32.mrf.mxu3  ;;  %v4215_v1 = vadd.f32 %v7807_v61, %v4008_v23 }
 0x3eb   : > { %4128 = vst [vmem:[%s5991_s0 + $0x5d0] sm:$0xff] %v4124_v58  ;;  %v4178_v24 = vadd.f32 %v4164_v34, %v4158_v15  ;;  %v4245_v59 = vadd.f32 %v7802_v36, %v4043_v50  ;;  %v4242_v34 = vadd.f32 %v7814_v62, %v4034_v49 }
 0x3ed   : > { %4182 = vst [vmem:[%s5991_s0 + $0x1e0] sm:$0xff] %v4178_v24 }
 0x3f1   : > { %v4140_v47 = vpop.permute.xlu1 %4139  ;;  %v4011_v26 = vpop.f32.mrf.mxu2 }
 0x3f2   : > { %v4151_v52 = vadd.f32 %v4140_v47, %v4131_v45  ;;  %v4176_v39 = vpop.permute.xlu2 %4175  ;;  %v4216_v33 = vadd.f32 %v7826_v56, %v4011_v26 }
 0x3f3   : > { %v4181_v7 = vadd.f32 %v4176_v39, %v4161_v43 }
 0x3f4   : > { %4155 = vst [vmem:[%s5991_s0 + $0x3d8] sm:$0xff] %v4151_v52 }
 0x3f5   : > { %4185 = vst [vmem:[%s5991_s0 + $0x7e0] sm:$0xff] %v4181_v7 }
 0x3f9   : > { %v4148_v13 = vpop.permute.xlu1 %4147 }
 0x3fa   : > { %v4153_v46 = vadd.f32 %v4148_v13, %v4133_v54  ;;  %v4014_v55 = vpop.f32.mrf.mxu2 }
 0x3fb   : > { %v4196_v0 = vpop.permute.xlu2 %4195  ;;  %v4217_v27 = vadd.f32 %v7802_v36, %v4014_v55  ;;  %v4244_v36 = vadd.f32 %v7826_v56, %v4040_v5 }
 0x3fc   : > { %4157 = vst [vmem:[%s5991_s0 + $0x7d8] sm:$0xff] %v4153_v46  ;;  %v4207_v12 = vadd.f32 %v4196_v0, %v4187_v48 }
 0x3fd   : > { %v4237_v51 = vadd.f32 %v4232_v18, %v4217_v27 }
 0x3fe   : > { %4211 = vst [vmem:[%s5991_s0 + $0x3e8] sm:$0xff] %v4207_v12 }
 0x3ff   : > { %4241 = vst [vmem:[%s5991_s0 + $0x7f0] sm:$0xff] %v4237_v51 }
 0x402   : > { %v4172_v2 = vpop.permute.xlu1 %4171 }
 0x403   : > { %v4180_v11 = vadd.f32 %v4172_v2, %v4160_v63 }
 0x404   : > { %v4220_v25 = vpop.permute.xlu2 %4219 }
 0x405   : > { %4184 = vst [vmem:[%s5991_s0 + $0x5e0] sm:$0xff] %v4180_v11  ;;  %v4234_v53 = vadd.f32 %v4220_v25, %v4214_v10 }
 0x407   : > { %4238 = vst [vmem:[%s5991_s0 + $0x1f0] sm:$0xff] %v4234_v53 }
 0x40b   : > { %v4192_v31 = vpop.permute.xlu1 %4191 }
 0x40c   : > { %v4206_v9 = vadd.f32 %v4192_v31, %v4186_v6  ;;  %v4228_v21 = vpop.permute.xlu2 %4227 }
 0x40d   : > { %v4236_v38 = vadd.f32 %v4228_v21, %v4216_v33 }
 0x40e   : > { %4210 = vst [vmem:[%s5991_s0 + $0x1e8] sm:$0xff] %v4206_v9 }
 0x40f   : > { %4240 = vst [vmem:[%s5991_s0 + $0x5f0] sm:$0xff] %v4236_v38 }
 0x413   : > { %v4204_v42 = vpop.permute.xlu1 %4203 }
 0x414   : > { %v4209_v32 = vadd.f32 %v4204_v42, %v4189_v3 }
 0x415   : > { %v4252_v19 = vpop.permute.xlu2 %4251 }
 0x416   : > { %4213 = vst [vmem:[%s5991_s0 + $0x7e8] sm:$0xff] %v4209_v32  ;;  %v4263_v37 = vadd.f32 %v4252_v19, %v4243_v8 }
 0x418   : > { %4267 = vst [vmem:[%s5991_s0 + $0x3f8] sm:$0xff] %v4263_v37 }
 0x41c   : > { %v4224_v44 = vpop.permute.xlu1 %4223 }
 0x41d   : > { %v4235_v15 = vadd.f32 %v4224_v44, %v4215_v1  ;;  %v4260_v60 = vpop.permute.xlu2 %4259 }
 0x41e   : > { %v4265_v58 = vadd.f32 %v4260_v60, %v4245_v59 }
 0x41f   : > { %4239 = vst [vmem:[%s5991_s0 + $0x3f0] sm:$0xff] %v4235_v15 }
 0x420   : > { %4269 = vst [vmem:[%s5991_s0 + $0x7f8] sm:$0xff] %v4265_v58 }
 0x425   : > { %v4248_v61 = vpop.permute.xlu1 %4247 }
 0x426   : > { %v4262_v24 = vadd.f32 %v4248_v61, %v4242_v34 }
 0x428   : > { %4266 = vst [vmem:[%s5991_s0 + $0x1f8] sm:$0xff] %v4262_v24 }
 0x42d   : > { %v4256_v29 = vpop.permute.xlu1 %4255 }
 0x42e   : > { %v4264_v16 = vadd.f32 %v4256_v29, %v4244_v36 }
 0x430   : > { %4268 = vst [vmem:[%s5991_s0 + $0x5f8] sm:$0xff] %v4264_v16 }
 0x431   : > { %5285 = shalt.err (!%p5282_p5)
}
 0x432   : > { %s5464_s2 = smov 8192   ;;  %s5465_s12 = smov 16384  }
 0x433   : > { %s5466_s28 = smov 512  }
 0x434   : > { %4726 = dma.vmem_to_hbm [thread:$0]  (%p5646_p7), %s4286_s8, 32768, %s4288_s21, %s4271_s22, %s5464_s2, %s5465_s12, %s5466_s28  }
 0x435 PF: > { %s7963_s10 = sld [smem:[#allocation16_spill]]  ;;  %p4749_p6 = scmp.ge.s32.totalorder %s5392_s25, 2 }
 0x437   : > { %p4743_p10 = pnand %p4749_p6, %p5650_p9 }
 0x439   : > { %p4744_p12 = pneg %p4743_p10 }
 0x43b   : > { %s4302_s0 = sand.u32 1, %s7963_s10  }
 0x43c   : > { %s4303_s30 = scalar_lea.sflag [#allocation4], %s4302_s0 }
 0x43d   : > { %5347 = dma.done.wait (%p4744_p12), %s4303_s30, 32768  }
 0x43e   : > { %5349 = vsyncadd (%p4744_p12), %s4303_s30, 4294934528  ;;  %s21_s25 = sadd.s32 1, %s5392_s25   ;;  %s7965_s5 = sld [smem:[#allocation15_spill]] }
 0x43f   : > { %p18_p1 = scmp.ge.s32.totalorder %s21_s25, 6   ;;  %s7966_s17 = sld [smem:[#allocation21_spill]] }
 0x440   : > { %s7967_s29 = sld [smem:[#allocation17_spill]]  ;;  %s7971_s15 = smov %s5356_s16 }
 0x441   : > { %s7968_s20 = sld [smem:[#allocation20_spill]]  ;;  %s7973_s18 = smov %s5368_s19 }
 0x442   : > { %s7969_s9 = sld [smem:[#allocation18_spill]]  ;;  %s7975_s21 = smov %s5384_s23 }
 0x443   : > { %s7970_s7 = sld [smem:[#allocation19_spill]]  ;;  %s7976_s22 = smov %s5388_s24 }
 0x444   : > { %s7972_s16 = smov %s7965_s5 }
 0x445   :  { %20 = sbr.rel (!%p18_p1) target bundleno = 14 (0xe), region = 107 }
 0x446   : > { %s7974_s19 = smov %s7967_s29 }
 0x448   : > { %s7977_s23 = smov %s7969_s9 }
 0x449   : > { %s7978_s24 = smov %s7970_s7 }
 0x44a   :  { %4309 = vsyncpa [#allocation3], 1 }
 0x44b   :  { %4311 = vsyncpa [#allocation3 + $0x1], 1 }
 0x44c   :  { %4312 = vsyncpa [#allocation6], 1 }
 0x44d   :  { %4313 = vsyncpa [#allocation4], 1 }
 0x44e   :  { %4315 = vsyncpa [#allocation4 + $0x1], 1 }

</bundles_post_ra>
